<compile_context>
chip_gen: v7x
topology: tpu7x:2x2x1
jax: 0.10.0
libtpu: 0.0.40
codegen_flags: <defaults>
</compile_context>

<pallas_src>
import math

import jax
import jax.numpy as jnp
from jax.experimental import pallas as pl
from jax.experimental.pallas import tpu as pltpu

# ----------------------------- model config ---------------------------------
B = 2            # batch
C = 3            # image channels
IMG = 16         # image height/width
PATCH = 8        # patch size -> 2x2 = 4 patches
HIDDEN = 32      # backbone hidden_dim
HEADS = 4        # attention heads
DH = HIDDEN // HEADS
MLP = 64         # encoder MLP dim
LAYERS = 2       # encoder depth
RACES = 5        # num_races
LN_EPS = 1e-6    # torchvision ViT LayerNorm eps

NP = (IMG // PATCH) ** 2          # patches per image = 4
S = NP + 1                        # tokens per image (cls + patches) = 5
BS = B * S                        # flattened token rows = 10
HEAD_HID = 128 + 64 + 128         # concatenated head hidden width = 320
OUT_PAD = 128                     # lane-dense fused head output width
NEG_INF = -1e9                    # additive mask value (exp underflows to 0)

_VMEM = pl.BlockSpec(memory_space=pltpu.MemorySpace.VMEM)


# ----------------------------- in-kernel helpers ------------------------------
def _ln(x, g, b):
    mu = jnp.mean(x, axis=-1, keepdims=True)
    xc = x - mu
    var = jnp.mean(xc * xc, axis=-1, keepdims=True)
    return xc * jax.lax.rsqrt(var + LN_EPS) * g + b


def _gelu(x):
    # exact (erf) GELU, matching torch.nn.GELU() default
    return 0.5 * x * (1.0 + jax.lax.erf(x * (1.0 / math.sqrt(2.0))))


# ----------------------------- fused kernel -----------------------------------
def _fused_vit_kernel(
    xp_ref, bias_ref, conv_w_ref, conv_b_ref, cls_ref, pos_ref,
    ln1_g_ref, ln1_b_ref,
    wq_ref, wk_ref, wv_ref, bq_ref, bk_ref, bv_ref,
    wo_ref, bo_ref,
    ln2_g_ref, ln2_b_ref,
    w_m1_ref, b_m1_ref, w_m2_ref, b_m2_ref,
    lnf_g_ref, lnf_b_ref,
    hw1_ref, hb1_ref, hw2_ref, hb2_ref,
    out_ref,
    h_ref, feats_ref,
):
    f32 = jnp.float32
    scale = 1.0 / math.sqrt(DH)

    # ---- patch embedding + cls token + positional embedding (assembled in VMEM) ----
    cls_row = cls_ref[...] + pos_ref[0:1, :]          # (1, HIDDEN)
    pos_patch = pos_ref[1:S, :]                       # (NP, HIDDEN)
    for b in range(B):
        tok_b = jnp.dot(xp_ref[b * NP:(b + 1) * NP, :], conv_w_ref[...],
                        preferred_element_type=f32) + conv_b_ref[...]
        h_ref[b * S:b * S + 1, :] = cls_row
        h_ref[b * S + 1:(b + 1) * S, :] = tok_b + pos_patch
    # TODO(synk): encoder-input Dropout omitted (inference mode -> identity).

    h = h_ref[...]                                    # (BS, HIDDEN)
    bias = bias_ref[...]                              # (BS, BS) block-diag 0 / -1e9 mask

    # ---- encoder layers (statically unrolled, everything stays in vregs/VMEM) ----
    for l in range(LAYERS):
        y = _ln(h, ln1_g_ref[l], ln1_b_ref[l])
        attn = jnp.zeros((BS, HIDDEN), f32)
        for hd in range(HEADS):
            i = l * HEADS + hd
            q = jnp.dot(y, wq_ref[i], preferred_element_type=f32) + bq_ref[i]   # (BS, DH)
            k = jnp.dot(y, wk_ref[i], preferred_element_type=f32) + bk_ref[i]
            v = jnp.dot(y, wv_ref[i], preferred_element_type=f32) + bv_ref[i]
            s = jax.lax.dot_general(q, k, (((1,), (1,)), ((), ())),
                                    preferred_element_type=f32) * scale + bias  # (BS, BS)
            s = s - jnp.max(s, axis=-1, keepdims=True)
            p = jnp.exp(s)
            p = p * pl.reciprocal(jnp.sum(p, axis=-1, keepdims=True), approx=True)
            o = jnp.dot(p, v, preferred_element_type=f32)                        # (BS, DH)
            # out-projection merged per head: concat(heads) @ Wo == sum_h o_h @ Wo_h
            attn = attn + jnp.dot(o, wo_ref[i], preferred_element_type=f32)
        attn = attn + bo_ref[l]
        h = h + attn          # TODO(synk): attention Dropout omitted (inference identity).

        y = _ln(h, ln2_g_ref[l], ln2_b_ref[l])
        m = _gelu(jnp.dot(y, w_m1_ref[l], preferred_element_type=f32) + b_m1_ref[l])
        m = jnp.dot(m, w_m2_ref[l], preferred_element_type=f32) + b_m2_ref[l]
        h = h + m

    # ---- final LN on the class tokens + fused age/gender/race heads ----
    h_ref[...] = h
    for b in range(B):
        feats_ref[b:b + 1, :] = h_ref[b * S:b * S + 1, :]     # class token of each image
    feats = _ln(feats_ref[...], lnf_g_ref[...], lnf_b_ref[...])                  # (B, HIDDEN)
    z = _gelu(jnp.dot(feats, hw1_ref[...], preferred_element_type=f32) + hb1_ref[...])  # (B, 320)
    # single lane-dense (B, 128) store; real columns: [age, gender, race0..race4]
    out_ref[...] = jnp.dot(z, hw2_ref[...], preferred_element_type=f32) + hb2_ref[...]


# ----------------------------- parameters ------------------------------------
def init_params(key):
    def nrm(k, shape, std=0.02):
        return std * jax.random.normal(k, shape, dtype=jnp.float32)

    keys = iter(jax.random.split(key, 64))
    n_tok = (IMG // PATCH) ** 2 + 1

    P = {
        # patch-embedding conv as (C*p*p, HIDDEN) matmul weight (row order = (C, ph, pw))
        "conv_w": nrm(next(keys), (C * PATCH * PATCH, HIDDEN)),
        "conv_b": jnp.zeros((HIDDEN,), jnp.float32),
        "cls": jnp.zeros((1, 1, HIDDEN), jnp.float32),
        "pos": nrm(next(keys), (1, n_tok, HIDDEN)),
        "ln_g": jnp.ones((HIDDEN,), jnp.float32),
        "ln_b": jnp.zeros((HIDDEN,), jnp.float32),
        "layers": [],
    }
    for _ in range(LAYERS):
        P["layers"].append(dict(
            ln1_g=jnp.ones((HIDDEN,), jnp.float32), ln1_b=jnp.zeros((HIDDEN,), jnp.float32),
            w_qkv=nrm(next(keys), (HIDDEN, 3 * HIDDEN)), b_qkv=jnp.zeros((3 * HIDDEN,), jnp.float32),
            w_o=nrm(next(keys), (HIDDEN, HIDDEN)), b_o=jnp.zeros((HIDDEN,), jnp.float32),
            ln2_g=jnp.ones((HIDDEN,), jnp.float32), ln2_b=jnp.zeros((HIDDEN,), jnp.float32),
            w_m1=nrm(next(keys), (HIDDEN, MLP)), b_m1=jnp.zeros((MLP,), jnp.float32),
            w_m2=nrm(next(keys), (MLP, HIDDEN)), b_m2=jnp.zeros((HIDDEN,), jnp.float32),
        ))
    P["age"] = dict(w1=nrm(next(keys), (HIDDEN, 128)), b1=jnp.zeros((128,), jnp.float32),
                    w2=nrm(next(keys), (128, 1)), b2=jnp.zeros((1,), jnp.float32))
    P["gender"] = dict(w1=nrm(next(keys), (HIDDEN, 64)), b1=jnp.zeros((64,), jnp.float32),
                       w2=nrm(next(keys), (64, 1)), b2=jnp.zeros((1,), jnp.float32))
    P["race"] = dict(w1=nrm(next(keys), (HIDDEN, 128)), b1=jnp.zeros((128,), jnp.float32),
                     w2=nrm(next(keys), (128, RACES)), b2=jnp.zeros((RACES,), jnp.float32))
    return P


def _pack_params(P):
    """Repack PyTorch-layout params into the fused-kernel layout (tiny XLA-side ops)."""
    # per-(layer, head) Q/K/V columns and out-projection rows
    wq, wk, wv, bq, bk, bv, wo = [], [], [], [], [], [], []
    for L in P["layers"]:
        w, b = L["w_qkv"], L["b_qkv"]
        for part, (wd, bd) in enumerate(((wq, bq), (wk, bk), (wv, bv))):
            wd.append(w[:, part * HIDDEN:(part + 1) * HIDDEN]
                      .reshape(HIDDEN, HEADS, DH).transpose(1, 0, 2))          # (H, HIDDEN, DH)
            bd.append(b[part * HIDDEN:(part + 1) * HIDDEN].reshape(HEADS, 1, DH))
        wo.append(L["w_o"].reshape(HEADS, DH, HIDDEN))                          # (H, DH, HIDDEN)

    def stack(name, shape):
        return jnp.stack([L[name] for L in P["layers"]]).reshape(shape)

    pk = dict(
        wq=jnp.concatenate(wq, 0), wk=jnp.concatenate(wk, 0), wv=jnp.concatenate(wv, 0),
        bq=jnp.concatenate(bq, 0), bk=jnp.concatenate(bk, 0), bv=jnp.concatenate(bv, 0),
        wo=jnp.concatenate(wo, 0),
        bo=stack("b_o", (LAYERS, 1, HIDDEN)),
        ln1_g=stack("ln1_g", (LAYERS, 1, HIDDEN)), ln1_b=stack("ln1_b", (LAYERS, 1, HIDDEN)),
        ln2_g=stack("ln2_g", (LAYERS, 1, HIDDEN)), ln2_b=stack("ln2_b", (LAYERS, 1, HIDDEN)),
        w_m1=stack("w_m1", (LAYERS, HIDDEN, MLP)), b_m1=stack("b_m1", (LAYERS, 1, MLP)),
        w_m2=stack("w_m2", (LAYERS, MLP, HIDDEN)), b_m2=stack("b_m2", (LAYERS, 1, HIDDEN)),
    )

    # fused heads: one concatenated first matmul + block-diagonal, lane-padded second matmul
    a1 = P["age"]["w1"].shape[1]       # 128
    g1 = P["gender"]["w1"].shape[1]    # 64
    pk["hw1"] = jnp.concatenate([P["age"]["w1"], P["gender"]["w1"], P["race"]["w1"]], axis=1)
    pk["hb1"] = jnp.concatenate([P["age"]["b1"], P["gender"]["b1"], P["race"]["b1"]],
                                axis=0).reshape(1, HEAD_HID)
    hw2 = jnp.zeros((HEAD_HID, OUT_PAD), jnp.float32)
    hw2 = hw2.at[0:a1, 0:1].set(P["age"]["w2"])
    hw2 = hw2.at[a1:a1 + g1, 1:2].set(P["gender"]["w2"])
    hw2 = hw2.at[a1 + g1:HEAD_HID, 2:2 + RACES].set(P["race"]["w2"])
    pk["hw2"] = hw2
    hb2 = jnp.zeros((OUT_PAD,), jnp.float32)
    hb2 = hb2.at[0].set(P["age"]["b2"][0]).at[1].set(P["gender"]["b2"][0])
    hb2 = hb2.at[2:2 + RACES].set(P["race"]["b2"])
    pk["hb2"] = hb2.reshape(1, OUT_PAD)
    return pk


# ----------------------------- forward pass -----------------------------------
def multitask_vit_forward(x, P):
    Bn, Cn, H, W = x.shape
    p = PATCH
    nH, nW = H // p, W // p

    # Conv2d(kernel=stride=p) == matmul over flattened (C, ph, pw) patches.
    # TODO(synk): patch extraction stays as one XLA reshape/transpose feeding the fused kernel.
    xp = x.reshape(Bn, Cn, nH, p, nW, p).transpose(0, 2, 4, 1, 3, 5)
    xp = xp.reshape(Bn * nH * nW, Cn * p * p)

    pk = _pack_params(P)

    # block-diagonal additive mask so flattened (B*S) rows never attend across images
    rb = jnp.arange(BS, dtype=jnp.int32) // S
    attn_bias = jnp.where(rb[:, None] == rb[None, :], 0.0, NEG_INF).astype(jnp.float32)

    inputs = (
        xp, attn_bias,
        P["conv_w"], P["conv_b"].reshape(1, HIDDEN),
        P["cls"].reshape(1, HIDDEN), P["pos"].reshape(S, HIDDEN),
        pk["ln1_g"], pk["ln1_b"],
        pk["wq"], pk["wk"], pk["wv"], pk["bq"], pk["bk"], pk["bv"],
        pk["wo"], pk["bo"],
        pk["ln2_g"], pk["ln2_b"],
        pk["w_m1"], pk["b_m1"], pk["w_m2"], pk["b_m2"],
        P["ln_g"].reshape(1, HIDDEN), P["ln_b"].reshape(1, HIDDEN),
        pk["hw1"], pk["hb1"], pk["hw2"], pk["hb2"],
    )

    out = pl.pallas_call(
        _fused_vit_kernel,
        out_shape=jax.ShapeDtypeStruct((Bn, OUT_PAD), jnp.float32),
        in_specs=[_VMEM] * len(inputs),
        out_specs=_VMEM,
        scratch_shapes=[
            pltpu.VMEM((BS, HIDDEN), jnp.float32),   # token-sequence buffer
            pltpu.VMEM((B, HIDDEN), jnp.float32),    # class-token features
        ],
    )(*inputs)

    age = out[:, 0]                 # .squeeze(1) -> (B,)
    gender = out[:, 1]              # .squeeze(1) -> (B,)
    race = out[:, 2:2 + RACES]      # (B, RACES)
    return age, gender, race


# ----------------------------- main -------------------------------------------
if __name__ == "__main__":
    key = jax.random.PRNGKey(0)
    pkey, xkey = jax.random.split(key)
    params = init_params(pkey)
    x = jax.random.normal(xkey, (B, C, IMG, IMG), dtype=jnp.float32)

    age, gender, race = jax.jit(multitask_vit_forward)(x, params)
    jax.block_until_ready((age, gender, race))

    assert age.shape == (B,)
    assert gender.shape == (B,)
    assert race.shape == (B, RACES)
    print("KERNEL_OK")
</pallas_src>

<mosaic_0001>
module attributes {stable_mosaic.version = 11 : i64} {
  func.func @_fused_vit_kernel(%arg0: memref<8x192xf32, #tpu.memory_space<vmem>>, %arg1: memref<10x10xf32, #tpu.memory_space<vmem>>, %arg2: memref<192x32xf32, #tpu.memory_space<vmem>>, %arg3: memref<1x32xf32, #tpu.memory_space<vmem>>, %arg4: memref<1x32xf32, #tpu.memory_space<vmem>>, %arg5: memref<5x32xf32, #tpu.memory_space<vmem>>, %arg6: memref<2x1x32xf32, #tpu.memory_space<vmem>>, %arg7: memref<2x1x32xf32, #tpu.memory_space<vmem>>, %arg8: memref<8x32x8xf32, #tpu.memory_space<vmem>>, %arg9: memref<8x32x8xf32, #tpu.memory_space<vmem>>, %arg10: memref<8x32x8xf32, #tpu.memory_space<vmem>>, %arg11: memref<8x1x8xf32, #tpu.memory_space<vmem>>, %arg12: memref<8x1x8xf32, #tpu.memory_space<vmem>>, %arg13: memref<8x1x8xf32, #tpu.memory_space<vmem>>, %arg14: memref<8x8x32xf32, #tpu.memory_space<vmem>>, %arg15: memref<2x1x32xf32, #tpu.memory_space<vmem>>, %arg16: memref<2x1x32xf32, #tpu.memory_space<vmem>>, %arg17: memref<2x1x32xf32, #tpu.memory_space<vmem>>, %arg18: memref<2x32x64xf32, #tpu.memory_space<vmem>>, %arg19: memref<2x1x64xf32, #tpu.memory_space<vmem>>, %arg20: memref<2x64x32xf32, #tpu.memory_space<vmem>>, %arg21: memref<2x1x32xf32, #tpu.memory_space<vmem>>, %arg22: memref<1x32xf32, #tpu.memory_space<vmem>>, %arg23: memref<1x32xf32, #tpu.memory_space<vmem>>, %arg24: memref<32x320xf32, #tpu.memory_space<vmem>>, %arg25: memref<1x320xf32, #tpu.memory_space<vmem>>, %arg26: memref<320x128xf32, #tpu.memory_space<vmem>>, %arg27: memref<1x128xf32, #tpu.memory_space<vmem>>, %arg28: memref<2x128xf32, #tpu.memory_space<vmem>>, %arg29: memref<10x32xf32, #tpu.memory_space<vmem>>, %arg30: memref<2x32xf32, #tpu.memory_space<vmem>>) attributes {dimension_semantics = [], scalar_prefetch = 0 : i64, scratch_operands = 2 : i64, tpu.core_type = #tpu.core_type<tc>} {
    %c0 = arith.constant 0 : index
    %c0_0 = arith.constant 0 : index
    %0 = vector.load %arg4[%c0, %c0_0] : memref<1x32xf32, #tpu.memory_space<vmem>>, vector<1x32xf32>
    %c0_1 = arith.constant 0 : index
    %c0_2 = arith.constant 0 : index
    %1 = vector.load %arg5[%c0_1, %c0_2] : memref<5x32xf32, #tpu.memory_space<vmem>>, vector<1x32xf32>
    %2 = arith.addf %0, %1 : vector<1x32xf32>
    %c1 = arith.constant 1 : index
    %c0_3 = arith.constant 0 : index
    %3 = vector.load %arg5[%c1, %c0_3] : memref<5x32xf32, #tpu.memory_space<vmem>>, vector<4x32xf32>
    %c0_4 = arith.constant 0 : index
    %c0_5 = arith.constant 0 : index
    %4 = vector.load %arg0[%c0_4, %c0_5] : memref<8x192xf32, #tpu.memory_space<vmem>>, vector<4x192xf32>
    %c0_6 = arith.constant 0 : index
    %c0_7 = arith.constant 0 : index
    %5 = vector.load %arg2[%c0_6, %c0_7] : memref<192x32xf32, #tpu.memory_space<vmem>>, vector<192x32xf32>
    %cst = arith.constant dense<0.000000e+00> : vector<4x32xf32>
    %6 = tpu.matmul %4, %5, %cst {dimension_numbers = #tpu.dot_dimension_numbers<[1], [0], [0], [1], [0, 0, 1, 1], [], []>} : vector<4x192xf32>, vector<192x32xf32>, vector<4x32xf32> -> vector<4x32xf32>
    %c0_8 = arith.constant 0 : index
    %c0_9 = arith.constant 0 : index
    %7 = vector.load %arg3[%c0_8, %c0_9] : memref<1x32xf32, #tpu.memory_space<vmem>>, vector<1x32xf32>
    %8 = vector.broadcast %7 : vector<1x32xf32> to vector<4x32xf32>
    %9 = arith.addf %6, %8 : vector<4x32xf32>
    %c0_10 = arith.constant 0 : index
    %c0_11 = arith.constant 0 : index
    %10 = vector.load %arg29[%c0_10, %c0_11] : memref<10x32xf32, #tpu.memory_space<vmem>>, vector<1x32xf32>
    tpu.vector_store %arg29[%c0_10, %c0_11], %2 {strides = array<i32>} : memref<10x32xf32, #tpu.memory_space<vmem>>, vector<1x32xf32>,
    %11 = arith.addf %9, %3 : vector<4x32xf32>
    %c1_12 = arith.constant 1 : index
    %c0_13 = arith.constant 0 : index
    %12 = vector.load %arg29[%c1_12, %c0_13] : memref<10x32xf32, #tpu.memory_space<vmem>>, vector<4x32xf32>
    tpu.vector_store %arg29[%c1_12, %c0_13], %11 {strides = array<i32>} : memref<10x32xf32, #tpu.memory_space<vmem>>, vector<4x32xf32>,
    %c4 = arith.constant 4 : index
    %c0_14 = arith.constant 0 : index
    %13 = vector.load %arg0[%c4, %c0_14] : memref<8x192xf32, #tpu.memory_space<vmem>>, vector<4x192xf32>
    %c0_15 = arith.constant 0 : index
    %c0_16 = arith.constant 0 : index
    %14 = vector.load %arg2[%c0_15, %c0_16] : memref<192x32xf32, #tpu.memory_space<vmem>>, vector<192x32xf32>
    %cst_17 = arith.constant dense<0.000000e+00> : vector<4x32xf32>
    %15 = tpu.matmul %13, %14, %cst_17 {dimension_numbers = #tpu.dot_dimension_numbers<[1], [0], [0], [1], [0, 0, 1, 1], [], []>} : vector<4x192xf32>, vector<192x32xf32>, vector<4x32xf32> -> vector<4x32xf32>
    %c0_18 = arith.constant 0 : index
    %c0_19 = arith.constant 0 : index
    %16 = vector.load %arg3[%c0_18, %c0_19] : memref<1x32xf32, #tpu.memory_space<vmem>>, vector<1x32xf32>
    %17 = vector.broadcast %16 : vector<1x32xf32> to vector<4x32xf32>
    %18 = arith.addf %15, %17 : vector<4x32xf32>
    %c5 = arith.constant 5 : index
    %c0_20 = arith.constant 0 : index
    %19 = vector.load %arg29[%c5, %c0_20] : memref<10x32xf32, #tpu.memory_space<vmem>>, vector<1x32xf32>
    tpu.vector_store %arg29[%c5, %c0_20], %2 {strides = array<i32>} : memref<10x32xf32, #tpu.memory_space<vmem>>, vector<1x32xf32>,
    %20 = arith.addf %18, %3 : vector<4x32xf32>
    %c6 = arith.constant 6 : index
    %c0_21 = arith.constant 0 : index
    %21 = vector.load %arg29[%c6, %c0_21] : memref<10x32xf32, #tpu.memory_space<vmem>>, vector<4x32xf32>
    tpu.vector_store %arg29[%c6, %c0_21], %20 {strides = array<i32>} : memref<10x32xf32, #tpu.memory_space<vmem>>, vector<4x32xf32>,
    %c0_22 = arith.constant 0 : index
    %c0_23 = arith.constant 0 : index
    %22 = vector.load %arg29[%c0_22, %c0_23] : memref<10x32xf32, #tpu.memory_space<vmem>>, vector<10x32xf32>
    %c0_24 = arith.constant 0 : index
    %c0_25 = arith.constant 0 : index
    %23 = vector.load %arg1[%c0_24, %c0_25] : memref<10x10xf32, #tpu.memory_space<vmem>>, vector<10x10xf32>
    %c0_26 = arith.constant 0 : index
    %c0_27 = arith.constant 0 : index
    %c0_28 = arith.constant 0 : index
    %24 = vector.load %arg6[%c0_26, %c0_27, %c0_28] : memref<2x1x32xf32, #tpu.memory_space<vmem>>, vector<1x1x32xf32>
    %25 = vector.shape_cast %24 : vector<1x1x32xf32> to vector<1x32xf32>
    %c0_29 = arith.constant 0 : index
    %c0_30 = arith.constant 0 : index
    %c0_31 = arith.constant 0 : index
    %26 = vector.load %arg7[%c0_29, %c0_30, %c0_31] : memref<2x1x32xf32, #tpu.memory_space<vmem>>, vector<1x1x32xf32>
    %27 = vector.shape_cast %26 : vector<1x1x32xf32> to vector<1x32xf32>
    %cst_32 = arith.constant dense<0.000000e+00> : vector<10xf32>
    %28 = vector.multi_reduction <add>, %22, %cst_32 [1] : vector<10x32xf32> to vector<10xf32>
    %29 = vector.shape_cast %28 : vector<10xf32> to vector<10x1xf32>
    %cst_33 = arith.constant 3.200000e+01 : f32
    %30 = vector.broadcast %cst_33 : f32 to vector<10x1xf32>
    %31 = arith.divf %29, %30 : vector<10x1xf32>
    %32 = vector.broadcast %31 : vector<10x1xf32> to vector<10x32xf32>
    %33 = arith.subf %22, %32 : vector<10x32xf32>
    %34 = arith.mulf %33, %33 : vector<10x32xf32>
    %cst_34 = arith.constant dense<0.000000e+00> : vector<10xf32>
    %35 = vector.multi_reduction <add>, %34, %cst_34 [1] : vector<10x32xf32> to vector<10xf32>
    %36 = vector.shape_cast %35 : vector<10xf32> to vector<10x1xf32>
    %cst_35 = arith.constant 3.200000e+01 : f32
    %37 = vector.broadcast %cst_35 : f32 to vector<10x1xf32>
    %38 = arith.divf %36, %37 : vector<10x1xf32>
    %cst_36 = arith.constant 9.99999997E-7 : f32
    %39 = vector.broadcast %cst_36 : f32 to vector<10x1xf32>
    %40 = arith.addf %38, %39 : vector<10x1xf32>
    %41 = math.rsqrt %40 : vector<10x1xf32>
    %42 = vector.broadcast %41 : vector<10x1xf32> to vector<10x32xf32>
    %43 = arith.mulf %33, %42 : vector<10x32xf32>
    %44 = vector.broadcast %25 : vector<1x32xf32> to vector<10x32xf32>
    %45 = arith.mulf %43, %44 : vector<10x32xf32>
    %46 = vector.broadcast %27 : vector<1x32xf32> to vector<10x32xf32>
    %47 = arith.addf %45, %46 : vector<10x32xf32>
    %cst_37 = arith.constant 0.000000e+00 : f32
    %48 = vector.broadcast %cst_37 : f32 to vector<10x32xf32>
    %c0_38 = arith.constant 0 : index
    %c0_39 = arith.constant 0 : index
    %c0_40 = arith.constant 0 : index
    %49 = vector.load %arg8[%c0_38, %c0_39, %c0_40] : memref<8x32x8xf32, #tpu.memory_space<vmem>>, vector<1x32x8xf32>
    %50 = vector.shape_cast %49 : vector<1x32x8xf32> to vector<32x8xf32>
    %cst_41 = arith.constant dense<0.000000e+00> : vector<10x8xf32>
    %51 = tpu.matmul %47, %50, %cst_41 {dimension_numbers = #tpu.dot_dimension_numbers<[1], [0], [0], [1], [0, 0, 1, 1], [], []>} : vector<10x32xf32>, vector<32x8xf32>, vector<10x8xf32> -> vector<10x8xf32>
    %c0_42 = arith.constant 0 : index
    %c0_43 = arith.constant 0 : index
    %c0_44 = arith.constant 0 : index
    %52 = vector.load %arg11[%c0_42, %c0_43, %c0_44] : memref<8x1x8xf32, #tpu.memory_space<vmem>>, vector<1x1x8xf32>
    %53 = vector.shape_cast %52 : vector<1x1x8xf32> to vector<1x8xf32>
    %54 = vector.broadcast %53 : vector<1x8xf32> to vector<10x8xf32>
    %55 = arith.addf %51, %54 : vector<10x8xf32>
    %c0_45 = arith.constant 0 : index
    %c0_46 = arith.constant 0 : index
    %c0_47 = arith.constant 0 : index
    %56 = vector.load %arg9[%c0_45, %c0_46, %c0_47] : memref<8x32x8xf32, #tpu.memory_space<vmem>>, vector<1x32x8xf32>
    %57 = vector.shape_cast %56 : vector<1x32x8xf32> to vector<32x8xf32>
    %cst_48 = arith.constant dense<0.000000e+00> : vector<10x8xf32>
    %58 = tpu.matmul %47, %57, %cst_48 {dimension_numbers = #tpu.dot_dimension_numbers<[1], [0], [0], [1], [0, 0, 1, 1], [], []>} : vector<10x32xf32>, vector<32x8xf32>, vector<10x8xf32> -> vector<10x8xf32>
    %c0_49 = arith.constant 0 : index
    %c0_50 = arith.constant 0 : index
    %c0_51 = arith.constant 0 : index
    %59 = vector.load %arg12[%c0_49, %c0_50, %c0_51] : memref<8x1x8xf32, #tpu.memory_space<vmem>>, vector<1x1x8xf32>
    %60 = vector.shape_cast %59 : vector<1x1x8xf32> to vector<1x8xf32>
    %61 = vector.broadcast %60 : vector<1x8xf32> to vector<10x8xf32>
    %62 = arith.addf %58, %61 : vector<10x8xf32>
    %c0_52 = arith.constant 0 : index
    %c0_53 = arith.constant 0 : index
    %c0_54 = arith.constant 0 : index
    %63 = vector.load %arg10[%c0_52, %c0_53, %c0_54] : memref<8x32x8xf32, #tpu.memory_space<vmem>>, vector<1x32x8xf32>
    %64 = vector.shape_cast %63 : vector<1x32x8xf32> to vector<32x8xf32>
    %cst_55 = arith.constant dense<0.000000e+00> : vector<10x8xf32>
    %65 = tpu.matmul %47, %64, %cst_55 {dimension_numbers = #tpu.dot_dimension_numbers<[1], [0], [0], [1], [0, 0, 1, 1], [], []>} : vector<10x32xf32>, vector<32x8xf32>, vector<10x8xf32> -> vector<10x8xf32>
    %c0_56 = arith.constant 0 : index
    %c0_57 = arith.constant 0 : index
    %c0_58 = arith.constant 0 : index
    %66 = vector.load %arg13[%c0_56, %c0_57, %c0_58] : memref<8x1x8xf32, #tpu.memory_space<vmem>>, vector<1x1x8xf32>
    %67 = vector.shape_cast %66 : vector<1x1x8xf32> to vector<1x8xf32>
    %68 = vector.broadcast %67 : vector<1x8xf32> to vector<10x8xf32>
    %69 = arith.addf %65, %68 : vector<10x8xf32>
    %cst_59 = arith.constant dense<0.000000e+00> : vector<10x10xf32>
    %70 = tpu.matmul %55, %62, %cst_59 {dimension_numbers = #tpu.dot_dimension_numbers<[1], [1], [0], [0], [0, 0, 1, 0], [], []>} : vector<10x8xf32>, vector<10x8xf32>, vector<10x10xf32> -> vector<10x10xf32>
    %cst_60 = arith.constant 0.353553385 : f32
    %71 = vector.broadcast %cst_60 : f32 to vector<10x10xf32>
    %72 = arith.mulf %70, %71 : vector<10x10xf32>
    %73 = arith.addf %72, %23 : vector<10x10xf32>
    %cst_61 = arith.constant dense<0xFF800000> : vector<10xf32>
    %74 = vector.multi_reduction <maximumf>, %73, %cst_61 [1] : vector<10x10xf32> to vector<10xf32>
    %75 = vector.shape_cast %74 : vector<10xf32> to vector<10x1xf32>
    %76 = vector.broadcast %75 : vector<10x1xf32> to vector<10x10xf32>
    %77 = arith.subf %73, %76 : vector<10x10xf32>
    %78 = math.exp %77 : vector<10x10xf32>
    %cst_62 = arith.constant dense<0.000000e+00> : vector<10xf32>
    %79 = vector.multi_reduction <add>, %78, %cst_62 [1] : vector<10x10xf32> to vector<10xf32>
    %80 = vector.shape_cast %79 : vector<10xf32> to vector<10x1xf32>
    %81 = tpu.reciprocal %80 {approx = true} : vector<10x1xf32> -> vector<10x1xf32>
    %82 = vector.broadcast %81 : vector<10x1xf32> to vector<10x10xf32>
    %83 = arith.mulf %78, %82 : vector<10x10xf32>
    %cst_63 = arith.constant dense<0.000000e+00> : vector<10x8xf32>
    %84 = tpu.matmul %83, %69, %cst_63 {dimension_numbers = #tpu.dot_dimension_numbers<[1], [0], [0], [1], [0, 0, 1, 1], [], []>} : vector<10x10xf32>, vector<10x8xf32>, vector<10x8xf32> -> vector<10x8xf32>
    %c0_64 = arith.constant 0 : index
    %c0_65 = arith.constant 0 : index
    %c0_66 = arith.constant 0 : index
    %85 = vector.load %arg14[%c0_64, %c0_65, %c0_66] : memref<8x8x32xf32, #tpu.memory_space<vmem>>, vector<1x8x32xf32>
    %86 = vector.shape_cast %85 : vector<1x8x32xf32> to vector<8x32xf32>
    %cst_67 = arith.constant dense<0.000000e+00> : vector<10x32xf32>
    %87 = tpu.matmul %84, %86, %cst_67 {dimension_numbers = #tpu.dot_dimension_numbers<[1], [0], [0], [1], [0, 0, 1, 1], [], []>} : vector<10x8xf32>, vector<8x32xf32>, vector<10x32xf32> -> vector<10x32xf32>
    %88 = arith.addf %48, %87 : vector<10x32xf32>
    %c1_68 = arith.constant 1 : index
    %c0_69 = arith.constant 0 : index
    %c0_70 = arith.constant 0 : index
    %89 = vector.load %arg8[%c1_68, %c0_69, %c0_70] : memref<8x32x8xf32, #tpu.memory_space<vmem>>, vector<1x32x8xf32>
    %90 = vector.shape_cast %89 : vector<1x32x8xf32> to vector<32x8xf32>
    %cst_71 = arith.constant dense<0.000000e+00> : vector<10x8xf32>
    %91 = tpu.matmul %47, %90, %cst_71 {dimension_numbers = #tpu.dot_dimension_numbers<[1], [0], [0], [1], [0, 0, 1, 1], [], []>} : vector<10x32xf32>, vector<32x8xf32>, vector<10x8xf32> -> vector<10x8xf32>
    %c1_72 = arith.constant 1 : index
    %c0_73 = arith.constant 0 : index
    %c0_74 = arith.constant 0 : index
    %92 = vector.load %arg11[%c1_72, %c0_73, %c0_74] : memref<8x1x8xf32, #tpu.memory_space<vmem>>, vector<1x1x8xf32>
    %93 = vector.shape_cast %92 : vector<1x1x8xf32> to vector<1x8xf32>
    %94 = vector.broadcast %93 : vector<1x8xf32> to vector<10x8xf32>
    %95 = arith.addf %91, %94 : vector<10x8xf32>
    %c1_75 = arith.constant 1 : index
    %c0_76 = arith.constant 0 : index
    %c0_77 = arith.constant 0 : index
    %96 = vector.load %arg9[%c1_75, %c0_76, %c0_77] : memref<8x32x8xf32, #tpu.memory_space<vmem>>, vector<1x32x8xf32>
    %97 = vector.shape_cast %96 : vector<1x32x8xf32> to vector<32x8xf32>
    %cst_78 = arith.constant dense<0.000000e+00> : vector<10x8xf32>
    %98 = tpu.matmul %47, %97, %cst_78 {dimension_numbers = #tpu.dot_dimension_numbers<[1], [0], [0], [1], [0, 0, 1, 1], [], []>} : vector<10x32xf32>, vector<32x8xf32>, vector<10x8xf32> -> vector<10x8xf32>
    %c1_79 = arith.constant 1 : index
    %c0_80 = arith.constant 0 : index
    %c0_81 = arith.constant 0 : index
    %99 = vector.load %arg12[%c1_79, %c0_80, %c0_81] : memref<8x1x8xf32, #tpu.memory_space<vmem>>, vector<1x1x8xf32>
    %100 = vector.shape_cast %99 : vector<1x1x8xf32> to vector<1x8xf32>
    %101 = vector.broadcast %100 : vector<1x8xf32> to vector<10x8xf32>
    %102 = arith.addf %98, %101 : vector<10x8xf32>
    %c1_82 = arith.constant 1 : index
    %c0_83 = arith.constant 0 : index
    %c0_84 = arith.constant 0 : index
    %103 = vector.load %arg10[%c1_82, %c0_83, %c0_84] : memref<8x32x8xf32, #tpu.memory_space<vmem>>, vector<1x32x8xf32>
    %104 = vector.shape_cast %103 : vector<1x32x8xf32> to vector<32x8xf32>
    %cst_85 = arith.constant dense<0.000000e+00> : vector<10x8xf32>
    %105 = tpu.matmul %47, %104, %cst_85 {dimension_numbers = #tpu.dot_dimension_numbers<[1], [0], [0], [1], [0, 0, 1, 1], [], []>} : vector<10x32xf32>, vector<32x8xf32>, vector<10x8xf32> -> vector<10x8xf32>
    %c1_86 = arith.constant 1 : index
    %c0_87 = arith.constant 0 : index
    %c0_88 = arith.constant 0 : index
    %106 = vector.load %arg13[%c1_86, %c0_87, %c0_88] : memref<8x1x8xf32, #tpu.memory_space<vmem>>, vector<1x1x8xf32>
    %107 = vector.shape_cast %106 : vector<1x1x8xf32> to vector<1x8xf32>
    %108 = vector.broadcast %107 : vector<1x8xf32> to vector<10x8xf32>
    %109 = arith.addf %105, %108 : vector<10x8xf32>
    %cst_89 = arith.constant dense<0.000000e+00> : vector<10x10xf32>
    %110 = tpu.matmul %95, %102, %cst_89 {dimension_numbers = #tpu.dot_dimension_numbers<[1], [1], [0], [0], [0, 0, 1, 0], [], []>} : vector<10x8xf32>, vector<10x8xf32>, vector<10x10xf32> -> vector<10x10xf32>
    %cst_90 = arith.constant 0.353553385 : f32
    %111 = vector.broadcast %cst_90 : f32 to vector<10x10xf32>
    %112 = arith.mulf %110, %111 : vector<10x10xf32>
    %113 = arith.addf %112, %23 : vector<10x10xf32>
    %cst_91 = arith.constant dense<0xFF800000> : vector<10xf32>
    %114 = vector.multi_reduction <maximumf>, %113, %cst_91 [1] : vector<10x10xf32> to vector<10xf32>
    %115 = vector.shape_cast %114 : vector<10xf32> to vector<10x1xf32>
    %116 = vector.broadcast %115 : vector<10x1xf32> to vector<10x10xf32>
    %117 = arith.subf %113, %116 : vector<10x10xf32>
    %118 = math.exp %117 : vector<10x10xf32>
    %cst_92 = arith.constant dense<0.000000e+00> : vector<10xf32>
    %119 = vector.multi_reduction <add>, %118, %cst_92 [1] : vector<10x10xf32> to vector<10xf32>
    %120 = vector.shape_cast %119 : vector<10xf32> to vector<10x1xf32>
    %121 = tpu.reciprocal %120 {approx = true} : vector<10x1xf32> -> vector<10x1xf32>
    %122 = vector.broadcast %121 : vector<10x1xf32> to vector<10x10xf32>
    %123 = arith.mulf %118, %122 : vector<10x10xf32>
    %cst_93 = arith.constant dense<0.000000e+00> : vector<10x8xf32>
    %124 = tpu.matmul %123, %109, %cst_93 {dimension_numbers = #tpu.dot_dimension_numbers<[1], [0], [0], [1], [0, 0, 1, 1], [], []>} : vector<10x10xf32>, vector<10x8xf32>, vector<10x8xf32> -> vector<10x8xf32>
    %c1_94 = arith.constant 1 : index
    %c0_95 = arith.constant 0 : index
    %c0_96 = arith.constant 0 : index
    %125 = vector.load %arg14[%c1_94, %c0_95, %c0_96] : memref<8x8x32xf32, #tpu.memory_space<vmem>>, vector<1x8x32xf32>
    %126 = vector.shape_cast %125 : vector<1x8x32xf32> to vector<8x32xf32>
    %cst_97 = arith.constant dense<0.000000e+00> : vector<10x32xf32>
    %127 = tpu.matmul %124, %126, %cst_97 {dimension_numbers = #tpu.dot_dimension_numbers<[1], [0], [0], [1], [0, 0, 1, 1], [], []>} : vector<10x8xf32>, vector<8x32xf32>, vector<10x32xf32> -> vector<10x32xf32>
    %128 = arith.addf %88, %127 : vector<10x32xf32>
    %c2 = arith.constant 2 : index
    %c0_98 = arith.constant 0 : index
    %c0_99 = arith.constant 0 : index
    %129 = vector.load %arg8[%c2, %c0_98, %c0_99] : memref<8x32x8xf32, #tpu.memory_space<vmem>>, vector<1x32x8xf32>
    %130 = vector.shape_cast %129 : vector<1x32x8xf32> to vector<32x8xf32>
    %cst_100 = arith.constant dense<0.000000e+00> : vector<10x8xf32>
    %131 = tpu.matmul %47, %130, %cst_100 {dimension_numbers = #tpu.dot_dimension_numbers<[1], [0], [0], [1], [0, 0, 1, 1], [], []>} : vector<10x32xf32>, vector<32x8xf32>, vector<10x8xf32> -> vector<10x8xf32>
    %c2_101 = arith.constant 2 : index
    %c0_102 = arith.constant 0 : index
    %c0_103 = arith.constant 0 : index
    %132 = vector.load %arg11[%c2_101, %c0_102, %c0_103] : memref<8x1x8xf32, #tpu.memory_space<vmem>>, vector<1x1x8xf32>
    %133 = vector.shape_cast %132 : vector<1x1x8xf32> to vector<1x8xf32>
    %134 = vector.broadcast %133 : vector<1x8xf32> to vector<10x8xf32>
    %135 = arith.addf %131, %134 : vector<10x8xf32>
    %c2_104 = arith.constant 2 : index
    %c0_105 = arith.constant 0 : index
    %c0_106 = arith.constant 0 : index
    %136 = vector.load %arg9[%c2_104, %c0_105, %c0_106] : memref<8x32x8xf32, #tpu.memory_space<vmem>>, vector<1x32x8xf32>
    %137 = vector.shape_cast %136 : vector<1x32x8xf32> to vector<32x8xf32>
    %cst_107 = arith.constant dense<0.000000e+00> : vector<10x8xf32>
    %138 = tpu.matmul %47, %137, %cst_107 {dimension_numbers = #tpu.dot_dimension_numbers<[1], [0], [0], [1], [0, 0, 1, 1], [], []>} : vector<10x32xf32>, vector<32x8xf32>, vector<10x8xf32> -> vector<10x8xf32>
    %c2_108 = arith.constant 2 : index
    %c0_109 = arith.constant 0 : index
    %c0_110 = arith.constant 0 : index
    %139 = vector.load %arg12[%c2_108, %c0_109, %c0_110] : memref<8x1x8xf32, #tpu.memory_space<vmem>>, vector<1x1x8xf32>
    %140 = vector.shape_cast %139 : vector<1x1x8xf32> to vector<1x8xf32>
    %141 = vector.broadcast %140 : vector<1x8xf32> to vector<10x8xf32>
    %142 = arith.addf %138, %141 : vector<10x8xf32>
    %c2_111 = arith.constant 2 : index
    %c0_112 = arith.constant 0 : index
    %c0_113 = arith.constant 0 : index
    %143 = vector.load %arg10[%c2_111, %c0_112, %c0_113] : memref<8x32x8xf32, #tpu.memory_space<vmem>>, vector<1x32x8xf32>
    %144 = vector.shape_cast %143 : vector<1x32x8xf32> to vector<32x8xf32>
    %cst_114 = arith.constant dense<0.000000e+00> : vector<10x8xf32>
    %145 = tpu.matmul %47, %144, %cst_114 {dimension_numbers = #tpu.dot_dimension_numbers<[1], [0], [0], [1], [0, 0, 1, 1], [], []>} : vector<10x32xf32>, vector<32x8xf32>, vector<10x8xf32> -> vector<10x8xf32>
    %c2_115 = arith.constant 2 : index
    %c0_116 = arith.constant 0 : index
    %c0_117 = arith.constant 0 : index
    %146 = vector.load %arg13[%c2_115, %c0_116, %c0_117] : memref<8x1x8xf32, #tpu.memory_space<vmem>>, vector<1x1x8xf32>
    %147 = vector.shape_cast %146 : vector<1x1x8xf32> to vector<1x8xf32>
    %148 = vector.broadcast %147 : vector<1x8xf32> to vector<10x8xf32>
    %149 = arith.addf %145, %148 : vector<10x8xf32>
    %cst_118 = arith.constant dense<0.000000e+00> : vector<10x10xf32>
    %150 = tpu.matmul %135, %142, %cst_118 {dimension_numbers = #tpu.dot_dimension_numbers<[1], [1], [0], [0], [0, 0, 1, 0], [], []>} : vector<10x8xf32>, vector<10x8xf32>, vector<10x10xf32> -> vector<10x10xf32>
    %cst_119 = arith.constant 0.353553385 : f32
    %151 = vector.broadcast %cst_119 : f32 to vector<10x10xf32>
    %152 = arith.mulf %150, %151 : vector<10x10xf32>
    %153 = arith.addf %152, %23 : vector<10x10xf32>
    %cst_120 = arith.constant dense<0xFF800000> : vector<10xf32>
    %154 = vector.multi_reduction <maximumf>, %153, %cst_120 [1] : vector<10x10xf32> to vector<10xf32>
    %155 = vector.shape_cast %154 : vector<10xf32> to vector<10x1xf32>
    %156 = vector.broadcast %155 : vector<10x1xf32> to vector<10x10xf32>
    %157 = arith.subf %153, %156 : vector<10x10xf32>
    %158 = math.exp %157 : vector<10x10xf32>
    %cst_121 = arith.constant dense<0.000000e+00> : vector<10xf32>
    %159 = vector.multi_reduction <add>, %158, %cst_121 [1] : vector<10x10xf32> to vector<10xf32>
    %160 = vector.shape_cast %159 : vector<10xf32> to vector<10x1xf32>
    %161 = tpu.reciprocal %160 {approx = true} : vector<10x1xf32> -> vector<10x1xf32>
    %162 = vector.broadcast %161 : vector<10x1xf32> to vector<10x10xf32>
    %163 = arith.mulf %158, %162 : vector<10x10xf32>
    %cst_122 = arith.constant dense<0.000000e+00> : vector<10x8xf32>
    %164 = tpu.matmul %163, %149, %cst_122 {dimension_numbers = #tpu.dot_dimension_numbers<[1], [0], [0], [1], [0, 0, 1, 1], [], []>} : vector<10x10xf32>, vector<10x8xf32>, vector<10x8xf32> -> vector<10x8xf32>
    %c2_123 = arith.constant 2 : index
    %c0_124 = arith.constant 0 : index
    %c0_125 = arith.constant 0 : index
    %165 = vector.load %arg14[%c2_123, %c0_124, %c0_125] : memref<8x8x32xf32, #tpu.memory_space<vmem>>, vector<1x8x32xf32>
    %166 = vector.shape_cast %165 : vector<1x8x32xf32> to vector<8x32xf32>
    %cst_126 = arith.constant dense<0.000000e+00> : vector<10x32xf32>
    %167 = tpu.matmul %164, %166, %cst_126 {dimension_numbers = #tpu.dot_dimension_numbers<[1], [0], [0], [1], [0, 0, 1, 1], [], []>} : vector<10x8xf32>, vector<8x32xf32>, vector<10x32xf32> -> vector<10x32xf32>
    %168 = arith.addf %128, %167 : vector<10x32xf32>
    %c3 = arith.constant 3 : index
    %c0_127 = arith.constant 0 : index
    %c0_128 = arith.constant 0 : index
    %169 = vector.load %arg8[%c3, %c0_127, %c0_128] : memref<8x32x8xf32, #tpu.memory_space<vmem>>, vector<1x32x8xf32>
    %170 = vector.shape_cast %169 : vector<1x32x8xf32> to vector<32x8xf32>
    %cst_129 = arith.constant dense<0.000000e+00> : vector<10x8xf32>
    %171 = tpu.matmul %47, %170, %cst_129 {dimension_numbers = #tpu.dot_dimension_numbers<[1], [0], [0], [1], [0, 0, 1, 1], [], []>} : vector<10x32xf32>, vector<32x8xf32>, vector<10x8xf32> -> vector<10x8xf32>
    %c3_130 = arith.constant 3 : index
    %c0_131 = arith.constant 0 : index
    %c0_132 = arith.constant 0 : index
    %172 = vector.load %arg11[%c3_130, %c0_131, %c0_132] : memref<8x1x8xf32, #tpu.memory_space<vmem>>, vector<1x1x8xf32>
    %173 = vector.shape_cast %172 : vector<1x1x8xf32> to vector<1x8xf32>
    %174 = vector.broadcast %173 : vector<1x8xf32> to vector<10x8xf32>
    %175 = arith.addf %171, %174 : vector<10x8xf32>
    %c3_133 = arith.constant 3 : index
    %c0_134 = arith.constant 0 : index
    %c0_135 = arith.constant 0 : index
    %176 = vector.load %arg9[%c3_133, %c0_134, %c0_135] : memref<8x32x8xf32, #tpu.memory_space<vmem>>, vector<1x32x8xf32>
    %177 = vector.shape_cast %176 : vector<1x32x8xf32> to vector<32x8xf32>
    %cst_136 = arith.constant dense<0.000000e+00> : vector<10x8xf32>
    %178 = tpu.matmul %47, %177, %cst_136 {dimension_numbers = #tpu.dot_dimension_numbers<[1], [0], [0], [1], [0, 0, 1, 1], [], []>} : vector<10x32xf32>, vector<32x8xf32>, vector<10x8xf32> -> vector<10x8xf32>
    %c3_137 = arith.constant 3 : index
    %c0_138 = arith.constant 0 : index
    %c0_139 = arith.constant 0 : index
    %179 = vector.load %arg12[%c3_137, %c0_138, %c0_139] : memref<8x1x8xf32, #tpu.memory_space<vmem>>, vector<1x1x8xf32>
    %180 = vector.shape_cast %179 : vector<1x1x8xf32> to vector<1x8xf32>
    %181 = vector.broadcast %180 : vector<1x8xf32> to vector<10x8xf32>
    %182 = arith.addf %178, %181 : vector<10x8xf32>
    %c3_140 = arith.constant 3 : index
    %c0_141 = arith.constant 0 : index
    %c0_142 = arith.constant 0 : index
    %183 = vector.load %arg10[%c3_140, %c0_141, %c0_142] : memref<8x32x8xf32, #tpu.memory_space<vmem>>, vector<1x32x8xf32>
    %184 = vector.shape_cast %183 : vector<1x32x8xf32> to vector<32x8xf32>
    %cst_143 = arith.constant dense<0.000000e+00> : vector<10x8xf32>
    %185 = tpu.matmul %47, %184, %cst_143 {dimension_numbers = #tpu.dot_dimension_numbers<[1], [0], [0], [1], [0, 0, 1, 1], [], []>} : vector<10x32xf32>, vector<32x8xf32>, vector<10x8xf32> -> vector<10x8xf32>
    %c3_144 = arith.constant 3 : index
    %c0_145 = arith.constant 0 : index
    %c0_146 = arith.constant 0 : index
    %186 = vector.load %arg13[%c3_144, %c0_145, %c0_146] : memref<8x1x8xf32, #tpu.memory_space<vmem>>, vector<1x1x8xf32>
    %187 = vector.shape_cast %186 : vector<1x1x8xf32> to vector<1x8xf32>
    %188 = vector.broadcast %187 : vector<1x8xf32> to vector<10x8xf32>
    %189 = arith.addf %185, %188 : vector<10x8xf32>
    %cst_147 = arith.constant dense<0.000000e+00> : vector<10x10xf32>
    %190 = tpu.matmul %175, %182, %cst_147 {dimension_numbers = #tpu.dot_dimension_numbers<[1], [1], [0], [0], [0, 0, 1, 0], [], []>} : vector<10x8xf32>, vector<10x8xf32>, vector<10x10xf32> -> vector<10x10xf32>
    %cst_148 = arith.constant 0.353553385 : f32
    %191 = vector.broadcast %cst_148 : f32 to vector<10x10xf32>
    %192 = arith.mulf %190, %191 : vector<10x10xf32>
    %193 = arith.addf %192, %23 : vector<10x10xf32>
    %cst_149 = arith.constant dense<0xFF800000> : vector<10xf32>
    %194 = vector.multi_reduction <maximumf>, %193, %cst_149 [1] : vector<10x10xf32> to vector<10xf32>
    %195 = vector.shape_cast %194 : vector<10xf32> to vector<10x1xf32>
    %196 = vector.broadcast %195 : vector<10x1xf32> to vector<10x10xf32>
    %197 = arith.subf %193, %196 : vector<10x10xf32>
    %198 = math.exp %197 : vector<10x10xf32>
    %cst_150 = arith.constant dense<0.000000e+00> : vector<10xf32>
    %199 = vector.multi_reduction <add>, %198, %cst_150 [1] : vector<10x10xf32> to vector<10xf32>
    %200 = vector.shape_cast %199 : vector<10xf32> to vector<10x1xf32>
    %201 = tpu.reciprocal %200 {approx = true} : vector<10x1xf32> -> vector<10x1xf32>
    %202 = vector.broadcast %201 : vector<10x1xf32> to vector<10x10xf32>
    %203 = arith.mulf %198, %202 : vector<10x10xf32>
    %cst_151 = arith.constant dense<0.000000e+00> : vector<10x8xf32>
    %204 = tpu.matmul %203, %189, %cst_151 {dimension_numbers = #tpu.dot_dimension_numbers<[1], [0], [0], [1], [0, 0, 1, 1], [], []>} : vector<10x10xf32>, vector<10x8xf32>, vector<10x8xf32> -> vector<10x8xf32>
    %c3_152 = arith.constant 3 : index
    %c0_153 = arith.constant 0 : index
    %c0_154 = arith.constant 0 : index
    %205 = vector.load %arg14[%c3_152, %c0_153, %c0_154] : memref<8x8x32xf32, #tpu.memory_space<vmem>>, vector<1x8x32xf32>
    %206 = vector.shape_cast %205 : vector<1x8x32xf32> to vector<8x32xf32>
    %cst_155 = arith.constant dense<0.000000e+00> : vector<10x32xf32>
    %207 = tpu.matmul %204, %206, %cst_155 {dimension_numbers = #tpu.dot_dimension_numbers<[1], [0], [0], [1], [0, 0, 1, 1], [], []>} : vector<10x8xf32>, vector<8x32xf32>, vector<10x32xf32> -> vector<10x32xf32>
    %208 = arith.addf %168, %207 : vector<10x32xf32>
    %c0_156 = arith.constant 0 : index
    %c0_157 = arith.constant 0 : index
    %c0_158 = arith.constant 0 : index
    %209 = vector.load %arg15[%c0_156, %c0_157, %c0_158] : memref<2x1x32xf32, #tpu.memory_space<vmem>>, vector<1x1x32xf32>
    %210 = vector.shape_cast %209 : vector<1x1x32xf32> to vector<1x32xf32>
    %211 = vector.broadcast %210 : vector<1x32xf32> to vector<10x32xf32>
    %212 = arith.addf %208, %211 : vector<10x32xf32>
    %213 = arith.addf %22, %212 : vector<10x32xf32>
    %c0_159 = arith.constant 0 : index
    %c0_160 = arith.constant 0 : index
    %c0_161 = arith.constant 0 : index
    %214 = vector.load %arg16[%c0_159, %c0_160, %c0_161] : memref<2x1x32xf32, #tpu.memory_space<vmem>>, vector<1x1x32xf32>
    %215 = vector.shape_cast %214 : vector<1x1x32xf32> to vector<1x32xf32>
    %c0_162 = arith.constant 0 : index
    %c0_163 = arith.constant 0 : index
    %c0_164 = arith.constant 0 : index
    %216 = vector.load %arg17[%c0_162, %c0_163, %c0_164] : memref<2x1x32xf32, #tpu.memory_space<vmem>>, vector<1x1x32xf32>
    %217 = vector.shape_cast %216 : vector<1x1x32xf32> to vector<1x32xf32>
    %cst_165 = arith.constant dense<0.000000e+00> : vector<10xf32>
    %218 = vector.multi_reduction <add>, %213, %cst_165 [1] : vector<10x32xf32> to vector<10xf32>
    %219 = vector.shape_cast %218 : vector<10xf32> to vector<10x1xf32>
    %cst_166 = arith.constant 3.200000e+01 : f32
    %220 = vector.broadcast %cst_166 : f32 to vector<10x1xf32>
    %221 = arith.divf %219, %220 : vector<10x1xf32>
    %222 = vector.broadcast %221 : vector<10x1xf32> to vector<10x32xf32>
    %223 = arith.subf %213, %222 : vector<10x32xf32>
    %224 = arith.mulf %223, %223 : vector<10x32xf32>
    %cst_167 = arith.constant dense<0.000000e+00> : vector<10xf32>
    %225 = vector.multi_reduction <add>, %224, %cst_167 [1] : vector<10x32xf32> to vector<10xf32>
    %226 = vector.shape_cast %225 : vector<10xf32> to vector<10x1xf32>
    %cst_168 = arith.constant 3.200000e+01 : f32
    %227 = vector.broadcast %cst_168 : f32 to vector<10x1xf32>
    %228 = arith.divf %226, %227 : vector<10x1xf32>
    %cst_169 = arith.constant 9.99999997E-7 : f32
    %229 = vector.broadcast %cst_169 : f32 to vector<10x1xf32>
    %230 = arith.addf %228, %229 : vector<10x1xf32>
    %231 = math.rsqrt %230 : vector<10x1xf32>
    %232 = vector.broadcast %231 : vector<10x1xf32> to vector<10x32xf32>
    %233 = arith.mulf %223, %232 : vector<10x32xf32>
    %234 = vector.broadcast %215 : vector<1x32xf32> to vector<10x32xf32>
    %235 = arith.mulf %233, %234 : vector<10x32xf32>
    %236 = vector.broadcast %217 : vector<1x32xf32> to vector<10x32xf32>
    %237 = arith.addf %235, %236 : vector<10x32xf32>
    %c0_170 = arith.constant 0 : index
    %c0_171 = arith.constant 0 : index
    %c0_172 = arith.constant 0 : index
    %238 = vector.load %arg18[%c0_170, %c0_171, %c0_172] : memref<2x32x64xf32, #tpu.memory_space<vmem>>, vector<1x32x64xf32>
    %239 = vector.shape_cast %238 : vector<1x32x64xf32> to vector<32x64xf32>
    %cst_173 = arith.constant dense<0.000000e+00> : vector<10x64xf32>
    %240 = tpu.matmul %237, %239, %cst_173 {dimension_numbers = #tpu.dot_dimension_numbers<[1], [0], [0], [1], [0, 0, 1, 1], [], []>} : vector<10x32xf32>, vector<32x64xf32>, vector<10x64xf32> -> vector<10x64xf32>
    %c0_174 = arith.constant 0 : index
    %c0_175 = arith.constant 0 : index
    %c0_176 = arith.constant 0 : index
    %241 = vector.load %arg19[%c0_174, %c0_175, %c0_176] : memref<2x1x64xf32, #tpu.memory_space<vmem>>, vector<1x1x64xf32>
    %242 = vector.shape_cast %241 : vector<1x1x64xf32> to vector<1x64xf32>
    %243 = vector.broadcast %242 : vector<1x64xf32> to vector<10x64xf32>
    %244 = arith.addf %240, %243 : vector<10x64xf32>
    %cst_177 = arith.constant 5.000000e-01 : f32
    %245 = vector.broadcast %cst_177 : f32 to vector<10x64xf32>
    %246 = arith.mulf %245, %244 : vector<10x64xf32>
    %cst_178 = arith.constant 0.707106769 : f32
    %247 = vector.broadcast %cst_178 : f32 to vector<10x64xf32>
    %248 = arith.mulf %244, %247 : vector<10x64xf32>
    %249 = math.erf %248 : vector<10x64xf32>
    %cst_179 = arith.constant 1.000000e+00 : f32
    %250 = vector.broadcast %cst_179 : f32 to vector<10x64xf32>
    %251 = arith.addf %250, %249 : vector<10x64xf32>
    %252 = arith.mulf %246, %251 : vector<10x64xf32>
    %c0_180 = arith.constant 0 : index
    %c0_181 = arith.constant 0 : index
    %c0_182 = arith.constant 0 : index
    %253 = vector.load %arg20[%c0_180, %c0_181, %c0_182] : memref<2x64x32xf32, #tpu.memory_space<vmem>>, vector<1x64x32xf32>
    %254 = vector.shape_cast %253 : vector<1x64x32xf32> to vector<64x32xf32>
    %cst_183 = arith.constant dense<0.000000e+00> : vector<10x32xf32>
    %255 = tpu.matmul %252, %254, %cst_183 {dimension_numbers = #tpu.dot_dimension_numbers<[1], [0], [0], [1], [0, 0, 1, 1], [], []>} : vector<10x64xf32>, vector<64x32xf32>, vector<10x32xf32> -> vector<10x32xf32>
    %c0_184 = arith.constant 0 : index
    %c0_185 = arith.constant 0 : index
    %c0_186 = arith.constant 0 : index
    %256 = vector.load %arg21[%c0_184, %c0_185, %c0_186] : memref<2x1x32xf32, #tpu.memory_space<vmem>>, vector<1x1x32xf32>
    %257 = vector.shape_cast %256 : vector<1x1x32xf32> to vector<1x32xf32>
    %258 = vector.broadcast %257 : vector<1x32xf32> to vector<10x32xf32>
    %259 = arith.addf %255, %258 : vector<10x32xf32>
    %260 = arith.addf %213, %259 : vector<10x32xf32>
    %c1_187 = arith.constant 1 : index
    %c0_188 = arith.constant 0 : index
    %c0_189 = arith.constant 0 : index
    %261 = vector.load %arg6[%c1_187, %c0_188, %c0_189] : memref<2x1x32xf32, #tpu.memory_space<vmem>>, vector<1x1x32xf32>
    %262 = vector.shape_cast %261 : vector<1x1x32xf32> to vector<1x32xf32>
    %c1_190 = arith.constant 1 : index
    %c0_191 = arith.constant 0 : index
    %c0_192 = arith.constant 0 : index
    %263 = vector.load %arg7[%c1_190, %c0_191, %c0_192] : memref<2x1x32xf32, #tpu.memory_space<vmem>>, vector<1x1x32xf32>
    %264 = vector.shape_cast %263 : vector<1x1x32xf32> to vector<1x32xf32>
    %cst_193 = arith.constant dense<0.000000e+00> : vector<10xf32>
    %265 = vector.multi_reduction <add>, %260, %cst_193 [1] : vector<10x32xf32> to vector<10xf32>
    %266 = vector.shape_cast %265 : vector<10xf32> to vector<10x1xf32>
    %cst_194 = arith.constant 3.200000e+01 : f32
    %267 = vector.broadcast %cst_194 : f32 to vector<10x1xf32>
    %268 = arith.divf %266, %267 : vector<10x1xf32>
    %269 = vector.broadcast %268 : vector<10x1xf32> to vector<10x32xf32>
    %270 = arith.subf %260, %269 : vector<10x32xf32>
    %271 = arith.mulf %270, %270 : vector<10x32xf32>
    %cst_195 = arith.constant dense<0.000000e+00> : vector<10xf32>
    %272 = vector.multi_reduction <add>, %271, %cst_195 [1] : vector<10x32xf32> to vector<10xf32>
    %273 = vector.shape_cast %272 : vector<10xf32> to vector<10x1xf32>
    %cst_196 = arith.constant 3.200000e+01 : f32
    %274 = vector.broadcast %cst_196 : f32 to vector<10x1xf32>
    %275 = arith.divf %273, %274 : vector<10x1xf32>
    %cst_197 = arith.constant 9.99999997E-7 : f32
    %276 = vector.broadcast %cst_197 : f32 to vector<10x1xf32>
    %277 = arith.addf %275, %276 : vector<10x1xf32>
    %278 = math.rsqrt %277 : vector<10x1xf32>
    %279 = vector.broadcast %278 : vector<10x1xf32> to vector<10x32xf32>
    %280 = arith.mulf %270, %279 : vector<10x32xf32>
    %281 = vector.broadcast %262 : vector<1x32xf32> to vector<10x32xf32>
    %282 = arith.mulf %280, %281 : vector<10x32xf32>
    %283 = vector.broadcast %264 : vector<1x32xf32> to vector<10x32xf32>
    %284 = arith.addf %282, %283 : vector<10x32xf32>
    %cst_198 = arith.constant 0.000000e+00 : f32
    %285 = vector.broadcast %cst_198 : f32 to vector<10x32xf32>
    %c4_199 = arith.constant 4 : index
    %c0_200 = arith.constant 0 : index
    %c0_201 = arith.constant 0 : index
    %286 = vector.load %arg8[%c4_199, %c0_200, %c0_201] : memref<8x32x8xf32, #tpu.memory_space<vmem>>, vector<1x32x8xf32>
    %287 = vector.shape_cast %286 : vector<1x32x8xf32> to vector<32x8xf32>
    %cst_202 = arith.constant dense<0.000000e+00> : vector<10x8xf32>
    %288 = tpu.matmul %284, %287, %cst_202 {dimension_numbers = #tpu.dot_dimension_numbers<[1], [0], [0], [1], [0, 0, 1, 1], [], []>} : vector<10x32xf32>, vector<32x8xf32>, vector<10x8xf32> -> vector<10x8xf32>
    %c4_203 = arith.constant 4 : index
    %c0_204 = arith.constant 0 : index
    %c0_205 = arith.constant 0 : index
    %289 = vector.load %arg11[%c4_203, %c0_204, %c0_205] : memref<8x1x8xf32, #tpu.memory_space<vmem>>, vector<1x1x8xf32>
    %290 = vector.shape_cast %289 : vector<1x1x8xf32> to vector<1x8xf32>
    %291 = vector.broadcast %290 : vector<1x8xf32> to vector<10x8xf32>
    %292 = arith.addf %288, %291 : vector<10x8xf32>
    %c4_206 = arith.constant 4 : index
    %c0_207 = arith.constant 0 : index
    %c0_208 = arith.constant 0 : index
    %293 = vector.load %arg9[%c4_206, %c0_207, %c0_208] : memref<8x32x8xf32, #tpu.memory_space<vmem>>, vector<1x32x8xf32>
    %294 = vector.shape_cast %293 : vector<1x32x8xf32> to vector<32x8xf32>
    %cst_209 = arith.constant dense<0.000000e+00> : vector<10x8xf32>
    %295 = tpu.matmul %284, %294, %cst_209 {dimension_numbers = #tpu.dot_dimension_numbers<[1], [0], [0], [1], [0, 0, 1, 1], [], []>} : vector<10x32xf32>, vector<32x8xf32>, vector<10x8xf32> -> vector<10x8xf32>
    %c4_210 = arith.constant 4 : index
    %c0_211 = arith.constant 0 : index
    %c0_212 = arith.constant 0 : index
    %296 = vector.load %arg12[%c4_210, %c0_211, %c0_212] : memref<8x1x8xf32, #tpu.memory_space<vmem>>, vector<1x1x8xf32>
    %297 = vector.shape_cast %296 : vector<1x1x8xf32> to vector<1x8xf32>
    %298 = vector.broadcast %297 : vector<1x8xf32> to vector<10x8xf32>
    %299 = arith.addf %295, %298 : vector<10x8xf32>
    %c4_213 = arith.constant 4 : index
    %c0_214 = arith.constant 0 : index
    %c0_215 = arith.constant 0 : index
    %300 = vector.load %arg10[%c4_213, %c0_214, %c0_215] : memref<8x32x8xf32, #tpu.memory_space<vmem>>, vector<1x32x8xf32>
    %301 = vector.shape_cast %300 : vector<1x32x8xf32> to vector<32x8xf32>
    %cst_216 = arith.constant dense<0.000000e+00> : vector<10x8xf32>
    %302 = tpu.matmul %284, %301, %cst_216 {dimension_numbers = #tpu.dot_dimension_numbers<[1], [0], [0], [1], [0, 0, 1, 1], [], []>} : vector<10x32xf32>, vector<32x8xf32>, vector<10x8xf32> -> vector<10x8xf32>
    %c4_217 = arith.constant 4 : index
    %c0_218 = arith.constant 0 : index
    %c0_219 = arith.constant 0 : index
    %303 = vector.load %arg13[%c4_217, %c0_218, %c0_219] : memref<8x1x8xf32, #tpu.memory_space<vmem>>, vector<1x1x8xf32>
    %304 = vector.shape_cast %303 : vector<1x1x8xf32> to vector<1x8xf32>
    %305 = vector.broadcast %304 : vector<1x8xf32> to vector<10x8xf32>
    %306 = arith.addf %302, %305 : vector<10x8xf32>
    %cst_220 = arith.constant dense<0.000000e+00> : vector<10x10xf32>
    %307 = tpu.matmul %292, %299, %cst_220 {dimension_numbers = #tpu.dot_dimension_numbers<[1], [1], [0], [0], [0, 0, 1, 0], [], []>} : vector<10x8xf32>, vector<10x8xf32>, vector<10x10xf32> -> vector<10x10xf32>
    %cst_221 = arith.constant 0.353553385 : f32
    %308 = vector.broadcast %cst_221 : f32 to vector<10x10xf32>
    %309 = arith.mulf %307, %308 : vector<10x10xf32>
    %310 = arith.addf %309, %23 : vector<10x10xf32>
    %cst_222 = arith.constant dense<0xFF800000> : vector<10xf32>
    %311 = vector.multi_reduction <maximumf>, %310, %cst_222 [1] : vector<10x10xf32> to vector<10xf32>
    %312 = vector.shape_cast %311 : vector<10xf32> to vector<10x1xf32>
    %313 = vector.broadcast %312 : vector<10x1xf32> to vector<10x10xf32>
    %314 = arith.subf %310, %313 : vector<10x10xf32>
    %315 = math.exp %314 : vector<10x10xf32>
    %cst_223 = arith.constant dense<0.000000e+00> : vector<10xf32>
    %316 = vector.multi_reduction <add>, %315, %cst_223 [1] : vector<10x10xf32> to vector<10xf32>
    %317 = vector.shape_cast %316 : vector<10xf32> to vector<10x1xf32>
    %318 = tpu.reciprocal %317 {approx = true} : vector<10x1xf32> -> vector<10x1xf32>
    %319 = vector.broadcast %318 : vector<10x1xf32> to vector<10x10xf32>
    %320 = arith.mulf %315, %319 : vector<10x10xf32>
    %cst_224 = arith.constant dense<0.000000e+00> : vector<10x8xf32>
    %321 = tpu.matmul %320, %306, %cst_224 {dimension_numbers = #tpu.dot_dimension_numbers<[1], [0], [0], [1], [0, 0, 1, 1], [], []>} : vector<10x10xf32>, vector<10x8xf32>, vector<10x8xf32> -> vector<10x8xf32>
    %c4_225 = arith.constant 4 : index
    %c0_226 = arith.constant 0 : index
    %c0_227 = arith.constant 0 : index
    %322 = vector.load %arg14[%c4_225, %c0_226, %c0_227] : memref<8x8x32xf32, #tpu.memory_space<vmem>>, vector<1x8x32xf32>
    %323 = vector.shape_cast %322 : vector<1x8x32xf32> to vector<8x32xf32>
    %cst_228 = arith.constant dense<0.000000e+00> : vector<10x32xf32>
    %324 = tpu.matmul %321, %323, %cst_228 {dimension_numbers = #tpu.dot_dimension_numbers<[1], [0], [0], [1], [0, 0, 1, 1], [], []>} : vector<10x8xf32>, vector<8x32xf32>, vector<10x32xf32> -> vector<10x32xf32>
    %325 = arith.addf %285, %324 : vector<10x32xf32>
    %c5_229 = arith.constant 5 : index
    %c0_230 = arith.constant 0 : index
    %c0_231 = arith.constant 0 : index
    %326 = vector.load %arg8[%c5_229, %c0_230, %c0_231] : memref<8x32x8xf32, #tpu.memory_space<vmem>>, vector<1x32x8xf32>
    %327 = vector.shape_cast %326 : vector<1x32x8xf32> to vector<32x8xf32>
    %cst_232 = arith.constant dense<0.000000e+00> : vector<10x8xf32>
    %328 = tpu.matmul %284, %327, %cst_232 {dimension_numbers = #tpu.dot_dimension_numbers<[1], [0], [0], [1], [0, 0, 1, 1], [], []>} : vector<10x32xf32>, vector<32x8xf32>, vector<10x8xf32> -> vector<10x8xf32>
    %c5_233 = arith.constant 5 : index
    %c0_234 = arith.constant 0 : index
    %c0_235 = arith.constant 0 : index
    %329 = vector.load %arg11[%c5_233, %c0_234, %c0_235] : memref<8x1x8xf32, #tpu.memory_space<vmem>>, vector<1x1x8xf32>
    %330 = vector.shape_cast %329 : vector<1x1x8xf32> to vector<1x8xf32>
    %331 = vector.broadcast %330 : vector<1x8xf32> to vector<10x8xf32>
    %332 = arith.addf %328, %331 : vector<10x8xf32>
    %c5_236 = arith.constant 5 : index
    %c0_237 = arith.constant 0 : index
    %c0_238 = arith.constant 0 : index
    %333 = vector.load %arg9[%c5_236, %c0_237, %c0_238] : memref<8x32x8xf32, #tpu.memory_space<vmem>>, vector<1x32x8xf32>
    %334 = vector.shape_cast %333 : vector<1x32x8xf32> to vector<32x8xf32>
    %cst_239 = arith.constant dense<0.000000e+00> : vector<10x8xf32>
    %335 = tpu.matmul %284, %334, %cst_239 {dimension_numbers = #tpu.dot_dimension_numbers<[1], [0], [0], [1], [0, 0, 1, 1], [], []>} : vector<10x32xf32>, vector<32x8xf32>, vector<10x8xf32> -> vector<10x8xf32>
    %c5_240 = arith.constant 5 : index
    %c0_241 = arith.constant 0 : index
    %c0_242 = arith.constant 0 : index
    %336 = vector.load %arg12[%c5_240, %c0_241, %c0_242] : memref<8x1x8xf32, #tpu.memory_space<vmem>>, vector<1x1x8xf32>
    %337 = vector.shape_cast %336 : vector<1x1x8xf32> to vector<1x8xf32>
    %338 = vector.broadcast %337 : vector<1x8xf32> to vector<10x8xf32>
    %339 = arith.addf %335, %338 : vector<10x8xf32>
    %c5_243 = arith.constant 5 : index
    %c0_244 = arith.constant 0 : index
    %c0_245 = arith.constant 0 : index
    %340 = vector.load %arg10[%c5_243, %c0_244, %c0_245] : memref<8x32x8xf32, #tpu.memory_space<vmem>>, vector<1x32x8xf32>
    %341 = vector.shape_cast %340 : vector<1x32x8xf32> to vector<32x8xf32>
    %cst_246 = arith.constant dense<0.000000e+00> : vector<10x8xf32>
    %342 = tpu.matmul %284, %341, %cst_246 {dimension_numbers = #tpu.dot_dimension_numbers<[1], [0], [0], [1], [0, 0, 1, 1], [], []>} : vector<10x32xf32>, vector<32x8xf32>, vector<10x8xf32> -> vector<10x8xf32>
    %c5_247 = arith.constant 5 : index
    %c0_248 = arith.constant 0 : index
    %c0_249 = arith.constant 0 : index
    %343 = vector.load %arg13[%c5_247, %c0_248, %c0_249] : memref<8x1x8xf32, #tpu.memory_space<vmem>>, vector<1x1x8xf32>
    %344 = vector.shape_cast %343 : vector<1x1x8xf32> to vector<1x8xf32>
    %345 = vector.broadcast %344 : vector<1x8xf32> to vector<10x8xf32>
    %346 = arith.addf %342, %345 : vector<10x8xf32>
    %cst_250 = arith.constant dense<0.000000e+00> : vector<10x10xf32>
    %347 = tpu.matmul %332, %339, %cst_250 {dimension_numbers = #tpu.dot_dimension_numbers<[1], [1], [0], [0], [0, 0, 1, 0], [], []>} : vector<10x8xf32>, vector<10x8xf32>, vector<10x10xf32> -> vector<10x10xf32>
    %cst_251 = arith.constant 0.353553385 : f32
    %348 = vector.broadcast %cst_251 : f32 to vector<10x10xf32>
    %349 = arith.mulf %347, %348 : vector<10x10xf32>
    %350 = arith.addf %349, %23 : vector<10x10xf32>
    %cst_252 = arith.constant dense<0xFF800000> : vector<10xf32>
    %351 = vector.multi_reduction <maximumf>, %350, %cst_252 [1] : vector<10x10xf32> to vector<10xf32>
    %352 = vector.shape_cast %351 : vector<10xf32> to vector<10x1xf32>
    %353 = vector.broadcast %352 : vector<10x1xf32> to vector<10x10xf32>
    %354 = arith.subf %350, %353 : vector<10x10xf32>
    %355 = math.exp %354 : vector<10x10xf32>
    %cst_253 = arith.constant dense<0.000000e+00> : vector<10xf32>
    %356 = vector.multi_reduction <add>, %355, %cst_253 [1] : vector<10x10xf32> to vector<10xf32>
    %357 = vector.shape_cast %356 : vector<10xf32> to vector<10x1xf32>
    %358 = tpu.reciprocal %357 {approx = true} : vector<10x1xf32> -> vector<10x1xf32>
    %359 = vector.broadcast %358 : vector<10x1xf32> to vector<10x10xf32>
    %360 = arith.mulf %355, %359 : vector<10x10xf32>
    %cst_254 = arith.constant dense<0.000000e+00> : vector<10x8xf32>
    %361 = tpu.matmul %360, %346, %cst_254 {dimension_numbers = #tpu.dot_dimension_numbers<[1], [0], [0], [1], [0, 0, 1, 1], [], []>} : vector<10x10xf32>, vector<10x8xf32>, vector<10x8xf32> -> vector<10x8xf32>
    %c5_255 = arith.constant 5 : index
    %c0_256 = arith.constant 0 : index
    %c0_257 = arith.constant 0 : index
    %362 = vector.load %arg14[%c5_255, %c0_256, %c0_257] : memref<8x8x32xf32, #tpu.memory_space<vmem>>, vector<1x8x32xf32>
    %363 = vector.shape_cast %362 : vector<1x8x32xf32> to vector<8x32xf32>
    %cst_258 = arith.constant dense<0.000000e+00> : vector<10x32xf32>
    %364 = tpu.matmul %361, %363, %cst_258 {dimension_numbers = #tpu.dot_dimension_numbers<[1], [0], [0], [1], [0, 0, 1, 1], [], []>} : vector<10x8xf32>, vector<8x32xf32>, vector<10x32xf32> -> vector<10x32xf32>
    %365 = arith.addf %325, %364 : vector<10x32xf32>
    %c6_259 = arith.constant 6 : index
    %c0_260 = arith.constant 0 : index
    %c0_261 = arith.constant 0 : index
    %366 = vector.load %arg8[%c6_259, %c0_260, %c0_261] : memref<8x32x8xf32, #tpu.memory_space<vmem>>, vector<1x32x8xf32>
    %367 = vector.shape_cast %366 : vector<1x32x8xf32> to vector<32x8xf32>
    %cst_262 = arith.constant dense<0.000000e+00> : vector<10x8xf32>
    %368 = tpu.matmul %284, %367, %cst_262 {dimension_numbers = #tpu.dot_dimension_numbers<[1], [0], [0], [1], [0, 0, 1, 1], [], []>} : vector<10x32xf32>, vector<32x8xf32>, vector<10x8xf32> -> vector<10x8xf32>
    %c6_263 = arith.constant 6 : index
    %c0_264 = arith.constant 0 : index
    %c0_265 = arith.constant 0 : index
    %369 = vector.load %arg11[%c6_263, %c0_264, %c0_265] : memref<8x1x8xf32, #tpu.memory_space<vmem>>, vector<1x1x8xf32>
    %370 = vector.shape_cast %369 : vector<1x1x8xf32> to vector<1x8xf32>
    %371 = vector.broadcast %370 : vector<1x8xf32> to vector<10x8xf32>
    %372 = arith.addf %368, %371 : vector<10x8xf32>
    %c6_266 = arith.constant 6 : index
    %c0_267 = arith.constant 0 : index
    %c0_268 = arith.constant 0 : index
    %373 = vector.load %arg9[%c6_266, %c0_267, %c0_268] : memref<8x32x8xf32, #tpu.memory_space<vmem>>, vector<1x32x8xf32>
    %374 = vector.shape_cast %373 : vector<1x32x8xf32> to vector<32x8xf32>
    %cst_269 = arith.constant dense<0.000000e+00> : vector<10x8xf32>
    %375 = tpu.matmul %284, %374, %cst_269 {dimension_numbers = #tpu.dot_dimension_numbers<[1], [0], [0], [1], [0, 0, 1, 1], [], []>} : vector<10x32xf32>, vector<32x8xf32>, vector<10x8xf32> -> vector<10x8xf32>
    %c6_270 = arith.constant 6 : index
    %c0_271 = arith.constant 0 : index
    %c0_272 = arith.constant 0 : index
    %376 = vector.load %arg12[%c6_270, %c0_271, %c0_272] : memref<8x1x8xf32, #tpu.memory_space<vmem>>, vector<1x1x8xf32>
    %377 = vector.shape_cast %376 : vector<1x1x8xf32> to vector<1x8xf32>
    %378 = vector.broadcast %377 : vector<1x8xf32> to vector<10x8xf32>
    %379 = arith.addf %375, %378 : vector<10x8xf32>
    %c6_273 = arith.constant 6 : index
    %c0_274 = arith.constant 0 : index
    %c0_275 = arith.constant 0 : index
    %380 = vector.load %arg10[%c6_273, %c0_274, %c0_275] : memref<8x32x8xf32, #tpu.memory_space<vmem>>, vector<1x32x8xf32>
    %381 = vector.shape_cast %380 : vector<1x32x8xf32> to vector<32x8xf32>
    %cst_276 = arith.constant dense<0.000000e+00> : vector<10x8xf32>
    %382 = tpu.matmul %284, %381, %cst_276 {dimension_numbers = #tpu.dot_dimension_numbers<[1], [0], [0], [1], [0, 0, 1, 1], [], []>} : vector<10x32xf32>, vector<32x8xf32>, vector<10x8xf32> -> vector<10x8xf32>
    %c6_277 = arith.constant 6 : index
    %c0_278 = arith.constant 0 : index
    %c0_279 = arith.constant 0 : index
    %383 = vector.load %arg13[%c6_277, %c0_278, %c0_279] : memref<8x1x8xf32, #tpu.memory_space<vmem>>, vector<1x1x8xf32>
    %384 = vector.shape_cast %383 : vector<1x1x8xf32> to vector<1x8xf32>
    %385 = vector.broadcast %384 : vector<1x8xf32> to vector<10x8xf32>
    %386 = arith.addf %382, %385 : vector<10x8xf32>
    %cst_280 = arith.constant dense<0.000000e+00> : vector<10x10xf32>
    %387 = tpu.matmul %372, %379, %cst_280 {dimension_numbers = #tpu.dot_dimension_numbers<[1], [1], [0], [0], [0, 0, 1, 0], [], []>} : vector<10x8xf32>, vector<10x8xf32>, vector<10x10xf32> -> vector<10x10xf32>
    %cst_281 = arith.constant 0.353553385 : f32
    %388 = vector.broadcast %cst_281 : f32 to vector<10x10xf32>
    %389 = arith.mulf %387, %388 : vector<10x10xf32>
    %390 = arith.addf %389, %23 : vector<10x10xf32>
    %cst_282 = arith.constant dense<0xFF800000> : vector<10xf32>
    %391 = vector.multi_reduction <maximumf>, %390, %cst_282 [1] : vector<10x10xf32> to vector<10xf32>
    %392 = vector.shape_cast %391 : vector<10xf32> to vector<10x1xf32>
    %393 = vector.broadcast %392 : vector<10x1xf32> to vector<10x10xf32>
    %394 = arith.subf %390, %393 : vector<10x10xf32>
    %395 = math.exp %394 : vector<10x10xf32>
    %cst_283 = arith.constant dense<0.000000e+00> : vector<10xf32>
    %396 = vector.multi_reduction <add>, %395, %cst_283 [1] : vector<10x10xf32> to vector<10xf32>
    %397 = vector.shape_cast %396 : vector<10xf32> to vector<10x1xf32>
    %398 = tpu.reciprocal %397 {approx = true} : vector<10x1xf32> -> vector<10x1xf32>
    %399 = vector.broadcast %398 : vector<10x1xf32> to vector<10x10xf32>
    %400 = arith.mulf %395, %399 : vector<10x10xf32>
    %cst_284 = arith.constant dense<0.000000e+00> : vector<10x8xf32>
    %401 = tpu.matmul %400, %386, %cst_284 {dimension_numbers = #tpu.dot_dimension_numbers<[1], [0], [0], [1], [0, 0, 1, 1], [], []>} : vector<10x10xf32>, vector<10x8xf32>, vector<10x8xf32> -> vector<10x8xf32>
    %c6_285 = arith.constant 6 : index
    %c0_286 = arith.constant 0 : index
    %c0_287 = arith.constant 0 : index
    %402 = vector.load %arg14[%c6_285, %c0_286, %c0_287] : memref<8x8x32xf32, #tpu.memory_space<vmem>>, vector<1x8x32xf32>
    %403 = vector.shape_cast %402 : vector<1x8x32xf32> to vector<8x32xf32>
    %cst_288 = arith.constant dense<0.000000e+00> : vector<10x32xf32>
    %404 = tpu.matmul %401, %403, %cst_288 {dimension_numbers = #tpu.dot_dimension_numbers<[1], [0], [0], [1], [0, 0, 1, 1], [], []>} : vector<10x8xf32>, vector<8x32xf32>, vector<10x32xf32> -> vector<10x32xf32>
    %405 = arith.addf %365, %404 : vector<10x32xf32>
    %c7 = arith.constant 7 : index
    %c0_289 = arith.constant 0 : index
    %c0_290 = arith.constant 0 : index
    %406 = vector.load %arg8[%c7, %c0_289, %c0_290] : memref<8x32x8xf32, #tpu.memory_space<vmem>>, vector<1x32x8xf32>
    %407 = vector.shape_cast %406 : vector<1x32x8xf32> to vector<32x8xf32>
    %cst_291 = arith.constant dense<0.000000e+00> : vector<10x8xf32>
    %408 = tpu.matmul %284, %407, %cst_291 {dimension_numbers = #tpu.dot_dimension_numbers<[1], [0], [0], [1], [0, 0, 1, 1], [], []>} : vector<10x32xf32>, vector<32x8xf32>, vector<10x8xf32> -> vector<10x8xf32>
    %c7_292 = arith.constant 7 : index
    %c0_293 = arith.constant 0 : index
    %c0_294 = arith.constant 0 : index
    %409 = vector.load %arg11[%c7_292, %c0_293, %c0_294] : memref<8x1x8xf32, #tpu.memory_space<vmem>>, vector<1x1x8xf32>
    %410 = vector.shape_cast %409 : vector<1x1x8xf32> to vector<1x8xf32>
    %411 = vector.broadcast %410 : vector<1x8xf32> to vector<10x8xf32>
    %412 = arith.addf %408, %411 : vector<10x8xf32>
    %c7_295 = arith.constant 7 : index
    %c0_296 = arith.constant 0 : index
    %c0_297 = arith.constant 0 : index
    %413 = vector.load %arg9[%c7_295, %c0_296, %c0_297] : memref<8x32x8xf32, #tpu.memory_space<vmem>>, vector<1x32x8xf32>
    %414 = vector.shape_cast %413 : vector<1x32x8xf32> to vector<32x8xf32>
    %cst_298 = arith.constant dense<0.000000e+00> : vector<10x8xf32>
    %415 = tpu.matmul %284, %414, %cst_298 {dimension_numbers = #tpu.dot_dimension_numbers<[1], [0], [0], [1], [0, 0, 1, 1], [], []>} : vector<10x32xf32>, vector<32x8xf32>, vector<10x8xf32> -> vector<10x8xf32>
    %c7_299 = arith.constant 7 : index
    %c0_300 = arith.constant 0 : index
    %c0_301 = arith.constant 0 : index
    %416 = vector.load %arg12[%c7_299, %c0_300, %c0_301] : memref<8x1x8xf32, #tpu.memory_space<vmem>>, vector<1x1x8xf32>
    %417 = vector.shape_cast %416 : vector<1x1x8xf32> to vector<1x8xf32>
    %418 = vector.broadcast %417 : vector<1x8xf32> to vector<10x8xf32>
    %419 = arith.addf %415, %418 : vector<10x8xf32>
    %c7_302 = arith.constant 7 : index
    %c0_303 = arith.constant 0 : index
    %c0_304 = arith.constant 0 : index
    %420 = vector.load %arg10[%c7_302, %c0_303, %c0_304] : memref<8x32x8xf32, #tpu.memory_space<vmem>>, vector<1x32x8xf32>
    %421 = vector.shape_cast %420 : vector<1x32x8xf32> to vector<32x8xf32>
    %cst_305 = arith.constant dense<0.000000e+00> : vector<10x8xf32>
    %422 = tpu.matmul %284, %421, %cst_305 {dimension_numbers = #tpu.dot_dimension_numbers<[1], [0], [0], [1], [0, 0, 1, 1], [], []>} : vector<10x32xf32>, vector<32x8xf32>, vector<10x8xf32> -> vector<10x8xf32>
    %c7_306 = arith.constant 7 : index
    %c0_307 = arith.constant 0 : index
    %c0_308 = arith.constant 0 : index
    %423 = vector.load %arg13[%c7_306, %c0_307, %c0_308] : memref<8x1x8xf32, #tpu.memory_space<vmem>>, vector<1x1x8xf32>
    %424 = vector.shape_cast %423 : vector<1x1x8xf32> to vector<1x8xf32>
    %425 = vector.broadcast %424 : vector<1x8xf32> to vector<10x8xf32>
    %426 = arith.addf %422, %425 : vector<10x8xf32>
    %cst_309 = arith.constant dense<0.000000e+00> : vector<10x10xf32>
    %427 = tpu.matmul %412, %419, %cst_309 {dimension_numbers = #tpu.dot_dimension_numbers<[1], [1], [0], [0], [0, 0, 1, 0], [], []>} : vector<10x8xf32>, vector<10x8xf32>, vector<10x10xf32> -> vector<10x10xf32>
    %cst_310 = arith.constant 0.353553385 : f32
    %428 = vector.broadcast %cst_310 : f32 to vector<10x10xf32>
    %429 = arith.mulf %427, %428 : vector<10x10xf32>
    %430 = arith.addf %429, %23 : vector<10x10xf32>
    %cst_311 = arith.constant dense<0xFF800000> : vector<10xf32>
    %431 = vector.multi_reduction <maximumf>, %430, %cst_311 [1] : vector<10x10xf32> to vector<10xf32>
    %432 = vector.shape_cast %431 : vector<10xf32> to vector<10x1xf32>
    %433 = vector.broadcast %432 : vector<10x1xf32> to vector<10x10xf32>
    %434 = arith.subf %430, %433 : vector<10x10xf32>
    %435 = math.exp %434 : vector<10x10xf32>
    %cst_312 = arith.constant dense<0.000000e+00> : vector<10xf32>
    %436 = vector.multi_reduction <add>, %435, %cst_312 [1] : vector<10x10xf32> to vector<10xf32>
    %437 = vector.shape_cast %436 : vector<10xf32> to vector<10x1xf32>
    %438 = tpu.reciprocal %437 {approx = true} : vector<10x1xf32> -> vector<10x1xf32>
    %439 = vector.broadcast %438 : vector<10x1xf32> to vector<10x10xf32>
    %440 = arith.mulf %435, %439 : vector<10x10xf32>
    %cst_313 = arith.constant dense<0.000000e+00> : vector<10x8xf32>
    %441 = tpu.matmul %440, %426, %cst_313 {dimension_numbers = #tpu.dot_dimension_numbers<[1], [0], [0], [1], [0, 0, 1, 1], [], []>} : vector<10x10xf32>, vector<10x8xf32>, vector<10x8xf32> -> vector<10x8xf32>
    %c7_314 = arith.constant 7 : index
    %c0_315 = arith.constant 0 : index
    %c0_316 = arith.constant 0 : index
    %442 = vector.load %arg14[%c7_314, %c0_315, %c0_316] : memref<8x8x32xf32, #tpu.memory_space<vmem>>, vector<1x8x32xf32>
    %443 = vector.shape_cast %442 : vector<1x8x32xf32> to vector<8x32xf32>
    %cst_317 = arith.constant dense<0.000000e+00> : vector<10x32xf32>
    %444 = tpu.matmul %441, %443, %cst_317 {dimension_numbers = #tpu.dot_dimension_numbers<[1], [0], [0], [1], [0, 0, 1, 1], [], []>} : vector<10x8xf32>, vector<8x32xf32>, vector<10x32xf32> -> vector<10x32xf32>
    %445 = arith.addf %405, %444 : vector<10x32xf32>
    %c1_318 = arith.constant 1 : index
    %c0_319 = arith.constant 0 : index
    %c0_320 = arith.constant 0 : index
    %446 = vector.load %arg15[%c1_318, %c0_319, %c0_320] : memref<2x1x32xf32, #tpu.memory_space<vmem>>, vector<1x1x32xf32>
    %447 = vector.shape_cast %446 : vector<1x1x32xf32> to vector<1x32xf32>
    %448 = vector.broadcast %447 : vector<1x32xf32> to vector<10x32xf32>
    %449 = arith.addf %445, %448 : vector<10x32xf32>
    %450 = arith.addf %260, %449 : vector<10x32xf32>
    %c1_321 = arith.constant 1 : index
    %c0_322 = arith.constant 0 : index
    %c0_323 = arith.constant 0 : index
    %451 = vector.load %arg16[%c1_321, %c0_322, %c0_323] : memref<2x1x32xf32, #tpu.memory_space<vmem>>, vector<1x1x32xf32>
    %452 = vector.shape_cast %451 : vector<1x1x32xf32> to vector<1x32xf32>
    %c1_324 = arith.constant 1 : index
    %c0_325 = arith.constant 0 : index
    %c0_326 = arith.constant 0 : index
    %453 = vector.load %arg17[%c1_324, %c0_325, %c0_326] : memref<2x1x32xf32, #tpu.memory_space<vmem>>, vector<1x1x32xf32>
    %454 = vector.shape_cast %453 : vector<1x1x32xf32> to vector<1x32xf32>
    %cst_327 = arith.constant dense<0.000000e+00> : vector<10xf32>
    %455 = vector.multi_reduction <add>, %450, %cst_327 [1] : vector<10x32xf32> to vector<10xf32>
    %456 = vector.shape_cast %455 : vector<10xf32> to vector<10x1xf32>
    %cst_328 = arith.constant 3.200000e+01 : f32
    %457 = vector.broadcast %cst_328 : f32 to vector<10x1xf32>
    %458 = arith.divf %456, %457 : vector<10x1xf32>
    %459 = vector.broadcast %458 : vector<10x1xf32> to vector<10x32xf32>
    %460 = arith.subf %450, %459 : vector<10x32xf32>
    %461 = arith.mulf %460, %460 : vector<10x32xf32>
    %cst_329 = arith.constant dense<0.000000e+00> : vector<10xf32>
    %462 = vector.multi_reduction <add>, %461, %cst_329 [1] : vector<10x32xf32> to vector<10xf32>
    %463 = vector.shape_cast %462 : vector<10xf32> to vector<10x1xf32>
    %cst_330 = arith.constant 3.200000e+01 : f32
    %464 = vector.broadcast %cst_330 : f32 to vector<10x1xf32>
    %465 = arith.divf %463, %464 : vector<10x1xf32>
    %cst_331 = arith.constant 9.99999997E-7 : f32
    %466 = vector.broadcast %cst_331 : f32 to vector<10x1xf32>
    %467 = arith.addf %465, %466 : vector<10x1xf32>
    %468 = math.rsqrt %467 : vector<10x1xf32>
    %469 = vector.broadcast %468 : vector<10x1xf32> to vector<10x32xf32>
    %470 = arith.mulf %460, %469 : vector<10x32xf32>
    %471 = vector.broadcast %452 : vector<1x32xf32> to vector<10x32xf32>
    %472 = arith.mulf %470, %471 : vector<10x32xf32>
    %473 = vector.broadcast %454 : vector<1x32xf32> to vector<10x32xf32>
    %474 = arith.addf %472, %473 : vector<10x32xf32>
    %c1_332 = arith.constant 1 : index
    %c0_333 = arith.constant 0 : index
    %c0_334 = arith.constant 0 : index
    %475 = vector.load %arg18[%c1_332, %c0_333, %c0_334] : memref<2x32x64xf32, #tpu.memory_space<vmem>>, vector<1x32x64xf32>
    %476 = vector.shape_cast %475 : vector<1x32x64xf32> to vector<32x64xf32>
    %cst_335 = arith.constant dense<0.000000e+00> : vector<10x64xf32>
    %477 = tpu.matmul %474, %476, %cst_335 {dimension_numbers = #tpu.dot_dimension_numbers<[1], [0], [0], [1], [0, 0, 1, 1], [], []>} : vector<10x32xf32>, vector<32x64xf32>, vector<10x64xf32> -> vector<10x64xf32>
    %c1_336 = arith.constant 1 : index
    %c0_337 = arith.constant 0 : index
    %c0_338 = arith.constant 0 : index
    %478 = vector.load %arg19[%c1_336, %c0_337, %c0_338] : memref<2x1x64xf32, #tpu.memory_space<vmem>>, vector<1x1x64xf32>
    %479 = vector.shape_cast %478 : vector<1x1x64xf32> to vector<1x64xf32>
    %480 = vector.broadcast %479 : vector<1x64xf32> to vector<10x64xf32>
    %481 = arith.addf %477, %480 : vector<10x64xf32>
    %cst_339 = arith.constant 5.000000e-01 : f32
    %482 = vector.broadcast %cst_339 : f32 to vector<10x64xf32>
    %483 = arith.mulf %482, %481 : vector<10x64xf32>
    %cst_340 = arith.constant 0.707106769 : f32
    %484 = vector.broadcast %cst_340 : f32 to vector<10x64xf32>
    %485 = arith.mulf %481, %484 : vector<10x64xf32>
    %486 = math.erf %485 : vector<10x64xf32>
    %cst_341 = arith.constant 1.000000e+00 : f32
    %487 = vector.broadcast %cst_341 : f32 to vector<10x64xf32>
    %488 = arith.addf %487, %486 : vector<10x64xf32>
    %489 = arith.mulf %483, %488 : vector<10x64xf32>
    %c1_342 = arith.constant 1 : index
    %c0_343 = arith.constant 0 : index
    %c0_344 = arith.constant 0 : index
    %490 = vector.load %arg20[%c1_342, %c0_343, %c0_344] : memref<2x64x32xf32, #tpu.memory_space<vmem>>, vector<1x64x32xf32>
    %491 = vector.shape_cast %490 : vector<1x64x32xf32> to vector<64x32xf32>
    %cst_345 = arith.constant dense<0.000000e+00> : vector<10x32xf32>
    %492 = tpu.matmul %489, %491, %cst_345 {dimension_numbers = #tpu.dot_dimension_numbers<[1], [0], [0], [1], [0, 0, 1, 1], [], []>} : vector<10x64xf32>, vector<64x32xf32>, vector<10x32xf32> -> vector<10x32xf32>
    %c1_346 = arith.constant 1 : index
    %c0_347 = arith.constant 0 : index
    %c0_348 = arith.constant 0 : index
    %493 = vector.load %arg21[%c1_346, %c0_347, %c0_348] : memref<2x1x32xf32, #tpu.memory_space<vmem>>, vector<1x1x32xf32>
    %494 = vector.shape_cast %493 : vector<1x1x32xf32> to vector<1x32xf32>
    %495 = vector.broadcast %494 : vector<1x32xf32> to vector<10x32xf32>
    %496 = arith.addf %492, %495 : vector<10x32xf32>
    %497 = arith.addf %450, %496 : vector<10x32xf32>
    %c0_349 = arith.constant 0 : index
    %c0_350 = arith.constant 0 : index
    %498 = vector.load %arg29[%c0_349, %c0_350] : memref<10x32xf32, #tpu.memory_space<vmem>>, vector<10x32xf32>
    tpu.vector_store %arg29[%c0_349, %c0_350], %497 {strides = array<i32>} : memref<10x32xf32, #tpu.memory_space<vmem>>, vector<10x32xf32>,
    %c0_351 = arith.constant 0 : index
    %c0_352 = arith.constant 0 : index
    %499 = vector.load %arg29[%c0_351, %c0_352] : memref<10x32xf32, #tpu.memory_space<vmem>>, vector<1x32xf32>
    %c0_353 = arith.constant 0 : index
    %c0_354 = arith.constant 0 : index
    %500 = vector.load %arg30[%c0_353, %c0_354] : memref<2x32xf32, #tpu.memory_space<vmem>>, vector<1x32xf32>
    tpu.vector_store %arg30[%c0_353, %c0_354], %499 {strides = array<i32>} : memref<2x32xf32, #tpu.memory_space<vmem>>, vector<1x32xf32>,
    %c5_355 = arith.constant 5 : index
    %c0_356 = arith.constant 0 : index
    %501 = vector.load %arg29[%c5_355, %c0_356] : memref<10x32xf32, #tpu.memory_space<vmem>>, vector<1x32xf32>
    %c1_357 = arith.constant 1 : index
    %c0_358 = arith.constant 0 : index
    %502 = vector.load %arg30[%c1_357, %c0_358] : memref<2x32xf32, #tpu.memory_space<vmem>>, vector<1x32xf32>
    tpu.vector_store %arg30[%c1_357, %c0_358], %501 {strides = array<i32>} : memref<2x32xf32, #tpu.memory_space<vmem>>, vector<1x32xf32>,
    %c0_359 = arith.constant 0 : index
    %c0_360 = arith.constant 0 : index
    %503 = vector.load %arg30[%c0_359, %c0_360] : memref<2x32xf32, #tpu.memory_space<vmem>>, vector<2x32xf32>
    %c0_361 = arith.constant 0 : index
    %c0_362 = arith.constant 0 : index
    %504 = vector.load %arg22[%c0_361, %c0_362] : memref<1x32xf32, #tpu.memory_space<vmem>>, vector<1x32xf32>
    %c0_363 = arith.constant 0 : index
    %c0_364 = arith.constant 0 : index
    %505 = vector.load %arg23[%c0_363, %c0_364] : memref<1x32xf32, #tpu.memory_space<vmem>>, vector<1x32xf32>
    %cst_365 = arith.constant dense<0.000000e+00> : vector<2xf32>
    %506 = vector.multi_reduction <add>, %503, %cst_365 [1] : vector<2x32xf32> to vector<2xf32>
    %507 = vector.shape_cast %506 : vector<2xf32> to vector<2x1xf32>
    %cst_366 = arith.constant 3.200000e+01 : f32
    %508 = vector.broadcast %cst_366 : f32 to vector<2x1xf32>
    %509 = arith.divf %507, %508 : vector<2x1xf32>
    %510 = vector.broadcast %509 : vector<2x1xf32> to vector<2x32xf32>
    %511 = arith.subf %503, %510 : vector<2x32xf32>
    %512 = arith.mulf %511, %511 : vector<2x32xf32>
    %cst_367 = arith.constant dense<0.000000e+00> : vector<2xf32>
    %513 = vector.multi_reduction <add>, %512, %cst_367 [1] : vector<2x32xf32> to vector<2xf32>
    %514 = vector.shape_cast %513 : vector<2xf32> to vector<2x1xf32>
    %cst_368 = arith.constant 3.200000e+01 : f32
    %515 = vector.broadcast %cst_368 : f32 to vector<2x1xf32>
    %516 = arith.divf %514, %515 : vector<2x1xf32>
    %cst_369 = arith.constant 9.99999997E-7 : f32
    %517 = vector.broadcast %cst_369 : f32 to vector<2x1xf32>
    %518 = arith.addf %516, %517 : vector<2x1xf32>
    %519 = math.rsqrt %518 : vector<2x1xf32>
    %520 = vector.broadcast %519 : vector<2x1xf32> to vector<2x32xf32>
    %521 = arith.mulf %511, %520 : vector<2x32xf32>
    %522 = vector.broadcast %504 : vector<1x32xf32> to vector<2x32xf32>
    %523 = arith.mulf %521, %522 : vector<2x32xf32>
    %524 = vector.broadcast %505 : vector<1x32xf32> to vector<2x32xf32>
    %525 = arith.addf %523, %524 : vector<2x32xf32>
    %c0_370 = arith.constant 0 : index
    %c0_371 = arith.constant 0 : index
    %526 = vector.load %arg24[%c0_370, %c0_371] : memref<32x320xf32, #tpu.memory_space<vmem>>, vector<32x320xf32>
    %cst_372 = arith.constant dense<0.000000e+00> : vector<2x320xf32>
    %527 = tpu.matmul %525, %526, %cst_372 {dimension_numbers = #tpu.dot_dimension_numbers<[1], [0], [0], [1], [0, 0, 1, 1], [], []>} : vector<2x32xf32>, vector<32x320xf32>, vector<2x320xf32> -> vector<2x320xf32>
    %c0_373 = arith.constant 0 : index
    %c0_374 = arith.constant 0 : index
    %528 = vector.load %arg25[%c0_373, %c0_374] : memref<1x320xf32, #tpu.memory_space<vmem>>, vector<1x320xf32>
    %529 = vector.broadcast %528 : vector<1x320xf32> to vector<2x320xf32>
    %530 = arith.addf %527, %529 : vector<2x320xf32>
    %cst_375 = arith.constant 5.000000e-01 : f32
    %531 = vector.broadcast %cst_375 : f32 to vector<2x320xf32>
    %532 = arith.mulf %531, %530 : vector<2x320xf32>
    %cst_376 = arith.constant 0.707106769 : f32
    %533 = vector.broadcast %cst_376 : f32 to vector<2x320xf32>
    %534 = arith.mulf %530, %533 : vector<2x320xf32>
    %535 = math.erf %534 : vector<2x320xf32>
    %cst_377 = arith.constant 1.000000e+00 : f32
    %536 = vector.broadcast %cst_377 : f32 to vector<2x320xf32>
    %537 = arith.addf %536, %535 : vector<2x320xf32>
    %538 = arith.mulf %532, %537 : vector<2x320xf32>
    %c0_378 = arith.constant 0 : index
    %c0_379 = arith.constant 0 : index
    %539 = vector.load %arg26[%c0_378, %c0_379] : memref<320x128xf32, #tpu.memory_space<vmem>>, vector<320x128xf32>
    %cst_380 = arith.constant dense<0.000000e+00> : vector<2x128xf32>
    %540 = tpu.matmul %538, %539, %cst_380 {dimension_numbers = #tpu.dot_dimension_numbers<[1], [0], [0], [1], [0, 0, 1, 1], [], []>} : vector<2x320xf32>, vector<320x128xf32>, vector<2x128xf32> -> vector<2x128xf32>
    %c0_381 = arith.constant 0 : index
    %c0_382 = arith.constant 0 : index
    %541 = vector.load %arg27[%c0_381, %c0_382] : memref<1x128xf32, #tpu.memory_space<vmem>>, vector<1x128xf32>
    %542 = vector.broadcast %541 : vector<1x128xf32> to vector<2x128xf32>
    %543 = arith.addf %540, %542 : vector<2x128xf32>
    %c0_383 = arith.constant 0 : index
    %c0_384 = arith.constant 0 : index
    %544 = vector.load %arg28[%c0_383, %c0_384] : memref<2x128xf32, #tpu.memory_space<vmem>>, vector<2x128xf32>
    tpu.vector_store %arg28[%c0_383, %c0_384], %543 {strides = array<i32>} : memref<2x128xf32, #tpu.memory_space<vmem>>, vector<2x128xf32>,
    return
  }
}

</mosaic_0001>

<bundles_post_ra>
// kernel: multitask_vit_forward.1
= control target key start
LH: loop header
LB: loop body
LE: loop exit
PB: predicated region body
PF: predicated region fallthrough
CT: control target
= control target key end

     0   :  { %v7426_v0 = vmov 0.0|0.0   ;;  %vm126_vm0 = vcmask 523264   ;;  %vm200_vm1 = vcmask 253952   ;;  %vm203_vm2 = vcmask 257024   ;;  %s8753_s2 = inlined_call_operand.vmem [shape: f32[192,32], index: 2, kind: input, shape index: {}]   ;;  %s8754_s0 = inlined_call_operand.vmem [shape: f32[8,192], index: 0, kind: input, shape index: {}]   ;;  %s8755_s4 = inlined_call_operand.vmem [shape: f32[1,32], index: 4, kind: input, shape index: {}]   ;;  %s8756_s5 = inlined_call_operand.vmem [shape: f32[5,32], index: 5, kind: input, shape index: {}]   ;;  %s8757_s3 = inlined_call_operand.vmem [shape: f32[1,32], index: 3, kind: input, shape index: {}]   ;;  %s8758_s8 = inlined_call_operand.vmem [shape: f32[8,32,8], index: 8, kind: input, shape index: {}]   ;;  %s8759_s10 = inlined_call_operand.vmem [shape: f32[8,32,8], index: 10, kind: input, shape index: {}]   ;;  %s8760_s9 = inlined_call_operand.vmem [shape: f32[8,32,8], index: 9, kind: input, shape index: {}]   ;;  %s8761_s6 = inlined_call_operand.vmem [shape: f32[2,1,32], index: 6, kind: input, shape index: {}]   ;;  %s8762_s7 = inlined_call_operand.vmem [shape: f32[2,1,32], index: 7, kind: input, shape index: {}]   ;;  %s8763_s13 = inlined_call_operand.vmem [shape: f32[8,1,8], index: 13, kind: input, shape index: {}]   ;;  %s8764_s11 = inlined_call_operand.vmem [shape: f32[8,1,8], index: 11, kind: input, shape index: {}]   ;;  %s8765_s12 = inlined_call_operand.vmem [shape: f32[8,1,8], index: 12, kind: input, shape index: {}]   ;;  %s8766_s1 = inlined_call_operand.vmem [shape: f32[10,10], index: 1, kind: input, shape index: {}]   ;;  %s8767_s14 = inlined_call_operand.vmem [shape: f32[8,8,32], index: 14, kind: input, shape index: {}]   ;;  %s8768_s15 = inlined_call_operand.vmem [shape: f32[2,1,32], index: 15, kind: input, shape index: {}]   ;;  %s8769_s18 = inlined_call_operand.vmem [shape: f32[2,32,64], index: 18, kind: input, shape index: {}]   ;;  %s8770_s16 = inlined_call_operand.vmem [shape: f32[2,1,32], index: 16, kind: input, shape index: {}]   ;;  %s8771_s17 = inlined_call_operand.vmem [shape: f32[2,1,32], index: 17, kind: input, shape index: {}]   ;;  %s8772_s20 = inlined_call_operand.vmem [shape: f32[2,64,32], index: 20, kind: input, shape index: {}]   ;;  %s8773_s19 = inlined_call_operand.vmem [shape: f32[2,1,64], index: 19, kind: input, shape index: {}]   ;;  %s8774_s21 = inlined_call_operand.vmem [shape: f32[2,1,32], index: 21, kind: input, shape index: {}]   ;;  %s8775_s24 = inlined_call_operand.vmem [shape: f32[32,320], index: 24, kind: input, shape index: {}]   ;;  %s8776_s26 = inlined_call_operand.vmem [shape: f32[320,128], index: 26, kind: input, shape index: {}]   ;;  %s8777_s22 = inlined_call_operand.vmem [shape: f32[1,32], index: 22, kind: input, shape index: {}]   ;;  %s8778_s23 = inlined_call_operand.vmem [shape: f32[1,32], index: 23, kind: input, shape index: {}]   ;;  %s8779_s25 = inlined_call_operand.vmem [shape: f32[1,320], index: 25, kind: input, shape index: {}]   ;;  %s8780_s27 = inlined_call_operand.vmem [shape: f32[1,128], index: 27, kind: input, shape index: {}]   ;;  %s8781_s28 = inlined_call_operand.vmem [shape: f32[2,128], index: 28, kind: output, shape index: {}]  }
   0x1   :  { %8793 = sst [smem:[#allocation4_spill]] %s8753_s2  ;;  %6846 = vmatprep.subr.bf16.mxu0 %v7426_v0  ;;  %6882 = vmatprep.subr.bf16.mxu1 %v7426_v0  ;;  %vm324_vm3 = vcmask 261120   ;;  %vm328_vm4 = vcmask 254976   ;;  %vm755_vm5 = vcmask 1041408   ;;  %vm633_vm6 = vcmask 64512  }
   0x2   :  { %8794 = sst [smem:[#allocation5_spill]] %s8754_s0  ;;  %vm7427_vm7 = vmmov 1   ;;  %vm7795_vm9 = vmpackc.low %vm633_vm6, %vm633_vm6  ;;  %vm729_vm10 = vcmask 74752   ;;  %vm725_vm11 = vcmask 80896   ;;  %vm7429_vm12 = vmmov 0  }
   0x3   :  { %8795 = sst [smem:[#allocation6_spill]] %s8755_s4  ;;  %vm7775_vm8 = vmpackc.low %vm755_vm5, %vm7427_vm7 }
   0x4   :  { %8796 = sst [smem:[#allocation7_spill]] %s8756_s5 }
   0x5   :  { %8797 = sst [smem:[#allocation8_spill]] %s8757_s3  ;;  %s8811_s29 = sld [smem:[#allocation7_spill]] }
   0x6   :  { %8798 = sst [smem:[#allocation9_spill]] %s8758_s8  ;;  %s8808_s8 = sld [smem:[#allocation4_spill]] }
   0x7   :  { %8799 = sst [smem:[#allocation10_spill]] %s8759_s10  ;;  %s8809_s10 = sld [smem:[#allocation5_spill]] }
   0x8   :  { %8800 = sst [smem:[#allocation11_spill]] %s8760_s9  ;;  %s8814_s0 = sld [smem:[#allocation10_spill]] }
   0x9   :  { %8801 = sst [smem:[#allocation12_spill]] %s8761_s6 }
   0xa   :  { %8802 = sst [smem:[#allocation13_spill]] %s8762_s7  ;;  %s8813_s7 = sld [smem:[#allocation9_spill]] }
   0xb   :  { %8803 = sst [smem:[#allocation14_spill]] %s8763_s13  ;;  %v90_v44 = vld [vmem:[%s8811_s29] sm:$0x1]  ;;  %v92_v47 = vld [vmem:[%s8811_s29 + $0x1] sm:$0xf]  ;;  %s8817_s4 = sld [smem:[#allocation13_spill]] }
   0xc   :  { %8804 = sst [smem:[#allocation15_spill]] %s8764_s11  ;;  %v95_v1 = vld [vmem:[%s8808_s8] sm:$0xff]  ;;  %v96_v2 = vld [vmem:[%s8808_s8 + $0x8] sm:$0xff]  ;;  %v97_v3 = vld [vmem:[%s8808_s8 + $0x10] sm:$0xff]  ;;  %s8810_s13 = sld [smem:[#allocation6_spill]] }
   0xd   :  { %8805 = sst [smem:[#allocation16_spill]] %s8765_s12  ;;  %v6847_v4 = vpack.c.bf16 %v96_v2, %v95_v1  ;;  %v98_v5 = vld [vmem:[%s8808_s8 + $0x18] sm:$0xff]  ;;  %v99_v7 = vld [vmem:[%s8808_s8 + $0x20] sm:$0xff]  ;;  %v100_v8 = vld [vmem:[%s8808_s8 + $0x28] sm:$0xff]  ;;  %s8818_s3 = sld [smem:[#allocation14_spill]] }
   0xe   :  { %8806 = sst [smem:[#allocation17_spill]] %s8780_s27  ;;  %v6850_v6 = vpack.c.bf16 %v98_v5, %v97_v3  ;;  %v6853_v9 = vpack.c.bf16 %v100_v8, %v99_v7  ;;  %v101_v10 = vld [vmem:[%s8808_s8 + $0x30] sm:$0xff]  ;;  %v102_v11 = vld [vmem:[%s8808_s8 + $0x38] sm:$0xff]  ;;  %v94_v12 = vld [vmem:[%s8809_s10 + $0x8] sm:$0xf]  ;;  %s8812_s12 = sld [smem:[#allocation8_spill]] }
   0xf   :  { %8807 = sst [smem:[#allocation18_spill]] %s8781_s28  ;;  %6848 = vmatpush1.bf16.msra.mxu0 %v6847_v4  ;;  %6884 = vmatpush1.bf16.msra.mxu1 %v6847_v4  ;;  %v206_v13 = vld [vmem:[%s8809_s10 + $0x8] sm:$0xf0]  ;;  %v6856_v15 = vpack.c.bf16 %v102_v11, %v101_v10  ;;  %v103_v16 = vld [vmem:[%s8808_s8 + $0x40] sm:$0xff]  ;;  %v105_v19 = vld [vmem:[%s8808_s8 + $0x50] sm:$0xff]  ;;  %s8819_s2 = sld [smem:[#allocation15_spill]] }
  0x10   :  { %6849 = vmatprep.subr.bf16.mxu0 %v7426_v0  ;;  %6885 = vmatprep.subr.bf16.mxu1 %v7426_v0  ;;  %v241_v14 = vrot.slane %v206_v13, 4  ;;  %v104_v17 = vld [vmem:[%s8808_s8 + $0x48] sm:$0xff]  ;;  %v106_v20 = vld [vmem:[%s8808_s8 + $0x58] sm:$0xff]  ;;  %v107_v22 = vld [vmem:[%s8808_s8 + $0x60] sm:$0xff] }
  0x11   :  { %5721 = vmatprep.mubr.msk.f32.mxu0 %vm126_vm0, %v94_v12  ;;  %v6859_v18 = vpack.c.bf16 %v104_v17, %v103_v16  ;;  %v6862_v21 = vpack.c.bf16 %v106_v20, %v105_v19  ;;  %v108_v23 = vld [vmem:[%s8808_s8 + $0x68] sm:$0xff]  ;;  %v109_v25 = vld [vmem:[%s8808_s8 + $0x70] sm:$0xff]  ;;  %v110_v26 = vld [vmem:[%s8808_s8 + $0x78] sm:$0xff] }
  0x12   :  { %5723 = vmatprep.mubr.msk.f32.mxu1 %vm126_vm0, %v241_v14  ;;  %v6865_v24 = vpack.c.bf16 %v108_v23, %v107_v22  ;;  %v6868_v27 = vpack.c.bf16 %v110_v26, %v109_v25  ;;  %v111_v28 = vld [vmem:[%s8808_s8 + $0x80] sm:$0xff]  ;;  %v112_v29 = vld [vmem:[%s8808_s8 + $0x88] sm:$0xff]  ;;  %v113_v31 = vld [vmem:[%s8808_s8 + $0x90] sm:$0xff] }
  0x13   :  { %6851 = vmatpush1.bf16.msra.mxu0 %v6850_v6  ;;  %6887 = vmatpush1.bf16.msra.mxu1 %v6850_v6  ;;  %v6871_v30 = vpack.c.bf16 %v112_v29, %v111_v28  ;;  %v114_v32 = vld [vmem:[%s8808_s8 + $0x98] sm:$0xff]  ;;  %v115_v34 = vld [vmem:[%s8808_s8 + $0xa0] sm:$0xff]  ;;  %v116_v35 = vld [vmem:[%s8808_s8 + $0xa8] sm:$0xff] }
  0x14   :  { %6852 = vmatprep.subr.bf16.mxu0 %v7426_v0  ;;  %6888 = vmatprep.subr.bf16.mxu1 %v7426_v0  ;;  %v6874_v33 = vpack.c.bf16 %v114_v32, %v113_v31  ;;  %v6877_v36 = vpack.c.bf16 %v116_v35, %v115_v34  ;;  %v117_v37 = vld [vmem:[%s8808_s8 + $0xb0] sm:$0xff]  ;;  %v118_v38 = vld [vmem:[%s8808_s8 + $0xb8] sm:$0xff]  ;;  %v205_v40 = vld [vmem:[%s8809_s10] sm:$0xf0]  ;;  %s8822_s8 = sld [smem:[#allocation16_spill]] }
  0x15   :  { %v6880_v39 = vpack.c.bf16 %v118_v38, %v117_v37  ;;  %v240_v41 = vrot.slane %v205_v40, 4  ;;  %v93_v42 = vld [vmem:[%s8809_s10] sm:$0xf]  ;;  %v370_v8 = vld [vmem:[%s8813_s7 + $0x8] sm:$0xff]  ;;  %v371_v13 = vld [vmem:[%s8813_s7 + $0x10] sm:$0xff] }
  0x16   :  { %v89_v43 = vld [vmem:[%s8810_s13] sm:$0x1]  ;;  %v548_v11 = vld [vmem:[%s8814_s0 + $0x8] sm:$0xff]  ;;  %v372_v14 = vld [vmem:[%s8813_s7 + $0x18] sm:$0xff]  ;;  %s8815_s13 = sld [smem:[#allocation11_spill]] }
  0x17   :  { %6854 = vmatpush1.bf16.msra.mxu0 %v6853_v9  ;;  %6890 = vmatpush1.bf16.msra.mxu1 %v6853_v9  ;;  %v91_v45 = vadd.f32 %v90_v44, %v89_v43  ;;  %v5720_v46 = vld [vmem:[%s8812_s12] ss:$0 sm:$0xff]  ;;  %v549_v16 = vld [vmem:[%s8814_s0 + $0x10] sm:$0xff]  ;;  %v550_v17 = vld [vmem:[%s8814_s0 + $0x18] sm:$0xff]  ;;  %s8816_s12 = sld [smem:[#allocation12_spill]] }
  0x18   :  { %6855 = vmatprep.subr.bf16.mxu0 %v7426_v0  ;;  %6891 = vmatprep.subr.bf16.mxu1 %v7426_v0  ;;  %v369_v7 = vld [vmem:[%s8813_s7] sm:$0xff] }
  0x19   :  { %201 = vst.msk [vmem:[#allocation2] sm:$0x1] %vm200_vm1, %v91_v45  ;;  %315 = vst.msk [vmem:[#allocation2 + $0x5] sm:$0x1] %vm200_vm1, %v91_v45  ;;  %v6918_v9 = vpack.c.bf16 %v370_v8, %v369_v7  ;;  %v547_v10 = vld [vmem:[%s8814_s0] sm:$0xff]  ;;  %v5760_v8 = vld [vmem:[%s8814_s0 + $0x30] sm:$0xff] }
  0x1a   :  { %v6934_v12 = vpack.c.bf16 %v548_v11, %v547_v10  ;;  %v5725_v31 = vld [vmem:[%s8817_s4] ss:$0 sm:$0xff] }
  0x1b   :  { %6857 = vmatpush1.bf16.msra.mxu0 %v6856_v15  ;;  %6893 = vmatpush1.bf16.msra.mxu1 %v6856_v15  ;;  %v6922_v15 = vpack.c.bf16 %v372_v14, %v371_v13 }
  0x1c   :  { %6858 = vmatprep.subr.bf16.mxu0 %v7426_v0  ;;  %6894 = vmatprep.subr.bf16.mxu1 %v7426_v0  ;;  %v461_v19 = vld [vmem:[%s8815_s13] sm:$0xff]  ;;  %v462_v20 = vld [vmem:[%s8815_s13 + $0x8] sm:$0xff]  ;;  %v464_v37 = vld [vmem:[%s8815_s13 + $0x18] sm:$0xff] }
  0x1d   :  { %v5724_v29 = vld [vmem:[%s8816_s12] ss:$0 sm:$0xff] }
  0x1f   :  { %6860 = vmatpush1.bf16.msra.mxu0 %v6859_v18  ;;  %6896 = vmatpush1.bf16.msra.mxu1 %v6859_v18  ;;  %v6938_v18 = vpack.c.bf16 %v550_v17, %v549_v16 }
  0x20   :  { %6861 = vmatprep.subr.bf16.mxu0 %v7426_v0  ;;  %6897 = vmatprep.subr.bf16.mxu1 %v7426_v0 }
  0x23   :  { %6863 = vmatpush1.bf16.msra.mxu0 %v6862_v21  ;;  %6899 = vmatpush1.bf16.msra.mxu1 %v6862_v21  ;;  %v6926_v21 = vpack.c.bf16 %v462_v20, %v461_v19 }
  0x24   :  { %6864 = vmatprep.subr.bf16.mxu0 %v7426_v0  ;;  %6900 = vmatprep.subr.bf16.mxu1 %v7426_v0 }
  0x27   :  { %6866 = vmatpush1.bf16.msra.mxu0 %v6865_v24  ;;  %6902 = vmatpush1.bf16.msra.mxu1 %v6865_v24 }
  0x28   :  { %6867 = vmatprep.subr.bf16.mxu0 %v7426_v0  ;;  %6903 = vmatprep.subr.bf16.mxu1 %v7426_v0 }
  0x2b   :  { %6869 = vmatpush1.bf16.msra.mxu0 %v6868_v27  ;;  %6905 = vmatpush1.bf16.msra.mxu1 %v6868_v27 }
  0x2c   :  { %6870 = vmatprep.subr.bf16.mxu0 %v7426_v0  ;;  %6906 = vmatprep.subr.bf16.mxu1 %v7426_v0 }
  0x2f   :  { %6872 = vmatpush1.bf16.msra.mxu0 %v6871_v30  ;;  %6908 = vmatpush1.bf16.msra.mxu1 %v6871_v30 }
  0x30   :  { %6873 = vmatprep.subr.bf16.mxu0 %v7426_v0  ;;  %6909 = vmatprep.subr.bf16.mxu1 %v7426_v0 }
  0x33   :  { %6875 = vmatpush1.bf16.msra.mxu0 %v6874_v33  ;;  %6911 = vmatpush1.bf16.msra.mxu1 %v6874_v33 }
  0x34   :  { %6876 = vmatprep.subr.bf16.mxu0 %v7426_v0  ;;  %6912 = vmatprep.subr.bf16.mxu1 %v7426_v0 }
  0x37   :  { %6878 = vmatpush1.bf16.msra.mxu0 %v6877_v36  ;;  %6914 = vmatpush1.bf16.msra.mxu1 %v6877_v36  ;;  %v463_v36 = vld [vmem:[%s8815_s13 + $0x10] sm:$0xff] }
  0x38   :  { %6879 = vmatprep.subr.bf16.mxu0 %v7426_v0  ;;  %6915 = vmatprep.subr.bf16.mxu1 %v7426_v0  ;;  %v6930_v40 = vpack.c.bf16 %v464_v37, %v463_v36 }
  0x3b   :  { %6881 = vmatpush1.bf16.msra.mxu0 %v6880_v39  ;;  %6917 = vmatpush1.bf16.msra.mxu1 %v6880_v39 }
  0x3c   :  { %6919 = vmatprep.subr.bf16.mxu1 %v6918_v9  ;;  %6935 = vmatprep.subr.bf16.mxu0 %v6934_v12 }
  0x3e   :  { %195 = vmatmul.mubr.f32.vlgmr.msra.gmra.mrb[0].mxu0 %v93_v42  ;;  %310 = vmatmul.mubr.f32.vlgmr.msra.gmra.mrb[0].mxu1 %v240_v41  ;;  %v5732_v41 = vld [vmem:[%s8818_s3] ss:$0 sm:$0xff] }
  0x3f   :  { %6921 = vmatpush3.bf16.msra.mxu1 %v6918_v9  ;;  %6937 = vmatpush3.bf16.msra.mxu0 %v6934_v12  ;;  %v5726_v42 = vld [vmem:[%s8819_s2] ss:$0 sm:$0xff]  ;;  %v5761_v9 = vld [vmem:[%s8814_s0 + $0x38] sm:$0xff]  ;;  %v7833_v12 = vld [vmem:[%s8766_s1 + $0x8] sm:$0x3] }
  0x40   :  { %6923 = vmatprep.subr.bf16.mxu1 %v6922_v15  ;;  %6939 = vmatprep.subr.bf16.mxu0 %v6938_v18  ;;  %v6974_v10 = vpack.c.bf16 %v5761_v9, %v5760_v8 }
  0x43   :  { %6925 = vmatpush3.bf16.msra.mxu1 %v6922_v15  ;;  %6941 = vmatpush3.bf16.msra.mxu0 %v6938_v18  ;;  %v7838_v15 = vld [vmem:[%s8766_s1] sm:$0xff] }
  0x44   :  { %6927 = vmatprep.subr.bf16.mxu1 %v6926_v21 }
 0x111   :  { %v196_v48 = vpop.f32.mrb[0].mxu0  ;;  %v311_v49 = vpop.f32.mrb[0].mxu1 }
 0x112   :  { %v197_v50 = vadd.f32 %v5720_v46, %v196_v48  ;;  %v312_v51 = vadd.f32 %v5720_v46, %v311_v49  ;;  %v198_v52 = vpop.f32.mrb[1].mxu0  ;;  %v313_v53 = vpop.f32.mrb[1].mxu1 }
 0x113   :  { %v5729_v52 = vld [vmem:[%s8822_s8] ss:$0 sm:$0xff] }
 0x114   :  { %v202_v54 = vadd.f32 %v197_v50, %v92_v47  ;;  %v316_v55 = vadd.f32 %v312_v51, %v92_v47 }
 0x116   :  { %204 = vst.msk [vmem:[#allocation2 + $0x1] sm:$0xf] %vm203_vm2, %v202_v54  ;;  %317 = vst.msk [vmem:[#allocation2 + $0x6] sm:$0xf] %vm203_vm2, %v316_v55 }
 0x11d   :  { %v7699_v56 = vld [vmem:[#allocation2] sm:$0xff]  ;;  %v7703_v58 = vld [vmem:[#allocation2 + $0x8] sm:$0x3] }
 0x11e   :  { %v325_v57 = vsel %vm324_vm3, %v7699_v56, 0.0  ;;  %v329_v59 = vsel %vm328_vm4, %v7703_v58, 0.0 }
 0x11f   :  { %326 = vadd.xlane.f32.xlu0 %v325_v57  ;;  %v5742_v57 = vld [vmem:[%s8813_s7 + $0x20] sm:$0xff] }
 0x123   :  { %330 = vadd.xlane.f32.xlu0 %v329_v59  ;;  %v5743_v59 = vld [vmem:[%s8813_s7 + $0x28] sm:$0xff] }
 0x1ac   :  { %v327_v60 = vpop.xlane.xlu0 %326 }
 0x1ad   :  { %v333_v61 = vmul.f32 0.03125, %v327_v60 }
 0x1af   :  { %v335_v62 = vsub.f32 %v7699_v56, %v333_v61 }
 0x1b0   :  { %v331_v63 = vpop.xlane.xlu0 %330 }
 0x1b1   :  { %v334_v1 = vmul.f32 0.03125, %v331_v63  ;;  %v337_v2 = vmul.f32 %v335_v62, %v335_v62  ;;  %v6954_v63 = vpack.c.bf16 %v5743_v59, %v5742_v57 }
 0x1b3   :  { %v336_v3 = vsub.f32 %v7703_v58, %v334_v1  ;;  %v339_v4 = vsel %vm324_vm3, %v337_v2, 0.0  ;;  %v5744_v1 = vld [vmem:[%s8813_s7 + $0x30] sm:$0xff]  ;;  %v5745_v2 = vld [vmem:[%s8813_s7 + $0x38] sm:$0xff] }
 0x1b4   :  { %340 = vadd.xlane.f32.xlu1 %v339_v4  ;;  %v6958_v4 = vpack.c.bf16 %v5745_v2, %v5744_v1 }
 0x1b5   :  { %v338_v5 = vmul.f32 %v336_v3, %v336_v3 }
 0x1b7   :  { %v342_v6 = vsel %vm328_vm4, %v338_v5, 0.0  ;;  %v5758_v5 = vld [vmem:[%s8814_s0 + $0x20] sm:$0xff] }
 0x1b8   :  { %343 = vadd.xlane.f32.xlu1 %v342_v6  ;;  %v5759_v6 = vld [vmem:[%s8814_s0 + $0x28] sm:$0xff] }
 0x1b9   :  { %v6970_v7 = vpack.c.bf16 %v5759_v6, %v5758_v5 }
 0x241   :  { %v341_v22 = vpop.xlane.xlu1 %340 }
 0x242   :  { %v345_v23 = vmul.f32 0.03125, %v341_v22 }
 0x244   :  { %v347_v24 = vadd.f32 1e-06, %v345_v23 }
 0x245   :  { %v344_v25 = vpop.xlane.xlu1 %343 }
 0x246   :  { %7328 = vrsqrt.f32 %v347_v24  ;;  %v346_v26 = vmul.f32 0.03125, %v344_v25  ;;  %v5763_v25 = vld [vmem:[%s8818_s3 + $0x1] ss:$0 sm:$0xff] }
 0x248   :  { %v348_v27 = vadd.f32 1e-06, %v346_v26 }
 0x24a   :  { %7330 = vrsqrt.f32 %v348_v27 }
 0x250   :  { %v7329_v28 = vpop.eup %7328 }
 0x251   :  { %v351_v30 = vmul.f32 %v7329_v28, %v335_v62 }
 0x253   :  { %v359_v32 = vmul.f32 %v5724_v29, %v351_v30 }
 0x254   :  { %v7331_v33 = vpop.eup %7330 }
 0x255   :  { %v7747_v34 = vadd.f32 %v5725_v31, %v359_v32  ;;  %v352_v35 = vmul.f32 %v7331_v33, %v336_v3 }
 0x257   :  { %v360_v38 = vmul.f32 %v5724_v29, %v352_v35  ;;  %6348 = vmatprep.mubr.msk.f32.mxu1 %vm324_vm3, %v7747_v34  ;;  %6370 = vmatprep.mubr.msk.f32.mxu0 %vm324_vm3, %v7747_v34 }
 0x259   :  { %v7759_v39 = vadd.f32 %v5725_v31, %v360_v38 }
 0x25b   :  { %6349 = vmatmul.mubr.msk.f32.vlgmr.msra.gmra.mrb[2].mxu1 %vm324_vm3, %v7759_v39  ;;  %6371 = vmatmul.mubr.msk.f32.vlgmr.msra.gmra.mrb[2].mxu0 %vm324_vm3, %v7759_v39 }
 0x25c   :  { %6929 = vmatpush3.bf16.msra.mxu1 %v6926_v21  ;;  %6359 = vmatprep.mubr.msk.f32.mxu1 %vm324_vm3, %v7747_v34  ;;  %v5747_v21 = vld [vmem:[%s8819_s2 + $0x1] ss:$0 sm:$0xff] }
 0x25d   :  { %6931 = vmatprep.subr.bf16.mxu1 %v6930_v40 }
 0x260   :  { %6933 = vmatpush3.bf16.msra.mxu1 %v6930_v40 }
 0x263   :  { %6360 = vmatmul.mubr.msk.f32.vlgmr.msra.gmra.mrb[4].mxu1 %vm324_vm3, %v7759_v39 }
 0x32e   :  { %v6350_v43 = vpop.f32.mrb[2].mxu1  ;;  %v6372_v44 = vpop.f32.mrb[2].mxu0 }
 0x32f   :  { %v630_v45 = vadd.f32 %v6372_v44, %v5732_v41  ;;  %v452_v46 = vpop.f32.mrb[3].mxu1  ;;  %v624_v47 = vpop.f32.mrb[3].mxu0  ;;  %v458_v3 = vadd.f32 %v6350_v43, %v5726_v42  ;;  %v5750_v43 = vld [vmem:[%s8815_s13 + $0x20] sm:$0xff]  ;;  %v5751_v44 = vld [vmem:[%s8815_s13 + $0x28] sm:$0xff] }
 0x330   :  { %v453_v48 = vadd.f32 %v5726_v42, %v452_v46  ;;  %v625_v49 = vadd.f32 %v5732_v41, %v624_v47 }
 0x332   :  { %v6948_v51 = vpack.c.bf16 %v630_v45, %v625_v49  ;;  %6377 = vmatprep.mubr.msk.f32.mxu1 %vm633_vm6, %v453_v48  ;;  %v6962_v45 = vpack.c.bf16 %v5751_v44, %v5750_v43  ;;  %v5752_v49 = vld [vmem:[%s8815_s13 + $0x30] sm:$0xff]  ;;  %v5797_v44 = vld [vmem:[%s8814_s0 + $0x58] sm:$0xff] }
 0x333   :  { %v5796_v43 = vld [vmem:[%s8814_s0 + $0x50] sm:$0xff] }
 0x334   :  { %6950 = vmatprep.subr.msk.bf16.mxu0 %vm7775_vm8, %v6948_v51 }
 0x335   :  { %6953 = vmatpush3.bf16.msk.msra.mxu0 %vm7775_vm8, %v6948_v51  ;;  %v5753_v51 = vld [vmem:[%s8815_s13 + $0x38] sm:$0xff] }
 0x336   :  { %v6361_v53 = vpop.f32.mrb[4].mxu1  ;;  %6963 = vmatprep.subr.bf16.mxu0 %v6962_v45 }
 0x337   :  { %v544_v54 = vadd.f32 %v6361_v53, %v5729_v52  ;;  %v538_v55 = vpop.f32.mrb[5].mxu1 }
 0x338   :  { %v539_v60 = vadd.f32 %v5729_v52, %v538_v55  ;;  %v6966_v55 = vpack.c.bf16 %v5753_v51, %v5752_v49 }
 0x33a   :  { %v6942_v62 = vpack.c.bf16 %v544_v54, %v539_v60 }
 0x33c   :  { %6944 = vmatprep.subr.msk.bf16.mxu1 %vm7795_vm9, %v6942_v62 }
 0x33d   :  { %6947 = vmatpush3.bf16.xpose.msk.msra.mxu1 %vm7795_vm9, %v6942_v62  ;;  %v5755_v62 = vld [vmem:[%s8822_s8 + $0x1] ss:$0 sm:$0xff] }
 0x33e   :  { %6955 = vmatprep.subr.bf16.mxu1 %v6954_v63 }
 0x344   :  { %6378 = vmatmul.mubr.msk.f32.vlgmr.msra.gmra.mrb[6].mxu1 %vm633_vm6, %v458_v3 }
 0x345   :  { %6957 = vmatpush3.bf16.msra.mxu1 %v6954_v63  ;;  %6395 = vmatprep.mubr.msk.f32.mxu1 %vm324_vm3, %v7747_v34 }
 0x346   :  { %6959 = vmatprep.subr.bf16.mxu1 %v6958_v4 }
 0x349   :  { %6961 = vmatpush3.bf16.msra.mxu1 %v6958_v4 }
 0x34a   :  { %6971 = vmatprep.subr.bf16.mxu1 %v6970_v7 }
 0x34c   :  { %6396 = vmatmul.mubr.msk.f32.vlgmr.msra.gmra.mrb[8].mxu1 %vm324_vm3, %v7759_v39 }
 0x34d   :  { %6973 = vmatpush3.bf16.msra.mxu1 %v6970_v7  ;;  %6417 = vmatprep.mubr.msk.f32.mxu1 %vm324_vm3, %v7747_v34 }
 0x34e   :  { %6975 = vmatprep.subr.bf16.mxu1 %v6974_v10 }
 0x351   :  { %6977 = vmatpush3.bf16.msra.mxu1 %v6974_v10 }
 0x354   :  { %6418 = vmatmul.mubr.msk.f32.vlgmr.msra.gmra.mrb[10].mxu1 %vm324_vm3, %v7759_v39 }
 0x417   :  { %v6379_v11 = vpop.f32.mrb[6].mxu1 }
 0x418   :  { %v722_v13 = vmul.f32 0.35355338, %v6379_v11  ;;  %v712_v14 = vpop.f32.mrb[7].mxu1 }
 0x419   :  { %v721_v16 = vmul.f32 0.35355338, %v712_v14 }
 0x41a   :  { %v724_v17 = vadd.f32 %v722_v13, %v7833_v12 }
 0x41b   :  { %v723_v18 = vadd.f32 %v721_v16, %v7838_v15 }
 0x41c   :  { %v730_v19 = vsel %vm729_vm10, %v724_v17, -inf }
 0x41d   :  { %731 = vmax.xlane.f32.xlu1 %v730_v19  ;;  %v726_v20 = vsel %vm725_vm11, %v723_v18, -inf }
 0x41e   :  { %727 = vmax.xlane.f32.xlu0 %v726_v20 }
 0x41f   :  { %v6397_v22 = vpop.f32.mrb[8].mxu1 }
 0x420   :  { %v920_v23 = vadd.f32 %v6397_v22, %v5747_v21  ;;  %v914_v24 = vpop.f32.mrb[9].mxu1 }
 0x421   :  { %v915_v57 = vadd.f32 %v5747_v21, %v914_v24 }
 0x427   :  { %v6419_v26 = vpop.f32.mrb[10].mxu1 }
 0x428   :  { %v1096_v27 = vadd.f32 %v6419_v26, %v5763_v25  ;;  %v1090_v28 = vpop.f32.mrb[11].mxu1  ;;  %v5779_v26 = vld [vmem:[%s8813_s7 + $0x48] sm:$0xff] }
 0x429   :  { %v1091_v29 = vadd.f32 %v5763_v25, %v1090_v28  ;;  %v5778_v25 = vld [vmem:[%s8813_s7 + $0x40] sm:$0xff]  ;;  %v5773_v28 = vld [vmem:[%s8767_s14 + $0x8] sm:$0xff] }
 0x42b   :  { %v6984_v30 = vpack.c.bf16 %v1096_v27, %v1091_v29  ;;  %v6990_v27 = vpack.c.bf16 %v5779_v26, %v5778_v25 }
 0x42d   :  { %6986 = vmatprep.subr.msk.bf16.mxu1 %vm7775_vm8, %v6984_v30 }
 0x42e   :  { %6989 = vmatpush3.bf16.msk.msra.mxu1 %vm7775_vm8, %v6984_v30 }
 0x42f   :  { %6991 = vmatprep.subr.bf16.mxu1 %v6990_v27 }
 0x4aa   :  { %v732_v31 = vpop.xlane.xlu1 %731 }
 0x4ab   :  { %v734_v32 = vsub.f32 %v724_v17, %v732_v31  ;;  %v728_v33 = vpop.xlane.xlu0 %727 }
 0x4ac   :  { %v733_v35 = vsub.f32 %v723_v18, %v728_v33  ;;  %v5781_v33 = vld [vmem:[%s8813_s7 + $0x58] sm:$0xff] }
 0x4ad   :  { %v737_v36 = vmul.f32 1.442695, %v734_v32  ;;  %v5780_v32 = vld [vmem:[%s8813_s7 + $0x50] sm:$0xff] }
 0x4ae   :  { %v735_v37 = vmul.f32 1.442695, %v733_v35 }
 0x4af   :  { %7332 = vpow2.f32 %v737_v36 }
 0x4b0   :  { %7334 = vpow2.f32 %v735_v37 }
 0x4b9   :  { %v7333_v38 = vpop.eup %7332 }
 0x4ba   :  { %v7335_v40 = vpop.eup %7334  ;;  %v742_v41 = vsel %vm729_vm10, %v7333_v38, 0.0 }
 0x4bb   :  { %743 = vadd.xlane.f32.xlu1 %v742_v41  ;;  %v739_v42 = vsel %vm725_vm11, %v7335_v40, 0.0  ;;  %v5795_v41 = vld [vmem:[%s8814_s0 + $0x48] sm:$0xff] }
 0x4bc   :  { %740 = vadd.xlane.f32.xlu0 %v739_v42 }
 0x548   :  { %v744_v46 = vpop.xlane.xlu1 %743 }
 0x549   :  { %7336 = vrcp.f32 %v744_v46  ;;  %v741_v47 = vpop.xlane.xlu0 %740  ;;  %v834_v46 = vld [vmem:[%s8767_s14] sm:$0xff] }
 0x54a   :  { %7338 = vrcp.f32 %v741_v47  ;;  %v5786_v47 = vld [vmem:[%s8815_s13 + $0x40] sm:$0xff] }
 0x553   :  { %v7337_v48 = vpop.eup %7336 }
 0x554   :  { %v7339_v52 = vpop.eup %7338  ;;  %v748_v54 = vmul.f32 %v7337_v48, %v7333_v38  ;;  %v6994_v38 = vpack.c.bf16 %v5781_v33, %v5780_v32  ;;  %v5787_v48 = vld [vmem:[%s8815_s13 + $0x48] sm:$0xff]  ;;  %v5812_v33 = vld [vmem:[%s8813_s7 + $0x60] sm:$0xff] }
 0x555   :  { %v747_v53 = vmul.f32 %v7339_v52, %v7335_v40  ;;  %v5794_v40 = vld [vmem:[%s8814_s0 + $0x40] sm:$0xff]  ;;  %v6998_v52 = vpack.c.bf16 %v5787_v48, %v5786_v47 }
 0x556   :  { %v7006_v42 = vpack.c.bf16 %v5795_v41, %v5794_v40  ;;  %v5828_v48 = vld [vmem:[%s8814_s0 + $0x60] sm:$0xff] }
 0x557   :  { %6384 = vmatprep.mubr.msk.f32.mxu0 %vm725_vm11, %v747_v53  ;;  %v5783_v53 = vld [vmem:[%s8819_s2 + $0x2] ss:$0 sm:$0xff] }
 0x558   :  { %6385 = vmatmul.mubr.msk.f32.vlgmr.msra.gmra.mrb[4].mxu0 %vm725_vm11, %v748_v54  ;;  %v5788_v54 = vld [vmem:[%s8815_s13 + $0x50] sm:$0xff] }
 0x559   :  { %6965 = vmatpush3.bf16.msra.mxu0 %v6962_v45  ;;  %6406 = vmatprep.mubr.msk.f32.mxu0 %vm324_vm3, %v7747_v34  ;;  %v7010_v45 = vpack.c.bf16 %v5797_v44, %v5796_v43  ;;  %v5815_v43 = vld [vmem:[%s8813_s7 + $0x78] sm:$0xff] }
 0x55a   :  { %6967 = vmatprep.subr.bf16.mxu0 %v6966_v55 }
 0x55d   :  { %6969 = vmatpush3.bf16.msra.mxu0 %v6966_v55  ;;  %v5789_v55 = vld [vmem:[%s8815_s13 + $0x58] sm:$0xff] }
 0x560   :  { %6407 = vmatmul.mubr.msk.f32.vlgmr.msra.gmra.mrb[6].mxu0 %vm324_vm3, %v7759_v39 }
 0x561   :  { %6424 = vmatprep.mubr.msk.f32.mxu0 %vm633_vm6, %v915_v57 }
 0x62b   :  { %v7875_v59 = vpop.f32.mrb[4].mxu0 }
 0x62c   :  { %v7877_v60 = vpop.f32.mrb[5].mxu0 }
 0x633   :  { %v6408_v63 = vpop.f32.mrb[6].mxu0 }
 0x634   :  { %v1008_v1 = vadd.f32 %v6408_v63, %v5755_v62  ;;  %v1002_v2 = vpop.f32.mrb[7].mxu0 }
 0x635   :  { %v1003_v3 = vadd.f32 %v5755_v62, %v1002_v2 }
 0x637   :  { %v6978_v4 = vpack.c.bf16 %v1008_v1, %v1003_v3  ;;  %v7002_v1 = vpack.c.bf16 %v5789_v55, %v5788_v54  ;;  %v5820_v55 = vld [vmem:[%s8815_s13 + $0x60] sm:$0xff] }
 0x639   :  { %6980 = vmatprep.subr.msk.bf16.mxu0 %vm7795_vm9, %v6978_v4 }
 0x63a   :  { %6983 = vmatpush3.bf16.xpose.msk.msra.mxu0 %vm7795_vm9, %v6978_v4 }
 0x63b   :  { %6434 = vmatprep.subr.mxu0 %v5773_v28 }
 0x641   :  { %6425 = vmatmul.mubr.msk.f32.vlgmr.msra.gmra.mrb[8].mxu0 %vm633_vm6, %v920_v23 }
 0x642   :  { %6435 = vmatpush3.msra.mxu0 %v5773_v28 }
 0x643   :  { %6439 = vmatprep.subr.mxu0 %v834_v46 }
 0x714   :  { %v6426_v5 = vpop.f32.mrb[8].mxu0 }
 0x715   :  { %v1187_v6 = vmul.f32 0.35355338, %v6426_v5  ;;  %v1177_v7 = vpop.f32.mrb[9].mxu0 }
 0x716   :  { %v1186_v8 = vmul.f32 0.35355338, %v1177_v7 }
 0x717   :  { %v1189_v9 = vadd.f32 %v1187_v6, %v7833_v12 }
 0x718   :  { %v1188_v10 = vadd.f32 %v1186_v8, %v7838_v15 }
 0x719   :  { %v1193_v11 = vsel %vm729_vm10, %v1189_v9, -inf }
 0x71a   :  { %1194 = vmax.xlane.f32.xlu1 %v1193_v11  ;;  %v1190_v13 = vsel %vm725_vm11, %v1188_v10, -inf }
 0x71b   :  { %1191 = vmax.xlane.f32.xlu0 %v1190_v13 }
 0x7a7   :  { %v1195_v14 = vpop.xlane.xlu1 %1194 }
 0x7a8   :  { %v1197_v16 = vsub.f32 %v1189_v9, %v1195_v14  ;;  %v1192_v17 = vpop.xlane.xlu0 %1191 }
 0x7a9   :  { %v1196_v18 = vsub.f32 %v1188_v10, %v1192_v17 }
 0x7aa   :  { %v1200_v19 = vmul.f32 1.442695, %v1197_v16 }
 0x7ab   :  { %v1198_v20 = vmul.f32 1.442695, %v1196_v18 }
 0x7ac   :  { %7340 = vpow2.f32 %v1200_v19 }
 0x7ad   :  { %7342 = vpow2.f32 %v1198_v20 }
 0x7b6   :  { %v7341_v21 = vpop.eup %7340 }
 0x7b7   :  { %v7343_v22 = vpop.eup %7342  ;;  %v1205_v23 = vsel %vm729_vm10, %v7341_v21, 0.0 }
 0x7b8   :  { %1206 = vadd.xlane.f32.xlu1 %v1205_v23  ;;  %v1202_v24 = vsel %vm725_vm11, %v7343_v22, 0.0 }
 0x7b9   :  { %1203 = vadd.xlane.f32.xlu0 %v1202_v24 }
 0x845   :  { %v1207_v29 = vpop.xlane.xlu1 %1206 }
 0x846   :  { %7344 = vrcp.f32 %v1207_v29  ;;  %v1204_v30 = vpop.xlane.xlu0 %1203 }
 0x847   :  { %7346 = vrcp.f32 %v1204_v30 }
 0x850   :  { %v7345_v31 = vpop.eup %7344 }
 0x851   :  { %v7347_v35 = vpop.eup %7346  ;;  %v1211_v37 = vmul.f32 %v7345_v31, %v7341_v21 }
 0x852   :  { %v1210_v36 = vmul.f32 %v7347_v35, %v7343_v22  ;;  %v5813_v35 = vld [vmem:[%s8813_s7 + $0x68] sm:$0xff] }
 0x854   :  { %6431 = vmatprep.mubr.msk.f32.mxu1 %vm725_vm11, %v1210_v36  ;;  %v7026_v36 = vpack.c.bf16 %v5813_v35, %v5812_v33 }
 0x855   :  { %6432 = vmatmul.mubr.msk.f32.vlgmr.msra.gmra.mrb[12].mxu1 %vm725_vm11, %v1211_v37  ;;  %v5809_v37 = vld [vmem:[%s8767_s14 + $0x10] sm:$0xff] }
 0x856   :  { %6993 = vmatpush3.bf16.msra.mxu1 %v6990_v27  ;;  %6452 = vmatprep.mubr.msk.f32.mxu1 %vm324_vm3, %v7747_v34 }
 0x857   :  { %6995 = vmatprep.subr.bf16.mxu1 %v6994_v38 }
 0x85a   :  { %6997 = vmatpush3.bf16.msra.mxu1 %v6994_v38 }
 0x85b   :  { %7007 = vmatprep.subr.bf16.mxu1 %v7006_v42 }
 0x85d   :  { %6453 = vmatmul.mubr.msk.f32.vlgmr.msra.gmra.mrb[14].mxu1 %vm324_vm3, %v7759_v39 }
 0x85e   :  { %7009 = vmatpush3.bf16.msra.mxu1 %v7006_v42  ;;  %6474 = vmatprep.mubr.msk.f32.mxu1 %vm324_vm3, %v7747_v34  ;;  %v5814_v42 = vld [vmem:[%s8813_s7 + $0x70] sm:$0xff] }
 0x85f   :  { %7011 = vmatprep.subr.bf16.mxu1 %v7010_v45  ;;  %v7030_v47 = vpack.c.bf16 %v5815_v43, %v5814_v42 }
 0x862   :  { %7013 = vmatpush3.bf16.msra.mxu1 %v7010_v45 }
 0x865   :  { %6475 = vmatmul.mubr.msk.f32.vlgmr.msra.gmra.mrb[16].mxu1 %vm324_vm3, %v7759_v39 }
 0x928   :  { %v6433_v49 = vpop.f32.mrb[12].mxu1 }
 0x929   :  { %v1287_v51 = vpop.f32.mrb[13].mxu1 }
 0x92a   :  { %6436 = vmatprep.mubr.msk.f32.mxu0 %vm633_vm6, %v1287_v51 }
 0x92b   :  { %6437 = vmatmul.mubr.msk.f32.vlgmr.msra.gmra.mrb[10].mxu0 %vm633_vm6, %v6433_v49  ;;  %v5829_v49 = vld [vmem:[%s8814_s0 + $0x68] sm:$0xff] }
 0x92c   :  { %6440 = vmatpush3.msra.mxu0 %v834_v46  ;;  %6441 = vmatprep.mubr.msk.f32.mxu0 %vm633_vm6, %v7877_v60  ;;  %v5799_v60 = vld [vmem:[%s8818_s3 + $0x2] ss:$0 sm:$0xff]  ;;  %v7042_v51 = vpack.c.bf16 %v5829_v49, %v5828_v48 }
 0x92d   :  { %6999 = vmatprep.subr.bf16.mxu0 %v6998_v52 }
 0x930   :  { %v6454_v57 = vpop.f32.mrb[14].mxu1 }
 0x931   :  { %v1545_v62 = vadd.f32 %v6454_v57, %v5783_v53  ;;  %v1539_v63 = vpop.f32.mrb[15].mxu1  ;;  %v5821_v57 = vld [vmem:[%s8815_s13 + $0x68] sm:$0xff] }
 0x932   :  { %v1540_v5 = vadd.f32 %v5783_v53, %v1539_v63  ;;  %v5831_v53 = vld [vmem:[%s8814_s0 + $0x78] sm:$0xff]  ;;  %v5822_v63 = vld [vmem:[%s8815_s13 + $0x70] sm:$0xff] }
 0x933   :  { %6442 = vmatmul.mubr.msk.f32.vlgmr.msra.gmra.mrb[10].mxu0 %vm633_vm6, %v7875_v59  ;;  %v5791_v59 = vld [vmem:[%s8822_s8 + $0x2] ss:$0 sm:$0xff] }
 0x934   :  { %7001 = vmatpush3.bf16.msra.mxu0 %v6998_v52  ;;  %6463 = vmatprep.mubr.msk.f32.mxu0 %vm324_vm3, %v7747_v34  ;;  %v5830_v52 = vld [vmem:[%s8814_s0 + $0x70] sm:$0xff] }
 0x935   :  { %7003 = vmatprep.subr.bf16.mxu0 %v7002_v1  ;;  %v7046_v54 = vpack.c.bf16 %v5831_v53, %v5830_v52 }
 0x938   :  { %7005 = vmatpush3.bf16.msra.mxu0 %v7002_v1  ;;  %v6476_v2 = vpop.f32.mrb[16].mxu1  ;;  %v5823_v1 = vld [vmem:[%s8815_s13 + $0x78] sm:$0xff] }
 0x939   :  { %v1721_v3 = vadd.f32 %v6476_v2, %v5799_v60  ;;  %v1715_v4 = vpop.f32.mrb[17].mxu1 }
 0x93a   :  { %v1716_v6 = vadd.f32 %v5799_v60, %v1715_v4  ;;  %v5817_v4 = vld [vmem:[%s8819_s2 + $0x3] ss:$0 sm:$0xff] }
 0x93b   :  { %6464 = vmatmul.mubr.msk.f32.vlgmr.msra.gmra.mrb[12].mxu0 %vm324_vm3, %v7759_v39 }
 0x93c   :  { %v7020_v7 = vpack.c.bf16 %v1721_v3, %v1716_v6  ;;  %6481 = vmatprep.mubr.msk.f32.mxu0 %vm633_vm6, %v1540_v5  ;;  %v7038_v3 = vpack.c.bf16 %v5823_v1, %v5822_v63 }
 0x93e   :  { %7022 = vmatprep.subr.msk.bf16.mxu1 %vm7775_vm8, %v7020_v7 }
 0x93f   :  { %7025 = vmatpush3.bf16.msk.msra.mxu1 %vm7775_vm8, %v7020_v7 }
 0x940   :  { %7027 = vmatprep.subr.bf16.mxu1 %v7026_v36 }
 0xa0e   :  { %v6465_v8 = vpop.f32.mrb[12].mxu0 }
 0xa0f   :  { %v1633_v9 = vadd.f32 %v6465_v8, %v5791_v59  ;;  %v1627_v10 = vpop.f32.mrb[13].mxu0  ;;  %v5833_v8 = vld [vmem:[%s8818_s3 + $0x3] ss:$0 sm:$0xff] }
 0xa10   :  { %v1628_v11 = vadd.f32 %v5791_v59, %v1627_v10 }
 0xa12   :  { %v7014_v13 = vpack.c.bf16 %v1633_v9, %v1628_v11 }
 0xa14   :  { %7016 = vmatprep.subr.msk.bf16.mxu0 %vm7795_vm9, %v7014_v13 }
 0xa15   :  { %7019 = vmatpush3.bf16.xpose.msk.msra.mxu0 %vm7795_vm9, %v7014_v13 }
 0xa16   :  { %6491 = vmatprep.subr.mxu0 %v5809_v37 }
 0xa1c   :  { %6482 = vmatmul.mubr.msk.f32.vlgmr.msra.gmra.mrb[14].mxu0 %vm633_vm6, %v1545_v62  ;;  %v7034_v62 = vpack.c.bf16 %v5821_v57, %v5820_v55 }
 0xa1d   :  { %6492 = vmatpush3.msra.mxu0 %v5809_v37  ;;  %v5843_v37 = vld [vmem:[%s8767_s14 + $0x18] sm:$0xff] }
 0xa1e   :  { %7035 = vmatprep.subr.bf16.mxu0 %v7034_v62 }
 0xaef   :  { %v6483_v14 = vpop.f32.mrb[14].mxu0 }
 0xaf0   :  { %v1812_v16 = vmul.f32 0.35355338, %v6483_v14  ;;  %v1802_v17 = vpop.f32.mrb[15].mxu0 }
 0xaf1   :  { %v1811_v18 = vmul.f32 0.35355338, %v1802_v17 }
 0xaf2   :  { %v1814_v19 = vadd.f32 %v1812_v16, %v7833_v12 }
 0xaf3   :  { %v1813_v20 = vadd.f32 %v1811_v18, %v7838_v15 }
 0xaf4   :  { %v1818_v21 = vsel %vm729_vm10, %v1814_v19, -inf }
 0xaf5   :  { %1819 = vmax.xlane.f32.xlu1 %v1818_v21  ;;  %v1815_v22 = vsel %vm725_vm11, %v1813_v20, -inf }
 0xaf6   :  { %1816 = vmax.xlane.f32.xlu0 %v1815_v22 }
 0xb82   :  { %v1820_v23 = vpop.xlane.xlu1 %1819 }
 0xb83   :  { %v1822_v24 = vsub.f32 %v1814_v19, %v1820_v23  ;;  %v1817_v25 = vpop.xlane.xlu0 %1816 }
 0xb84   :  { %v1821_v26 = vsub.f32 %v1813_v20, %v1817_v25 }
 0xb85   :  { %v1825_v27 = vmul.f32 1.442695, %v1822_v24 }
 0xb86   :  { %v1823_v28 = vmul.f32 1.442695, %v1821_v26 }
 0xb87   :  { %7348 = vpow2.f32 %v1825_v27 }
 0xb88   :  { %7350 = vpow2.f32 %v1823_v28 }
 0xb91   :  { %v7349_v29 = vpop.eup %7348 }
 0xb92   :  { %v7351_v30 = vpop.eup %7350  ;;  %v1830_v31 = vsel %vm729_vm10, %v7349_v29, 0.0 }
 0xb93   :  { %1831 = vadd.xlane.f32.xlu1 %v1830_v31  ;;  %v1827_v32 = vsel %vm725_vm11, %v7351_v30, 0.0 }
 0xb94   :  { %1828 = vadd.xlane.f32.xlu0 %v1827_v32 }
 0xc20   :  { %v1832_v38 = vpop.xlane.xlu1 %1831 }
 0xc21   :  { %7352 = vrcp.f32 %v1832_v38  ;;  %v1829_v40 = vpop.xlane.xlu0 %1828 }
 0xc22   :  { %7354 = vrcp.f32 %v1829_v40 }
 0xc2b   :  { %v7353_v41 = vpop.eup %7352 }
 0xc2c   :  { %v7355_v44 = vpop.eup %7354  ;;  %v1836_v46 = vmul.f32 %v7353_v41, %v7349_v29 }
 0xc2d   :  { %v1835_v45 = vmul.f32 %v7355_v44, %v7351_v30 }
 0xc2f   :  { %6488 = vmatprep.mubr.msk.f32.mxu1 %vm725_vm11, %v1835_v45 }
 0xc30   :  { %6489 = vmatmul.mubr.msk.f32.vlgmr.msra.gmra.mrb[18].mxu1 %vm725_vm11, %v1836_v46 }
 0xc31   :  { %7029 = vmatpush3.bf16.msra.mxu1 %v7026_v36  ;;  %6504 = vmatprep.mubr.msk.f32.mxu1 %vm324_vm3, %v7747_v34 }
 0xc32   :  { %7031 = vmatprep.subr.bf16.mxu1 %v7030_v47 }
 0xc35   :  { %7033 = vmatpush3.bf16.msra.mxu1 %v7030_v47  ;;  %v5846_v47 = vld [vmem:[%s8768_s15] ss:$0 sm:$0xff] }
 0xc36   :  { %7043 = vmatprep.subr.bf16.mxu1 %v7042_v51 }
 0xc38   :  { %6505 = vmatmul.mubr.msk.f32.vlgmr.msra.gmra.mrb[20].mxu1 %vm324_vm3, %v7759_v39 }
 0xc39   :  { %7045 = vmatpush3.bf16.msra.mxu1 %v7042_v51  ;;  %6526 = vmatprep.mubr.msk.f32.mxu1 %vm324_vm3, %v7747_v34 }
 0xc3a   :  { %7047 = vmatprep.subr.bf16.mxu1 %v7046_v54 }
 0xc3d   :  { %7049 = vmatpush3.bf16.msra.mxu1 %v7046_v54 }
 0xc40   :  { %6527 = vmatmul.mubr.msk.f32.vlgmr.msra.gmra.mrb[22].mxu1 %vm324_vm3, %v7759_v39 }
 0xd03   :  { %v6490_v60 = vpop.f32.mrb[18].mxu1 }
 0xd04   :  { %v1912_v2 = vpop.f32.mrb[19].mxu1 }
 0xd05   :  { %6493 = vmatprep.mubr.msk.f32.mxu0 %vm633_vm6, %v1912_v2 }
 0xd06   :  { %6494 = vmatmul.mubr.msk.f32.vlgmr.msra.gmra.mrb[10].mxu0 %vm633_vm6, %v6490_v60 }
 0xd07   :  { %7037 = vmatpush3.bf16.msra.mxu0 %v7034_v62  ;;  %6515 = vmatprep.mubr.msk.f32.mxu0 %vm324_vm3, %v7747_v34 }
 0xd08   :  { %7039 = vmatprep.subr.bf16.mxu0 %v7038_v3 }
 0xd0b   :  { %v6506_v5 = vpop.f32.mrb[20].mxu1  ;;  %7041 = vmatpush3.bf16.msra.mxu0 %v7038_v3 }
 0xd0c   :  { %v2091_v6 = vadd.f32 %v6506_v5, %v5817_v4  ;;  %v2085_v7 = vpop.f32.mrb[21].mxu1 }
 0xd0d   :  { %v2086_v59 = vadd.f32 %v5817_v4, %v2085_v7  ;;  %v2608_v7 = vld [vmem:[%s8769_s18 + $0x8] sm:$0xff] }
 0xd0e   :  { %6516 = vmatmul.mubr.msk.f32.vlgmr.msra.gmra.mrb[16].mxu0 %vm324_vm3, %v7759_v39  ;;  %v5825_v39 = vld [vmem:[%s8822_s8 + $0x3] ss:$0 sm:$0xff] }
 0xd0f   :  { %6533 = vmatprep.mubr.msk.f32.mxu0 %vm633_vm6, %v2086_v59 }
 0xd13   :  { %v6528_v34 = vpop.f32.mrb[22].mxu1 }
 0xd14   :  { %v2267_v9 = vadd.f32 %v6528_v34, %v5833_v8  ;;  %v2261_v10 = vpop.f32.mrb[23].mxu1  ;;  %v2610_v34 = vld [vmem:[%s8769_s18 + $0x18] sm:$0xff] }
 0xd15   :  { %v2262_v11 = vadd.f32 %v5833_v8, %v2261_v10  ;;  %v2609_v8 = vld [vmem:[%s8769_s18 + $0x10] sm:$0xff] }
 0xd17   :  { %v7056_v13 = vpack.c.bf16 %v2267_v9, %v2262_v11  ;;  %v7066_v9 = vpack.c.bf16 %v2610_v34, %v2609_v8 }
 0xd19   :  { %7058 = vmatprep.subr.msk.bf16.mxu1 %vm7775_vm8, %v7056_v13 }
 0xd1a   :  { %7061 = vmatpush3.bf16.msk.msra.mxu1 %vm7775_vm8, %v7056_v13 }
 0xde1   :  { %v6517_v14 = vpop.f32.mrb[16].mxu0 }
 0xde2   :  { %v2179_v16 = vadd.f32 %v6517_v14, %v5825_v39  ;;  %v2173_v17 = vpop.f32.mrb[17].mxu0 }
 0xde3   :  { %v2174_v18 = vadd.f32 %v5825_v39, %v2173_v17 }
 0xde5   :  { %v7050_v19 = vpack.c.bf16 %v2179_v16, %v2174_v18  ;;  %v5847_v18 = vld [vmem:[%s8770_s16] ss:$0 sm:$0xff] }
 0xde7   :  { %7052 = vmatprep.subr.msk.bf16.mxu0 %vm7795_vm9, %v7050_v19 }
 0xde8   :  { %7055 = vmatpush3.bf16.xpose.msk.msra.mxu0 %vm7795_vm9, %v7050_v19 }
 0xde9   :  { %6543 = vmatprep.subr.mxu0 %v5843_v37 }
 0xdef   :  { %6534 = vmatmul.mubr.msk.f32.vlgmr.msra.gmra.mrb[18].mxu0 %vm633_vm6, %v2091_v6  ;;  %v2607_v6 = vld [vmem:[%s8769_s18] sm:$0xff] }
 0xdf0   :  { %6544 = vmatpush3.msra.mxu0 %v5843_v37  ;;  %v7062_v59 = vpack.c.bf16 %v2608_v7, %v2607_v6 }
 0xdf2   :  { %7063 = vmatprep.subr.bf16.mxu1 %v7062_v59 }
 0xec2   :  { %v6535_v20 = vpop.f32.mrb[18].mxu0 }
 0xec3   :  { %v2358_v21 = vmul.f32 0.35355338, %v6535_v20  ;;  %v2348_v22 = vpop.f32.mrb[19].mxu0 }
 0xec4   :  { %v2357_v23 = vmul.f32 0.35355338, %v2348_v22  ;;  %v5848_v22 = vld [vmem:[%s8771_s17] ss:$0 sm:$0xff] }
 0xec5   :  { %v2360_v24 = vadd.f32 %v2358_v21, %v7833_v12 }
 0xec6   :  { %v2359_v25 = vadd.f32 %v2357_v23, %v7838_v15 }
 0xec7   :  { %v2364_v26 = vsel %vm729_vm10, %v2360_v24, -inf }
 0xec8   :  { %2365 = vmax.xlane.f32.xlu1 %v2364_v26  ;;  %v2361_v27 = vsel %vm725_vm11, %v2359_v25, -inf }
 0xec9   :  { %2362 = vmax.xlane.f32.xlu0 %v2361_v27  ;;  %v2709_v27 = vld [vmem:[%s8772_s20] sm:$0xff] }
 0xf55   :  { %v2366_v28 = vpop.xlane.xlu1 %2365 }
 0xf56   :  { %v2368_v29 = vsub.f32 %v2360_v24, %v2366_v28  ;;  %v2363_v30 = vpop.xlane.xlu0 %2362  ;;  %v2710_v28 = vld [vmem:[%s8772_s20 + $0x8] sm:$0xff] }
 0xf57   :  { %v2367_v31 = vsub.f32 %v2359_v25, %v2363_v30  ;;  %v2711_v30 = vld [vmem:[%s8772_s20 + $0x10] sm:$0xff] }
 0xf58   :  { %v2371_v32 = vmul.f32 1.442695, %v2368_v29  ;;  %v7070_v29 = vpack.c.bf16 %v2710_v28, %v2709_v27 }
 0xf59   :  { %v2369_v33 = vmul.f32 1.442695, %v2367_v31  ;;  %v2712_v31 = vld [vmem:[%s8772_s20 + $0x18] sm:$0xff] }
 0xf5a   :  { %7356 = vpow2.f32 %v2371_v32  ;;  %7071 = vmatprep.subr.bf16.mxu0 %v7070_v29  ;;  %v7074_v32 = vpack.c.bf16 %v2712_v31, %v2711_v30 }
 0xf5b   :  { %7358 = vpow2.f32 %v2369_v33  ;;  %v2713_v33 = vld [vmem:[%s8772_s20 + $0x20] sm:$0xff] }
 0xf64   :  { %v7357_v35 = vpop.eup %7356 }
 0xf65   :  { %v7359_v36 = vpop.eup %7358  ;;  %v2376_v12 = vsel %vm729_vm10, %v7357_v35, 0.0 }
 0xf66   :  { %2377 = vadd.xlane.f32.xlu1 %v2376_v12  ;;  %v2373_v15 = vsel %vm725_vm11, %v7359_v36, 0.0  ;;  %v2715_v12 = vld [vmem:[%s8772_s20 + $0x30] sm:$0xff] }
 0xf67   :  { %2374 = vadd.xlane.f32.xlu0 %v2373_v15  ;;  %v2716_v15 = vld [vmem:[%s8772_s20 + $0x38] sm:$0xff] }
 0xf68   :  { %v7082_v37 = vpack.c.bf16 %v2716_v15, %v2715_v12 }
 0xff3   :  { %v2378_v38 = vpop.xlane.xlu1 %2377 }
 0xff4   :  { %7360 = vrcp.f32 %v2378_v38  ;;  %v2375_v40 = vpop.xlane.xlu0 %2374  ;;  %v5849_v38 = vld [vmem:[%s8773_s19] ss:$0 sm:$0xff] }
 0xff5   :  { %7362 = vrcp.f32 %v2375_v40 }
 0xffe   :  { %v7361_v41 = vpop.eup %7360 }
 0xfff   :  { %v7363_v42 = vpop.eup %7362  ;;  %v2382_v44 = vmul.f32 %v7361_v41, %v7357_v35  ;;  %v2714_v35 = vld [vmem:[%s8772_s20 + $0x28] sm:$0xff] }
0x1000   :  { %v2381_v43 = vmul.f32 %v7363_v42, %v7359_v36  ;;  %v7078_v36 = vpack.c.bf16 %v2714_v35, %v2713_v33  ;;  %v5857_v35 = vld [vmem:[%s8816_s12 + $0x1] ss:$0 sm:$0xff] }
0x1002   :  { %6540 = vmatprep.mubr.msk.f32.mxu1 %vm725_vm11, %v2381_v43 }
0x1003   :  { %6541 = vmatmul.mubr.msk.f32.vlgmr.msra.gmra.mrb[24].mxu1 %vm725_vm11, %v2382_v44 }
0x1004   :  { %7065 = vmatpush3.bf16.msra.mxu1 %v7062_v59 }
0x1005   :  { %7067 = vmatprep.subr.bf16.mxu1 %v7066_v9 }
0x1008   :  { %7069 = vmatpush3.bf16.msra.mxu1 %v7066_v9 }
0x10d6   :  { %v6542_v45 = vpop.f32.mrb[24].mxu1 }
0x10d7   :  { %v2458_v46 = vpop.f32.mrb[25].mxu1 }
0x10d8   :  { %6545 = vmatprep.mubr.msk.f32.mxu0 %vm633_vm6, %v2458_v46 }
0x10d9   :  { %6546 = vmatmul.mubr.msk.f32.vlgmr.msra.gmra.mrb[10].mxu0 %vm633_vm6, %v6542_v45 }
0x10da   :  { %7073 = vmatpush3.bf16.msra.mxu0 %v7070_v29 }
0x10db   :  { %7075 = vmatprep.subr.bf16.mxu0 %v7074_v32 }
0x10de   :  { %7077 = vmatpush3.bf16.msra.mxu0 %v7074_v32 }
0x10df   :  { %7079 = vmatprep.subr.bf16.mxu0 %v7078_v36 }
0x10e2   :  { %7081 = vmatpush3.bf16.msra.mxu0 %v7078_v36 }
0x10e3   :  { %7083 = vmatprep.subr.bf16.mxu0 %v7082_v37 }
0x10e6   :  { %7085 = vmatpush3.bf16.msra.mxu0 %v7082_v37  ;;  %v5858_v37 = vld [vmem:[%s8817_s4 + $0x1] ss:$0 sm:$0xff] }
0x11ac   :  { %v6547_v48 = vpop.f32.mrb[10].mxu0 }
0x11ad   :  { %v2560_v49 = vadd.f32 %v6547_v48, %v5846_v47  ;;  %v2541_v51 = vpop.f32.mrb[11].mxu0 }
0x11ae   :  { %v2559_v52 = vadd.f32 %v5846_v47, %v2541_v51 }
0x11af   :  { %v8071_v53 = vadd.f32 %v2560_v49, %v7703_v58 }
0x11b0   :  { %v8074_v54 = vadd.f32 %v2559_v52, %v7699_v56 }
0x11b1   :  { %v2568_v55 = vsel %vm328_vm4, %v8071_v53, 0.0 }
0x11b2   :  { %2569 = vadd.xlane.f32.xlu1 %v2568_v55  ;;  %v2565_v57 = vsel %vm324_vm3, %v8074_v54, 0.0 }
0x11b3   :  { %2566 = vadd.xlane.f32.xlu0 %v2565_v57 }
0x123f   :  { %v2570_v62 = vpop.xlane.xlu1 %2569 }
0x1240   :  { %v2572_v63 = vmul.f32 0.03125, %v2570_v62  ;;  %v2567_v1 = vpop.xlane.xlu0 %2566  ;;  %v5852_v62 = vld [vmem:[%s8774_s21] ss:$0 sm:$0xff] }
0x1241   :  { %v2571_v60 = vmul.f32 0.03125, %v2567_v1 }
0x1242   :  { %v2574_v2 = vsub.f32 %v8071_v53, %v2572_v63 }
0x1243   :  { %v2573_v58 = vsub.f32 %v8074_v54, %v2571_v60 }
0x1244   :  { %v2576_v3 = vmul.f32 %v2574_v2, %v2574_v2 }
0x1245   :  { %v2575_v4 = vmul.f32 %v2573_v58, %v2573_v58 }
0x1246   :  { %v2580_v56 = vsel %vm328_vm4, %v2576_v3, 0.0 }
0x1247   :  { %2581 = vadd.xlane.f32.xlu1 %v2580_v56  ;;  %v2577_v5 = vsel %vm324_vm3, %v2575_v4, 0.0 }
0x1248   :  { %2578 = vadd.xlane.f32.xlu0 %v2577_v5 }
0x12d4   :  { %v2582_v10 = vpop.xlane.xlu1 %2581 }
0x12d5   :  { %v2584_v11 = vmul.f32 0.03125, %v2582_v10  ;;  %v2579_v13 = vpop.xlane.xlu0 %2578 }
0x12d6   :  { %v2583_v39 = vmul.f32 0.03125, %v2579_v13  ;;  %v5860_v13 = vld [vmem:[%s8813_s7 + $0x88] sm:$0xff] }
0x12d7   :  { %v2586_v14 = vadd.f32 1e-06, %v2584_v11  ;;  %v5859_v11 = vld [vmem:[%s8813_s7 + $0x80] sm:$0xff] }
0x12d8   :  { %v2585_v16 = vadd.f32 1e-06, %v2583_v39  ;;  %v7086_v39 = vpack.c.bf16 %v5860_v13, %v5859_v11  ;;  %v5909_v13 = vld [vmem:[%s8814_s0 + $0xb0] sm:$0xff] }
0x12d9   :  { %7364 = vrsqrt.f32 %v2586_v14  ;;  %v5875_v14 = vld [vmem:[%s8814_s0 + $0x80] sm:$0xff] }
0x12da   :  { %7366 = vrsqrt.f32 %v2585_v16  ;;  %v5876_v16 = vld [vmem:[%s8814_s0 + $0x88] sm:$0xff]  ;;  %7087 = vmatprep.subr.bf16.mxu1 %v7086_v39 }
0x12e3   :  { %v7365_v17 = vpop.eup %7364 }
0x12e4   :  { %v7367_v19 = vpop.eup %7366  ;;  %v2590_v20 = vmul.f32 %v7365_v17, %v2574_v2  ;;  %v7102_v17 = vpack.c.bf16 %v5876_v16, %v5875_v14 }
0x12e5   :  { %v2589_v21 = vmul.f32 %v7367_v19, %v2573_v58  ;;  %v5862_v19 = vld [vmem:[%s8813_s7 + $0x98] sm:$0xff] }
0x12e6   :  { %v2598_v23 = vmul.f32 %v5847_v18, %v2590_v20  ;;  %7103 = vmatprep.subr.bf16.mxu0 %v7102_v17 }
0x12e7   :  { %v2597_v24 = vmul.f32 %v5847_v18, %v2589_v21  ;;  %v5861_v18 = vld [vmem:[%s8813_s7 + $0x90] sm:$0xff] }
0x12e8   :  { %v2606_v26 = vadd.f32 %v5848_v22, %v2598_v23  ;;  %v7090_v20 = vpack.c.bf16 %v5862_v19, %v5861_v18  ;;  %v5877_v21 = vld [vmem:[%s8814_s0 + $0x90] sm:$0xff] }
0x12e9   :  { %v2605_v25 = vadd.f32 %v5848_v22, %v2597_v24  ;;  %v5878_v22 = vld [vmem:[%s8814_s0 + $0x98] sm:$0xff]  ;;  %v5867_v24 = vld [vmem:[%s8815_s13 + $0x80] sm:$0xff] }
0x12ea   :  { %v7106_v23 = vpack.c.bf16 %v5878_v22, %v5877_v21  ;;  %v8268_v22 = vld [vmem:[%s8766_s1] sm:$0xff] }
0x12eb   :  { %6556 = vmatprep.mubr.msk.f32.mxu1 %vm324_vm3, %v2605_v25  ;;  %v5868_v25 = vld [vmem:[%s8815_s13 + $0x88] sm:$0xff] }
0x12ec   :  { %6557 = vmatmul.mubr.msk.f32.vlgmr.msra.gmra.mrb[26].mxu1 %vm324_vm3, %v2606_v26  ;;  %v7094_v26 = vpack.c.bf16 %v5868_v25, %v5867_v24 }
0x12ed   :  { %7089 = vmatpush3.bf16.msra.mxu1 %v7086_v39  ;;  %v5910_v39 = vld [vmem:[%s8814_s0 + $0xb8] sm:$0xff] }
0x12ee   :  { %7091 = vmatprep.subr.bf16.mxu1 %v7090_v20  ;;  %v7142_v14 = vpack.c.bf16 %v5910_v39, %v5909_v13 }
0x12f1   :  { %7093 = vmatpush3.bf16.msra.mxu1 %v7090_v20  ;;  %v8262_v20 = vld [vmem:[%s8766_s1 + $0x8] sm:$0x3] }
0x12f2   :  { %7095 = vmatprep.subr.bf16.mxu1 %v7094_v26 }
0x13bf   :  { %v6558_v40 = vpop.f32.mrb[26].mxu1 }
0x13c0   :  { %v2696_v41 = vadd.f32 %v6558_v40, %v5849_v38  ;;  %v2690_v42 = vpop.f32.mrb[27].mxu1 }
0x13c1   :  { %v2691_v43 = vadd.f32 %v5849_v38, %v2690_v42  ;;  %v5870_v42 = vld [vmem:[%s8815_s13 + $0x98] sm:$0xff] }
0x13c2   :  { %v2702_v44 = vmul.f32 0.70710677, %v2696_v41  ;;  %v2700_v52 = vmul.f32 0.5, %v2696_v41  ;;  %v5869_v41 = vld [vmem:[%s8815_s13 + $0x90] sm:$0xff] }
0x13c3   :  { %v2701_v45 = vmul.f32 0.70710677, %v2691_v43  ;;  %v2699_v49 = vmul.f32 0.5, %v2691_v43 }
0x13c4   :  { %7368 = verf.f32 %v2702_v44 }
0x13c5   :  { %7370 = verf.f32 %v2701_v45  ;;  %v7098_v45 = vpack.c.bf16 %v5870_v42, %v5869_v41 }
0x13ce   :  { %v7369_v46 = vpop.eup %7368 }
0x13cf   :  { %v7371_v47 = vpop.eup %7370  ;;  %v2706_v48 = vadd.f32 1.0, %v7369_v46  ;;  %v5880_v46 = vld [vmem:[%s8818_s3 + $0x4] ss:$0 sm:$0xff] }
0x13d0   :  { %v2705_v51 = vadd.f32 1.0, %v7371_v47  ;;  %v5864_v47 = vld [vmem:[%s8819_s2 + $0x4] ss:$0 sm:$0xff] }
0x13d1   :  { %v2708_v57 = vmul.f32 %v2706_v48, %v2700_v52 }
0x13d2   :  { %v2707_v55 = vmul.f32 %v2705_v51, %v2699_v49 }
0x13d4   :  { %6575 = vmatprep.mubr.msk.f32.mxu0 %vm126_vm0, %v2707_v55 }
0x13d5   :  { %6576 = vmatmul.mubr.msk.f32.vlgmr.msra.gmra.mrb[20].mxu0 %vm126_vm0, %v2708_v57 }
0x13d6   :  { %7105 = vmatpush3.bf16.msra.mxu0 %v7102_v17 }
0x13d7   :  { %7107 = vmatprep.subr.bf16.mxu0 %v7106_v23 }
0x13da   :  { %7109 = vmatpush3.bf16.msra.mxu0 %v7106_v23 }
0x14a8   :  { %v6577_v63 = vpop.f32.mrb[20].mxu0 }
0x14a9   :  { %v2802_v1 = vadd.f32 %v6577_v63, %v5852_v62  ;;  %v2796_v60 = vpop.f32.mrb[21].mxu0 }
0x14aa   :  { %v2797_v2 = vadd.f32 %v5852_v62, %v2796_v60 }
0x14ab   :  { %v8137_v58 = vadd.f32 %v2802_v1, %v8071_v53  ;;  %v5872_v1 = vld [vmem:[%s8822_s8 + $0x4] ss:$0 sm:$0xff] }
0x14ac   :  { %v8140_v3 = vadd.f32 %v2797_v2, %v8074_v54 }
0x14ad   :  { %v2814_v4 = vsel %vm328_vm4, %v8137_v58, 0.0 }
0x14ae   :  { %2815 = vadd.xlane.f32.xlu1 %v2814_v4  ;;  %v2811_v56 = vsel %vm324_vm3, %v8140_v3, 0.0 }
0x14af   :  { %2812 = vadd.xlane.f32.xlu0 %v2811_v56  ;;  %v5891_v56 = vld [vmem:[%s8813_s7 + $0xa0] sm:$0xff] }
0x153b   :  { %v2816_v5 = vpop.xlane.xlu1 %2815 }
0x153c   :  { %v2818_v6 = vmul.f32 0.03125, %v2816_v5  ;;  %v2813_v7 = vpop.xlane.xlu0 %2812  ;;  %v5892_v5 = vld [vmem:[%s8813_s7 + $0xa8] sm:$0xff] }
0x153d   :  { %v2817_v59 = vmul.f32 0.03125, %v2813_v7 }
0x153e   :  { %v2820_v8 = vsub.f32 %v8137_v58, %v2818_v6 }
0x153f   :  { %v2819_v53 = vsub.f32 %v8140_v3, %v2817_v59  ;;  %v7122_v59 = vpack.c.bf16 %v5892_v5, %v5891_v56 }
0x1540   :  { %v2822_v34 = vmul.f32 %v2820_v8, %v2820_v8 }
0x1541   :  { %v2821_v9 = vmul.f32 %v2819_v53, %v2819_v53 }
0x1542   :  { %v2826_v54 = vsel %vm328_vm4, %v2822_v34, 0.0 }
0x1543   :  { %2827 = vadd.xlane.f32.xlu1 %v2826_v54  ;;  %v2823_v10 = vsel %vm324_vm3, %v2821_v9, 0.0  ;;  %v5907_v54 = vld [vmem:[%s8814_s0 + $0xa0] sm:$0xff] }
0x1544   :  { %2824 = vadd.xlane.f32.xlu0 %v2823_v10  ;;  %v5908_v10 = vld [vmem:[%s8814_s0 + $0xa8] sm:$0xff] }
0x1545   :  { %v7138_v11 = vpack.c.bf16 %v5908_v10, %v5907_v54 }
0x15d0   :  { %v2828_v27 = vpop.xlane.xlu1 %2827 }
0x15d1   :  { %v2830_v28 = vmul.f32 0.03125, %v2828_v27  ;;  %v2825_v29 = vpop.xlane.xlu0 %2824 }
0x15d2   :  { %v2829_v30 = vmul.f32 0.03125, %v2825_v29 }
0x15d3   :  { %v2832_v31 = vadd.f32 1e-06, %v2830_v28 }
0x15d4   :  { %v2831_v32 = vadd.f32 1e-06, %v2829_v30  ;;  %v5912_v30 = vld [vmem:[%s8818_s3 + $0x5] ss:$0 sm:$0xff] }
0x15d5   :  { %7372 = vrsqrt.f32 %v2832_v31 }
0x15d6   :  { %7374 = vrsqrt.f32 %v2831_v32 }
0x15df   :  { %v7373_v33 = vpop.eup %7372 }
0x15e0   :  { %v7375_v36 = vpop.eup %7374  ;;  %v2836_v12 = vmul.f32 %v7373_v33, %v2820_v8  ;;  %v5893_v8 = vld [vmem:[%s8813_s7 + $0xb0] sm:$0xff] }
0x15e1   :  { %v2835_v15 = vmul.f32 %v7375_v36, %v2819_v53  ;;  %v5894_v53 = vld [vmem:[%s8813_s7 + $0xb8] sm:$0xff] }
0x15e2   :  { %v2844_v38 = vmul.f32 %v5857_v35, %v2836_v12  ;;  %v7126_v9 = vpack.c.bf16 %v5894_v53, %v5893_v8 }
0x15e3   :  { %v2843_v40 = vmul.f32 %v5857_v35, %v2835_v15 }
0x15e4   :  { %v8194_v44 = vadd.f32 %v5858_v37, %v2844_v38 }
0x15e5   :  { %v8192_v43 = vadd.f32 %v5858_v37, %v2843_v40 }
0x15e7   :  { %6586 = vmatprep.mubr.msk.f32.mxu1 %vm324_vm3, %v8192_v43  ;;  %6608 = vmatprep.mubr.msk.f32.mxu0 %vm324_vm3, %v8192_v43 }
0x15e8   :  { %6587 = vmatmul.mubr.msk.f32.vlgmr.msra.gmra.mrb[28].mxu1 %vm324_vm3, %v8194_v44  ;;  %6609 = vmatmul.mubr.msk.f32.vlgmr.msra.gmra.mrb[22].mxu0 %vm324_vm3, %v8194_v44 }
0x15e9   :  { %7097 = vmatpush3.bf16.msra.mxu1 %v7094_v26  ;;  %6597 = vmatprep.mubr.msk.f32.mxu1 %vm324_vm3, %v8192_v43  ;;  %v5896_v26 = vld [vmem:[%s8819_s2 + $0x5] ss:$0 sm:$0xff] }
0x15ea   :  { %7099 = vmatprep.subr.bf16.mxu1 %v7098_v45 }
0x15ed   :  { %7101 = vmatpush3.bf16.msra.mxu1 %v7098_v45 }
0x15f0   :  { %6598 = vmatmul.mubr.msk.f32.vlgmr.msra.gmra.mrb[30].mxu1 %vm324_vm3, %v8194_v44 }
0x16bb   :  { %v6588_v48 = vpop.f32.mrb[28].mxu1  ;;  %v6610_v49 = vpop.f32.mrb[22].mxu0 }
0x16bc   :  { %v3120_v51 = vadd.f32 %v6610_v49, %v5880_v46  ;;  %v2938_v52 = vpop.f32.mrb[29].mxu1  ;;  %v3114_v55 = vpop.f32.mrb[23].mxu0  ;;  %v2944_v34 = vadd.f32 %v6588_v48, %v5864_v47  ;;  %v5899_v48 = vld [vmem:[%s8815_s13 + $0xa0] sm:$0xff]  ;;  %v5900_v49 = vld [vmem:[%s8815_s13 + $0xa8] sm:$0xff] }
0x16bd   :  { %v2939_v57 = vadd.f32 %v5864_v47, %v2938_v52  ;;  %v3115_v62 = vadd.f32 %v5880_v46, %v3114_v55 }
0x16bf   :  { %v7116_v63 = vpack.c.bf16 %v3120_v51, %v3115_v62  ;;  %6615 = vmatprep.mubr.msk.f32.mxu1 %vm633_vm6, %v2939_v57  ;;  %v7130_v51 = vpack.c.bf16 %v5900_v49, %v5899_v48  ;;  %v5901_v62 = vld [vmem:[%s8815_s13 + $0xb0] sm:$0xff]  ;;  %v5946_v49 = vld [vmem:[%s8814_s0 + $0xd8] sm:$0xff] }
0x16c0   :  { %v5945_v48 = vld [vmem:[%s8814_s0 + $0xd0] sm:$0xff] }
0x16c1   :  { %7118 = vmatprep.subr.msk.bf16.mxu0 %vm7775_vm8, %v7116_v63 }
0x16c2   :  { %7121 = vmatpush3.bf16.msk.msra.mxu0 %vm7775_vm8, %v7116_v63  ;;  %v5902_v63 = vld [vmem:[%s8815_s13 + $0xb8] sm:$0xff] }
0x16c3   :  { %v6599_v60 = vpop.f32.mrb[30].mxu1  ;;  %7131 = vmatprep.subr.bf16.mxu0 %v7130_v51 }
0x16c4   :  { %v3032_v2 = vadd.f32 %v6599_v60, %v5872_v1  ;;  %v3026_v4 = vpop.f32.mrb[31].mxu1 }
0x16c5   :  { %v3027_v6 = vadd.f32 %v5872_v1, %v3026_v4  ;;  %v7134_v4 = vpack.c.bf16 %v5902_v63, %v5901_v62 }
0x16c7   :  { %v7110_v7 = vpack.c.bf16 %v3032_v2, %v3027_v6 }
0x16c9   :  { %7112 = vmatprep.subr.msk.bf16.mxu1 %vm7795_vm9, %v7110_v7 }
0x16ca   :  { %7115 = vmatpush3.bf16.xpose.msk.msra.mxu1 %vm7795_vm9, %v7110_v7  ;;  %v5904_v7 = vld [vmem:[%s8822_s8 + $0x5] ss:$0 sm:$0xff] }
0x16cb   :  { %7123 = vmatprep.subr.bf16.mxu1 %v7122_v59 }
0x16d1   :  { %6616 = vmatmul.mubr.msk.f32.vlgmr.msra.gmra.mrb[32].mxu1 %vm633_vm6, %v2944_v34 }
0x16d2   :  { %7125 = vmatpush3.bf16.msra.mxu1 %v7122_v59  ;;  %6633 = vmatprep.mubr.msk.f32.mxu1 %vm324_vm3, %v8192_v43 }
0x16d3   :  { %7127 = vmatprep.subr.bf16.mxu1 %v7126_v9 }
0x16d6   :  { %7129 = vmatpush3.bf16.msra.mxu1 %v7126_v9 }
0x16d7   :  { %7139 = vmatprep.subr.bf16.mxu1 %v7138_v11 }
0x16d9   :  { %6634 = vmatmul.mubr.msk.f32.vlgmr.msra.gmra.mrb[34].mxu1 %vm324_vm3, %v8194_v44 }
0x16da   :  { %7141 = vmatpush3.bf16.msra.mxu1 %v7138_v11  ;;  %6655 = vmatprep.mubr.msk.f32.mxu1 %vm324_vm3, %v8192_v43 }
0x16db   :  { %7143 = vmatprep.subr.bf16.mxu1 %v7142_v14 }
0x16de   :  { %7145 = vmatpush3.bf16.msra.mxu1 %v7142_v14 }
0x16e1   :  { %6656 = vmatmul.mubr.msk.f32.vlgmr.msra.gmra.mrb[36].mxu1 %vm324_vm3, %v8194_v44 }
0x17a4   :  { %v6617_v16 = vpop.f32.mrb[32].mxu1 }
0x17a5   :  { %v3211_v17 = vmul.f32 0.35355338, %v6617_v16  ;;  %v3201_v18 = vpop.f32.mrb[33].mxu1 }
0x17a6   :  { %v3210_v19 = vmul.f32 0.35355338, %v3201_v18 }
0x17a7   :  { %v3213_v21 = vadd.f32 %v8262_v20, %v3211_v17 }
0x17a8   :  { %v3212_v23 = vadd.f32 %v8268_v22, %v3210_v19 }
0x17a9   :  { %v3217_v24 = vsel %vm729_vm10, %v3213_v21, -inf }
0x17aa   :  { %3218 = vmax.xlane.f32.xlu1 %v3217_v24  ;;  %v3214_v25 = vsel %vm725_vm11, %v3212_v23, -inf }
0x17ab   :  { %3215 = vmax.xlane.f32.xlu0 %v3214_v25 }
0x17ac   :  { %v6635_v27 = vpop.f32.mrb[34].mxu1 }
0x17ad   :  { %v3407_v28 = vadd.f32 %v6635_v27, %v5896_v26  ;;  %v3401_v29 = vpop.f32.mrb[35].mxu1 }
0x17ae   :  { %v3402_v56 = vadd.f32 %v5896_v26, %v3401_v29 }
0x17b4   :  { %v6657_v31 = vpop.f32.mrb[36].mxu1 }
0x17b5   :  { %v3583_v32 = vadd.f32 %v6657_v31, %v5912_v30  ;;  %v3577_v33 = vpop.f32.mrb[37].mxu1  ;;  %v5928_v31 = vld [vmem:[%s8813_s7 + $0xc8] sm:$0xff] }
0x17b6   :  { %v3578_v35 = vadd.f32 %v5912_v30, %v3577_v33  ;;  %v5927_v30 = vld [vmem:[%s8813_s7 + $0xc0] sm:$0xff]  ;;  %v5922_v33 = vld [vmem:[%s8767_s14 + $0x28] sm:$0xff] }
0x17b8   :  { %v7152_v36 = vpack.c.bf16 %v3583_v32, %v3578_v35  ;;  %v7158_v32 = vpack.c.bf16 %v5928_v31, %v5927_v30 }
0x17ba   :  { %7154 = vmatprep.subr.msk.bf16.mxu1 %vm7775_vm8, %v7152_v36 }
0x17bb   :  { %7157 = vmatpush3.bf16.msk.msra.mxu1 %vm7775_vm8, %v7152_v36 }
0x17bc   :  { %7159 = vmatprep.subr.bf16.mxu1 %v7158_v32 }
0x1837   :  { %v3219_v12 = vpop.xlane.xlu1 %3218 }
0x1838   :  { %v3221_v15 = vsub.f32 %v3213_v21, %v3219_v12  ;;  %v3216_v37 = vpop.xlane.xlu0 %3215 }
0x1839   :  { %v3220_v38 = vsub.f32 %v3212_v23, %v3216_v37  ;;  %v5930_v37 = vld [vmem:[%s8813_s7 + $0xd8] sm:$0xff] }
0x183a   :  { %v3224_v40 = vmul.f32 1.442695, %v3221_v15  ;;  %v5929_v15 = vld [vmem:[%s8813_s7 + $0xd0] sm:$0xff] }
0x183b   :  { %v3222_v41 = vmul.f32 1.442695, %v3220_v38 }
0x183c   :  { %7376 = vpow2.f32 %v3224_v40 }
0x183d   :  { %7378 = vpow2.f32 %v3222_v41 }
0x1846   :  { %v7377_v42 = vpop.eup %7376 }
0x1847   :  { %v7379_v45 = vpop.eup %7378  ;;  %v3229_v46 = vsel %vm729_vm10, %v7377_v42, 0.0 }
0x1848   :  { %3230 = vadd.xlane.f32.xlu1 %v3229_v46  ;;  %v3226_v47 = vsel %vm725_vm11, %v7379_v45, 0.0  ;;  %v5944_v46 = vld [vmem:[%s8814_s0 + $0xc8] sm:$0xff] }
0x1849   :  { %3227 = vadd.xlane.f32.xlu0 %v3226_v47 }
0x18d5   :  { %v3231_v52 = vpop.xlane.xlu1 %3230 }
0x18d6   :  { %7380 = vrcp.f32 %v3231_v52  ;;  %v3228_v55 = vpop.xlane.xlu0 %3227  ;;  %v5890_v52 = vld [vmem:[%s8767_s14 + $0x20] sm:$0xff] }
0x18d7   :  { %7382 = vrcp.f32 %v3228_v55  ;;  %v5935_v55 = vld [vmem:[%s8815_s13 + $0xc0] sm:$0xff] }
0x18e0   :  { %v7381_v57 = vpop.eup %7380 }
0x18e1   :  { %v7383_v1 = vpop.eup %7382  ;;  %v3235_v2 = vmul.f32 %v7381_v57, %v7377_v42  ;;  %v7162_v42 = vpack.c.bf16 %v5930_v37, %v5929_v15  ;;  %v5936_v57 = vld [vmem:[%s8815_s13 + $0xc8] sm:$0xff]  ;;  %v5961_v37 = vld [vmem:[%s8813_s7 + $0xe0] sm:$0xff] }
0x18e2   :  { %v3234_v60 = vmul.f32 %v7383_v1, %v7379_v45  ;;  %v5943_v45 = vld [vmem:[%s8814_s0 + $0xc0] sm:$0xff]  ;;  %v7166_v1 = vpack.c.bf16 %v5936_v57, %v5935_v55 }
0x18e3   :  { %v7174_v47 = vpack.c.bf16 %v5944_v46, %v5943_v45  ;;  %v5977_v57 = vld [vmem:[%s8814_s0 + $0xe0] sm:$0xff] }
0x18e4   :  { %6622 = vmatprep.mubr.msk.f32.mxu0 %vm725_vm11, %v3234_v60  ;;  %v5932_v60 = vld [vmem:[%s8819_s2 + $0x6] ss:$0 sm:$0xff] }
0x18e5   :  { %6623 = vmatmul.mubr.msk.f32.vlgmr.msra.gmra.mrb[24].mxu0 %vm725_vm11, %v3235_v2  ;;  %v5937_v2 = vld [vmem:[%s8815_s13 + $0xd0] sm:$0xff] }
0x18e6   :  { %7133 = vmatpush3.bf16.msra.mxu0 %v7130_v51  ;;  %6644 = vmatprep.mubr.msk.f32.mxu0 %vm324_vm3, %v8192_v43  ;;  %v7178_v51 = vpack.c.bf16 %v5946_v49, %v5945_v48  ;;  %v5964_v48 = vld [vmem:[%s8813_s7 + $0xf8] sm:$0xff] }
0x18e7   :  { %7135 = vmatprep.subr.bf16.mxu0 %v7134_v4 }
0x18ea   :  { %7137 = vmatpush3.bf16.msra.mxu0 %v7134_v4  ;;  %v5938_v4 = vld [vmem:[%s8815_s13 + $0xd8] sm:$0xff] }
0x18ed   :  { %6645 = vmatmul.mubr.msk.f32.vlgmr.msra.gmra.mrb[26].mxu0 %vm324_vm3, %v8194_v44 }
0x18ee   :  { %6662 = vmatprep.mubr.msk.f32.mxu0 %vm633_vm6, %v3402_v56 }
0x19b8   :  { %v8304_v5 = vpop.f32.mrb[24].mxu0 }
0x19b9   :  { %v8306_v6 = vpop.f32.mrb[25].mxu0 }
0x19c0   :  { %v6646_v59 = vpop.f32.mrb[26].mxu0 }
0x19c1   :  { %v3495_v8 = vadd.f32 %v6646_v59, %v5904_v7  ;;  %v3489_v53 = vpop.f32.mrb[27].mxu0 }
0x19c2   :  { %v3490_v34 = vadd.f32 %v5904_v7, %v3489_v53 }
0x19c4   :  { %v7146_v9 = vpack.c.bf16 %v3495_v8, %v3490_v34  ;;  %v7170_v8 = vpack.c.bf16 %v5938_v4, %v5937_v2  ;;  %v5969_v4 = vld [vmem:[%s8815_s13 + $0xe0] sm:$0xff] }
0x19c6   :  { %7148 = vmatprep.subr.msk.bf16.mxu0 %vm7795_vm9, %v7146_v9 }
0x19c7   :  { %7151 = vmatpush3.bf16.xpose.msk.msra.mxu0 %vm7795_vm9, %v7146_v9 }
0x19c8   :  { %6672 = vmatprep.subr.mxu0 %v5922_v33 }
0x19ce   :  { %6663 = vmatmul.mubr.msk.f32.vlgmr.msra.gmra.mrb[28].mxu0 %vm633_vm6, %v3407_v28 }
0x19cf   :  { %6673 = vmatpush3.msra.mxu0 %v5922_v33 }
0x19d0   :  { %6677 = vmatprep.subr.mxu0 %v5890_v52 }
0x1aa1   :  { %v6664_v54 = vpop.f32.mrb[28].mxu0 }
0x1aa2   :  { %v3674_v10 = vmul.f32 0.35355338, %v6664_v54  ;;  %v3664_v11 = vpop.f32.mrb[29].mxu0 }
0x1aa3   :  { %v3673_v13 = vmul.f32 0.35355338, %v3664_v11 }
0x1aa4   :  { %v3676_v39 = vadd.f32 %v8262_v20, %v3674_v10 }
0x1aa5   :  { %v3675_v14 = vadd.f32 %v8268_v22, %v3673_v13 }
0x1aa6   :  { %v3680_v16 = vsel %vm729_vm10, %v3676_v39, -inf }
0x1aa7   :  { %3681 = vmax.xlane.f32.xlu1 %v3680_v16  ;;  %v3677_v17 = vsel %vm725_vm11, %v3675_v14, -inf }
0x1aa8   :  { %3678 = vmax.xlane.f32.xlu0 %v3677_v17 }
0x1b34   :  { %v3682_v18 = vpop.xlane.xlu1 %3681 }
0x1b35   :  { %v3684_v19 = vsub.f32 %v3676_v39, %v3682_v18  ;;  %v3679_v21 = vpop.xlane.xlu0 %3678 }
0x1b36   :  { %v3683_v23 = vsub.f32 %v3675_v14, %v3679_v21 }
0x1b37   :  { %v3687_v24 = vmul.f32 1.442695, %v3684_v19 }
0x1b38   :  { %v3685_v25 = vmul.f32 1.442695, %v3683_v23 }
0x1b39   :  { %7384 = vpow2.f32 %v3687_v24 }
0x1b3a   :  { %7386 = vpow2.f32 %v3685_v25 }
0x1b43   :  { %v7385_v26 = vpop.eup %7384 }
0x1b44   :  { %v7387_v27 = vpop.eup %7386  ;;  %v3692_v28 = vsel %vm729_vm10, %v7385_v26, 0.0 }
0x1b45   :  { %3693 = vadd.xlane.f32.xlu1 %v3692_v28  ;;  %v3689_v29 = vsel %vm725_vm11, %v7387_v27, 0.0 }
0x1b46   :  { %3690 = vadd.xlane.f32.xlu0 %v3689_v29 }
0x1bd2   :  { %v3694_v35 = vpop.xlane.xlu1 %3693 }
0x1bd3   :  { %7388 = vrcp.f32 %v3694_v35  ;;  %v3691_v36 = vpop.xlane.xlu0 %3690 }
0x1bd4   :  { %7390 = vrcp.f32 %v3691_v36 }
0x1bdd   :  { %v7389_v12 = vpop.eup %7388 }
0x1bde   :  { %v7391_v38 = vpop.eup %7390  ;;  %v3698_v41 = vmul.f32 %v7389_v12, %v7385_v26 }
0x1bdf   :  { %v3697_v40 = vmul.f32 %v7391_v38, %v7387_v27  ;;  %v5962_v38 = vld [vmem:[%s8813_s7 + $0xe8] sm:$0xff] }
0x1be1   :  { %6669 = vmatprep.mubr.msk.f32.mxu1 %vm725_vm11, %v3697_v40  ;;  %v7194_v40 = vpack.c.bf16 %v5962_v38, %v5961_v37  ;;  %v5992_v38 = vld [vmem:[%s8767_s14 + $0x38] sm:$0xff] }
0x1be2   :  { %6670 = vmatmul.mubr.msk.f32.vlgmr.msra.gmra.mrb[38].mxu1 %vm725_vm11, %v3698_v41  ;;  %v5958_v41 = vld [vmem:[%s8767_s14 + $0x30] sm:$0xff] }
0x1be3   :  { %7161 = vmatpush3.bf16.msra.mxu1 %v7158_v32  ;;  %6690 = vmatprep.mubr.msk.f32.mxu1 %vm324_vm3, %v8192_v43 }
0x1be4   :  { %7163 = vmatprep.subr.bf16.mxu1 %v7162_v42 }
0x1be7   :  { %7165 = vmatpush3.bf16.msra.mxu1 %v7162_v42 }
0x1be8   :  { %7175 = vmatprep.subr.bf16.mxu1 %v7174_v47 }
0x1bea   :  { %6691 = vmatmul.mubr.msk.f32.vlgmr.msra.gmra.mrb[40].mxu1 %vm324_vm3, %v8194_v44 }
0x1beb   :  { %7177 = vmatpush3.bf16.msra.mxu1 %v7174_v47  ;;  %6712 = vmatprep.mubr.msk.f32.mxu1 %vm324_vm3, %v8192_v43  ;;  %v5963_v47 = vld [vmem:[%s8813_s7 + $0xf0] sm:$0xff] }
0x1bec   :  { %7179 = vmatprep.subr.bf16.mxu1 %v7178_v51  ;;  %v7198_v55 = vpack.c.bf16 %v5964_v48, %v5963_v47 }
0x1bef   :  { %7181 = vmatpush3.bf16.msra.mxu1 %v7178_v51 }
0x1bf2   :  { %6713 = vmatmul.mubr.msk.f32.vlgmr.msra.gmra.mrb[42].mxu1 %vm324_vm3, %v8194_v44 }
0x1cb5   :  { %v6671_v62 = vpop.f32.mrb[38].mxu1 }
0x1cb6   :  { %v3774_v63 = vpop.f32.mrb[39].mxu1 }
0x1cb7   :  { %6674 = vmatprep.mubr.msk.f32.mxu0 %vm633_vm6, %v3774_v63 }
0x1cb8   :  { %6675 = vmatmul.mubr.msk.f32.vlgmr.msra.gmra.mrb[30].mxu0 %vm633_vm6, %v6671_v62  ;;  %v5978_v62 = vld [vmem:[%s8814_s0 + $0xe8] sm:$0xff] }
0x1cb9   :  { %6678 = vmatpush3.msra.mxu0 %v5890_v52  ;;  %6679 = vmatprep.mubr.msk.f32.mxu0 %vm633_vm6, %v8306_v6  ;;  %v5948_v6 = vld [vmem:[%s8818_s3 + $0x6] ss:$0 sm:$0xff]  ;;  %v7210_v63 = vpack.c.bf16 %v5978_v62, %v5977_v57 }
0x1cba   :  { %7167 = vmatprep.subr.bf16.mxu0 %v7166_v1 }
0x1cbd   :  { %v6692_v56 = vpop.f32.mrb[40].mxu1 }
0x1cbe   :  { %v4032_v7 = vadd.f32 %v6692_v56, %v5932_v60  ;;  %v4026_v59 = vpop.f32.mrb[41].mxu1  ;;  %v5970_v56 = vld [vmem:[%s8815_s13 + $0xe8] sm:$0xff] }
0x1cbf   :  { %v4027_v54 = vadd.f32 %v5932_v60, %v4026_v59  ;;  %v5980_v60 = vld [vmem:[%s8814_s0 + $0xf8] sm:$0xff]  ;;  %v5971_v59 = vld [vmem:[%s8815_s13 + $0xf0] sm:$0xff] }
0x1cc0   :  { %6680 = vmatmul.mubr.msk.f32.vlgmr.msra.gmra.mrb[30].mxu0 %vm633_vm6, %v8304_v5  ;;  %v5940_v5 = vld [vmem:[%s8822_s8 + $0x6] ss:$0 sm:$0xff] }
0x1cc1   :  { %7169 = vmatpush3.bf16.msra.mxu0 %v7166_v1  ;;  %6701 = vmatprep.mubr.msk.f32.mxu0 %vm324_vm3, %v8192_v43  ;;  %v5979_v1 = vld [vmem:[%s8814_s0 + $0xf0] sm:$0xff] }
0x1cc2   :  { %7171 = vmatprep.subr.bf16.mxu0 %v7170_v8  ;;  %v7214_v2 = vpack.c.bf16 %v5980_v60, %v5979_v1 }
0x1cc5   :  { %7173 = vmatpush3.bf16.msra.mxu0 %v7170_v8  ;;  %v6714_v53 = vpop.f32.mrb[42].mxu1  ;;  %v5972_v8 = vld [vmem:[%s8815_s13 + $0xf8] sm:$0xff] }
0x1cc6   :  { %v4208_v34 = vadd.f32 %v6714_v53, %v5948_v6  ;;  %v4202_v9 = vpop.f32.mrb[43].mxu1 }
0x1cc7   :  { %v4203_v10 = vadd.f32 %v5948_v6, %v4202_v9  ;;  %v5966_v9 = vld [vmem:[%s8819_s2 + $0x7] ss:$0 sm:$0xff] }
0x1cc8   :  { %6702 = vmatmul.mubr.msk.f32.vlgmr.msra.gmra.mrb[32].mxu0 %vm324_vm3, %v8194_v44 }
0x1cc9   :  { %v7188_v11 = vpack.c.bf16 %v4208_v34, %v4203_v10  ;;  %6719 = vmatprep.mubr.msk.f32.mxu0 %vm633_vm6, %v4027_v54  ;;  %v7206_v34 = vpack.c.bf16 %v5972_v8, %v5971_v59 }
0x1ccb   :  { %7190 = vmatprep.subr.msk.bf16.mxu1 %vm7775_vm8, %v7188_v11 }
0x1ccc   :  { %7193 = vmatpush3.bf16.msk.msra.mxu1 %vm7775_vm8, %v7188_v11 }
0x1ccd   :  { %7195 = vmatprep.subr.bf16.mxu1 %v7194_v40 }
0x1d9b   :  { %v6703_v13 = vpop.f32.mrb[32].mxu0 }
0x1d9c   :  { %v4120_v39 = vadd.f32 %v6703_v13, %v5940_v5  ;;  %v4114_v14 = vpop.f32.mrb[33].mxu0  ;;  %v5982_v13 = vld [vmem:[%s8818_s3 + $0x7] ss:$0 sm:$0xff] }
0x1d9d   :  { %v4115_v16 = vadd.f32 %v5940_v5, %v4114_v14 }
0x1d9f   :  { %v7182_v17 = vpack.c.bf16 %v4120_v39, %v4115_v16 }
0x1da1   :  { %7184 = vmatprep.subr.msk.bf16.mxu0 %vm7795_vm9, %v7182_v17 }
0x1da2   :  { %7187 = vmatpush3.bf16.xpose.msk.msra.mxu0 %vm7795_vm9, %v7182_v17 }
0x1da3   :  { %6729 = vmatprep.subr.mxu0 %v5958_v41 }
0x1da9   :  { %6720 = vmatmul.mubr.msk.f32.vlgmr.msra.gmra.mrb[34].mxu0 %vm633_vm6, %v4032_v7  ;;  %v7202_v7 = vpack.c.bf16 %v5970_v56, %v5969_v4 }
0x1daa   :  { %6730 = vmatpush3.msra.mxu0 %v5958_v41 }
0x1dab   :  { %7203 = vmatprep.subr.bf16.mxu0 %v7202_v7 }
0x1e7c   :  { %v6721_v18 = vpop.f32.mrb[34].mxu0 }
0x1e7d   :  { %v4299_v19 = vmul.f32 0.35355338, %v6721_v18  ;;  %v4289_v21 = vpop.f32.mrb[35].mxu0 }
0x1e7e   :  { %v4298_v23 = vmul.f32 0.35355338, %v4289_v21 }
0x1e7f   :  { %v4301_v24 = vadd.f32 %v8262_v20, %v4299_v19 }
0x1e80   :  { %v4300_v25 = vadd.f32 %v8268_v22, %v4298_v23 }
0x1e81   :  { %v4305_v26 = vsel %vm729_vm10, %v4301_v24, -inf }
0x1e82   :  { %4306 = vmax.xlane.f32.xlu1 %v4305_v26  ;;  %v4302_v27 = vsel %vm725_vm11, %v4300_v25, -inf }
0x1e83   :  { %4303 = vmax.xlane.f32.xlu0 %v4302_v27 }
0x1f0f   :  { %v4307_v28 = vpop.xlane.xlu1 %4306 }
0x1f10   :  { %v4309_v29 = vsub.f32 %v4301_v24, %v4307_v28  ;;  %v4304_v30 = vpop.xlane.xlu0 %4303 }
0x1f11   :  { %v4308_v31 = vsub.f32 %v4300_v25, %v4304_v30 }
0x1f12   :  { %v4312_v32 = vmul.f32 1.442695, %v4309_v29 }
0x1f13   :  { %v4310_v33 = vmul.f32 1.442695, %v4308_v31 }
0x1f14   :  { %7392 = vpow2.f32 %v4312_v32 }
0x1f15   :  { %7394 = vpow2.f32 %v4310_v33 }
0x1f1e   :  { %v7393_v35 = vpop.eup %7392 }
0x1f1f   :  { %v7395_v36 = vpop.eup %7394  ;;  %v4317_v12 = vsel %vm729_vm10, %v7393_v35, 0.0 }
0x1f20   :  { %4318 = vadd.xlane.f32.xlu1 %v4317_v12  ;;  %v4314_v15 = vsel %vm725_vm11, %v7395_v36, 0.0 }
0x1f21   :  { %4315 = vadd.xlane.f32.xlu0 %v4314_v15 }
0x1fad   :  { %v4319_v42 = vpop.xlane.xlu1 %4318 }
0x1fae   :  { %7396 = vrcp.f32 %v4319_v42  ;;  %v4316_v45 = vpop.xlane.xlu0 %4315 }
0x1faf   :  { %7398 = vrcp.f32 %v4316_v45 }
0x1fb8   :  { %v7397_v46 = vpop.eup %7396 }
0x1fb9   :  { %v7399_v49 = vpop.eup %7398  ;;  %v4323_v52 = vmul.f32 %v7397_v46, %v7393_v35 }
0x1fba   :  { %v4322_v51 = vmul.f32 %v7399_v49, %v7395_v36 }
0x1fbc   :  { %6726 = vmatprep.mubr.msk.f32.mxu1 %vm725_vm11, %v4322_v51  ;;  %v5996_v51 = vld [vmem:[%s8768_s15 + $0x1] ss:$0 sm:$0xff] }
0x1fbd   :  { %6727 = vmatmul.mubr.msk.f32.vlgmr.msra.gmra.mrb[44].mxu1 %vm725_vm11, %v4323_v52 }
0x1fbe   :  { %7197 = vmatpush3.bf16.msra.mxu1 %v7194_v40  ;;  %6742 = vmatprep.mubr.msk.f32.mxu1 %vm324_vm3, %v8192_v43 }
0x1fbf   :  { %7199 = vmatprep.subr.bf16.mxu1 %v7198_v55 }
0x1fc2   :  { %7201 = vmatpush3.bf16.msra.mxu1 %v7198_v55 }
0x1fc3   :  { %7211 = vmatprep.subr.bf16.mxu1 %v7210_v63 }
0x1fc5   :  { %6743 = vmatmul.mubr.msk.f32.vlgmr.msra.gmra.mrb[46].mxu1 %vm324_vm3, %v8194_v44 }
0x1fc6   :  { %7213 = vmatpush3.bf16.msra.mxu1 %v7210_v63  ;;  %6764 = vmatprep.mubr.msk.f32.mxu1 %vm324_vm3, %v8192_v43 }
0x1fc7   :  { %7215 = vmatprep.subr.bf16.mxu1 %v7214_v2 }
0x1fca   :  { %7217 = vmatpush3.bf16.msra.mxu1 %v7214_v2 }
0x1fcd   :  { %6765 = vmatmul.mubr.msk.f32.vlgmr.msra.gmra.mrb[48].mxu1 %vm324_vm3, %v8194_v44 }
0x2090   :  { %v6728_v6 = vpop.f32.mrb[44].mxu1 }
0x2091   :  { %v4399_v53 = vpop.f32.mrb[45].mxu1 }
0x2092   :  { %6731 = vmatprep.mubr.msk.f32.mxu0 %vm633_vm6, %v4399_v53 }
0x2093   :  { %6732 = vmatmul.mubr.msk.f32.vlgmr.msra.gmra.mrb[30].mxu0 %vm633_vm6, %v6728_v6 }
0x2094   :  { %7205 = vmatpush3.bf16.msra.mxu0 %v7202_v7  ;;  %6753 = vmatprep.mubr.msk.f32.mxu0 %vm324_vm3, %v8192_v43 }
0x2095   :  { %7207 = vmatprep.subr.bf16.mxu0 %v7206_v34 }
0x2098   :  { %v6744_v54 = vpop.f32.mrb[46].mxu1  ;;  %7209 = vmatpush3.bf16.msra.mxu0 %v7206_v34 }
0x2099   :  { %v4578_v10 = vadd.f32 %v6744_v54, %v5966_v9  ;;  %v4572_v11 = vpop.f32.mrb[47].mxu1  ;;  %v6002_v54 = vld [vmem:[%s8769_s18 + $0x28] sm:$0xff] }
0x209a   :  { %v4573_v5 = vadd.f32 %v5966_v9, %v4572_v11  ;;  %v6001_v9 = vld [vmem:[%s8769_s18 + $0x20] sm:$0xff]  ;;  %v6003_v11 = vld [vmem:[%s8769_s18 + $0x30] sm:$0xff] }
0x209b   :  { %6754 = vmatmul.mubr.msk.f32.vlgmr.msra.gmra.mrb[36].mxu0 %vm324_vm3, %v8194_v44  ;;  %v5974_v44 = vld [vmem:[%s8822_s8 + $0x7] ss:$0 sm:$0xff] }
0x209c   :  { %6771 = vmatprep.mubr.msk.f32.mxu0 %vm633_vm6, %v4573_v5  ;;  %v6004_v5 = vld [vmem:[%s8769_s18 + $0x38] sm:$0xff] }
0x20a0   :  { %v6766_v43 = vpop.f32.mrb[48].mxu1 }
0x20a1   :  { %v4754_v39 = vadd.f32 %v6766_v43, %v5982_v13  ;;  %v4748_v14 = vpop.f32.mrb[49].mxu1 }
0x20a2   :  { %v4749_v16 = vadd.f32 %v5982_v13, %v4748_v14  ;;  %v7234_v13 = vpack.c.bf16 %v6004_v5, %v6003_v11  ;;  %v5341_v11 = vld [vmem:[%s8775_s24 + $0x20] sm:$0xff] }
0x20a4   :  { %v7224_v17 = vpack.c.bf16 %v4754_v39, %v4749_v16 }
0x20a6   :  { %7226 = vmatprep.subr.msk.bf16.mxu1 %vm7775_vm8, %v7224_v17 }
0x20a7   :  { %7229 = vmatpush3.bf16.msk.msra.mxu1 %vm7775_vm8, %v7224_v17 }
0x216e   :  { %v6755_v18 = vpop.f32.mrb[36].mxu0 }
0x216f   :  { %v4666_v19 = vadd.f32 %v6755_v18, %v5974_v44  ;;  %v4660_v21 = vpop.f32.mrb[37].mxu0 }
0x2170   :  { %v4661_v23 = vadd.f32 %v5974_v44, %v4660_v21 }
0x2172   :  { %v7218_v24 = vpack.c.bf16 %v4666_v19, %v4661_v23  ;;  %v5999_v19 = vld [vmem:[%s8770_s16 + $0x1] ss:$0 sm:$0xff] }
0x2174   :  { %7220 = vmatprep.subr.msk.bf16.mxu0 %vm7795_vm9, %v7218_v24 }
0x2175   :  { %7223 = vmatpush3.bf16.xpose.msk.msra.mxu0 %vm7795_vm9, %v7218_v24 }
0x2176   :  { %6781 = vmatprep.subr.mxu0 %v5992_v38 }
0x217c   :  { %6772 = vmatmul.mubr.msk.f32.vlgmr.msra.gmra.mrb[38].mxu0 %vm633_vm6, %v4578_v10  ;;  %v7230_v10 = vpack.c.bf16 %v6002_v54, %v6001_v9 }
0x217d   :  { %6782 = vmatpush3.msra.mxu0 %v5992_v38 }
0x217e   :  { %7231 = vmatprep.subr.bf16.mxu1 %v7230_v10 }
0x224f   :  { %v6773_v25 = vpop.f32.mrb[38].mxu0 }
0x2250   :  { %v4845_v50 = vmul.f32 0.35355338, %v6773_v25  ;;  %v4835_v26 = vpop.f32.mrb[39].mxu0  ;;  %v6000_v25 = vld [vmem:[%s8771_s17 + $0x1] ss:$0 sm:$0xff] }
0x2251   :  { %v4844_v27 = vmul.f32 0.35355338, %v4835_v26 }
0x2252   :  { %v4847_v28 = vadd.f32 %v8262_v20, %v4845_v50 }
0x2253   :  { %v4846_v29 = vadd.f32 %v8268_v22, %v4844_v27 }
0x2254   :  { %v4851_v30 = vsel %vm729_vm10, %v4847_v28, -inf }
0x2255   :  { %4852 = vmax.xlane.f32.xlu1 %v4851_v30  ;;  %v4848_v31 = vsel %vm725_vm11, %v4846_v29, -inf  ;;  %v6010_v30 = vld [vmem:[%s8772_s20 + $0x48] sm:$0xff] }
0x2256   :  { %4849 = vmax.xlane.f32.xlu0 %v4848_v31 }
0x22e2   :  { %v4853_v32 = vpop.xlane.xlu1 %4852 }
0x22e3   :  { %v4855_v33 = vsub.f32 %v4847_v28, %v4853_v32  ;;  %v4850_v61 = vpop.xlane.xlu0 %4849  ;;  %v6011_v32 = vld [vmem:[%s8772_s20 + $0x50] sm:$0xff] }
0x22e4   :  { %v4854_v35 = vsub.f32 %v4846_v29, %v4850_v61  ;;  %v6009_v29 = vld [vmem:[%s8772_s20 + $0x40] sm:$0xff] }
0x22e5   :  { %v4858_v36 = vmul.f32 1.442695, %v4855_v33  ;;  %v7238_v31 = vpack.c.bf16 %v6010_v30, %v6009_v29  ;;  %v6012_v33 = vld [vmem:[%s8772_s20 + $0x58] sm:$0xff] }
0x22e6   :  { %v4856_v12 = vmul.f32 1.442695, %v4854_v35  ;;  %v7242_v61 = vpack.c.bf16 %v6012_v33, %v6011_v32  ;;  %v6013_v35 = vld [vmem:[%s8772_s20 + $0x60] sm:$0xff]  ;;  %v5528_v32 = vld [vmem:[%s8776_s26 + $0x18] sm:$0xff] }
0x22e7   :  { %7400 = vpow2.f32 %v4858_v36  ;;  %7239 = vmatprep.subr.bf16.mxu0 %v7238_v31  ;;  %v6014_v36 = vld [vmem:[%s8772_s20 + $0x68] sm:$0xff]  ;;  %v5545_v33 = vld [vmem:[%s8776_s26 + $0xa0] sm:$0xff] }
0x22e8   :  { %7402 = vpow2.f32 %v4856_v12  ;;  %v7246_v12 = vpack.c.bf16 %v6014_v36, %v6013_v35 }
0x22f1   :  { %v7401_v15 = vpop.eup %7400 }
0x22f2   :  { %v7403_v37 = vpop.eup %7402  ;;  %v4863_v20 = vsel %vm729_vm10, %v7401_v15, 0.0 }
0x22f3   :  { %4864 = vadd.xlane.f32.xlu1 %v4863_v20  ;;  %v4860_v22 = vsel %vm725_vm11, %v7403_v37, 0.0 }
0x22f4   :  { %4861 = vadd.xlane.f32.xlu0 %v4860_v22  ;;  %v6006_v22 = vld [vmem:[%s8773_s19 + $0x1] ss:$0 sm:$0xff] }
0x2380   :  { %v4865_v40 = vpop.xlane.xlu1 %4864 }
0x2381   :  { %7404 = vrcp.f32 %v4865_v40  ;;  %v4862_v41 = vpop.xlane.xlu0 %4861 }
0x2382   :  { %7406 = vrcp.f32 %v4862_v41 }
0x238b   :  { %v7405_v42 = vpop.eup %7404 }
0x238c   :  { %v7407_v45 = vpop.eup %7406  ;;  %v4869_v47 = vmul.f32 %v7405_v42, %v7401_v15  ;;  %v6015_v15 = vld [vmem:[%s8772_s20 + $0x70] sm:$0xff] }
0x238d   :  { %v4868_v46 = vmul.f32 %v7407_v45, %v7403_v37  ;;  %v6016_v37 = vld [vmem:[%s8772_s20 + $0x78] sm:$0xff] }
0x238e   :  { %v7250_v20 = vpack.c.bf16 %v6016_v37, %v6015_v15  ;;  %v5530_v15 = vld [vmem:[%s8776_s26 + $0x28] sm:$0xff] }
0x238f   :  { %6778 = vmatprep.mubr.msk.f32.mxu1 %vm725_vm11, %v4868_v46 }
0x2390   :  { %6779 = vmatmul.mubr.msk.f32.vlgmr.msra.gmra.mrb[50].mxu1 %vm725_vm11, %v4869_v47 }
0x2391   :  { %7233 = vmatpush3.bf16.msra.mxu1 %v7230_v10  ;;  %v5338_v10 = vld [vmem:[%s8775_s24 + $0x8] sm:$0xff] }
0x2392   :  { %7235 = vmatprep.subr.bf16.mxu1 %v7234_v13  ;;  %v7254_v5 = vpack.c.bf16 %v5341_v11, %v5338_v10  ;;  %v5557_v11 = vld [vmem:[%s8776_s26 + $0x100] sm:$0xff] }
0x2395   :  { %7237 = vmatpush3.bf16.msra.mxu1 %v7234_v13  ;;  %v5337_v13 = vld [vmem:[%s8775_s24] sm:$0xff] }
0x2396   :  { %7255 = vmatprep.subr.bf16.mxu1 %v7254_v5  ;;  %v5558_v5 = vld [vmem:[%s8776_s26 + $0x108] sm:$0xff] }
0x2463   :  { %v6780_v48 = vpop.f32.mrb[50].mxu1 }
0x2464   :  { %v4945_v49 = vpop.f32.mrb[51].mxu1 }
0x2465   :  { %6783 = vmatprep.mubr.msk.f32.mxu0 %vm633_vm6, %v4945_v49 }
0x2466   :  { %6784 = vmatmul.mubr.msk.f32.vlgmr.msra.gmra.mrb[30].mxu0 %vm633_vm6, %v6780_v48 }
0x2467   :  { %7241 = vmatpush3.bf16.msra.mxu0 %v7238_v31  ;;  %v5527_v31 = vld [vmem:[%s8776_s26 + $0x10] sm:$0xff] }
0x2468   :  { %7243 = vmatprep.subr.bf16.mxu0 %v7242_v61  ;;  %v7274_v35 = vpack.c.bf16 %v5528_v32, %v5527_v31  ;;  %v5563_v31 = vld [vmem:[%s8776_s26 + $0x130] sm:$0xff]  ;;  %v5564_v32 = vld [vmem:[%s8776_s26 + $0x138] sm:$0xff] }
0x246b   :  { %7245 = vmatpush3.bf16.msra.mxu0 %v7242_v61  ;;  %v5546_v61 = vld [vmem:[%s8776_s26 + $0xa8] sm:$0xff] }
0x246c   :  { %7247 = vmatprep.subr.bf16.mxu0 %v7246_v12  ;;  %v7276_v36 = vpack.c.bf16 %v5546_v61, %v5545_v33  ;;  %v7310_v33 = vpack.c.bf16 %v5564_v32, %v5563_v31  ;;  %v5351_v61 = vlaneseq }
0x246f   :  { %7249 = vmatpush3.bf16.msra.mxu0 %v7246_v12  ;;  %v5529_v12 = vld [vmem:[%s8776_s26 + $0x20] sm:$0xff] }
0x2470   :  { %7251 = vmatprep.subr.bf16.mxu0 %v7250_v20  ;;  %v7278_v37 = vpack.c.bf16 %v5530_v15, %v5529_v12  ;;  %v5349_v12 = vld [vmem:[%s8779_s25] sm:$0x7] }
0x2473   :  { %7253 = vmatpush3.bf16.msra.mxu0 %v7250_v20 }
0x2539   :  { %v6785_v52 = vpop.f32.mrb[30].mxu0 }
0x253a   :  { %v5048_v55 = vadd.f32 %v6785_v52, %v5996_v51  ;;  %v5028_v57 = vpop.f32.mrb[31].mxu0 }
0x253b   :  { %v5047_v62 = vadd.f32 %v5996_v51, %v5028_v57 }
0x253c   :  { %v8500_v63 = vadd.f32 %v5048_v55, %v8137_v58 }
0x253d   :  { %v8503_v1 = vadd.f32 %v5047_v62, %v8140_v3 }
0x253e   :  { %v5058_v60 = vsel %vm328_vm4, %v8500_v63, 0.0 }
0x253f   :  { %5059 = vadd.xlane.f32.xlu1 %v5058_v60  ;;  %v5055_v2 = vsel %vm324_vm3, %v8503_v1, 0.0  ;;  %v6018_v60 = vld [vmem:[%s8774_s21 + $0x1] ss:$0 sm:$0xff] }
0x2540   :  { %5056 = vadd.xlane.f32.xlu0 %v5055_v2 }
0x25cc   :  { %v5060_v4 = vpop.xlane.xlu1 %5059 }
0x25cd   :  { %v5062_v56 = vmul.f32 0.03125, %v5060_v4  ;;  %v5057_v7 = vpop.xlane.xlu0 %5056 }
0x25ce   :  { %v5061_v59 = vmul.f32 0.03125, %v5057_v7 }
0x25cf   :  { %v5064_v8 = vsub.f32 %v8500_v63, %v5062_v56 }
0x25d0   :  { %v5063_v58 = vsub.f32 %v8503_v1, %v5061_v59 }
0x25d1   :  { %v5066_v6 = vmul.f32 %v5064_v8, %v5064_v8 }
0x25d2   :  { %v5065_v53 = vmul.f32 %v5063_v58, %v5063_v58 }
0x25d3   :  { %v5070_v3 = vsel %vm328_vm4, %v5066_v6, 0.0 }
0x25d4   :  { %5071 = vadd.xlane.f32.xlu1 %v5070_v3  ;;  %v5067_v34 = vsel %vm324_vm3, %v5065_v53, 0.0 }
0x25d5   :  { %5068 = vadd.xlane.f32.xlu0 %v5067_v34 }
0x2661   :  { %v5072_v43 = vpop.xlane.xlu1 %5071 }
0x2662   :  { %v5074_v39 = vmul.f32 0.03125, %v5072_v43  ;;  %v5069_v14 = vpop.xlane.xlu0 %5068  ;;  %v5340_v43 = vld [vmem:[%s8775_s24 + $0x18] sm:$0xff] }
0x2663   :  { %v5073_v16 = vmul.f32 0.03125, %v5069_v14  ;;  %v5344_v14 = vld [vmem:[%s8775_s24 + $0x38] sm:$0xff] }
0x2664   :  { %v5076_v17 = vadd.f32 1e-06, %v5074_v39  ;;  %v7256_v39 = vpack.c.bf16 %v5340_v43, %v5337_v13  ;;  %v7301_v13 = vpack.c.bf16 %v5558_v5, %v5557_v11  ;;  %v5553_v43 = vld [vmem:[%s8776_s26 + $0xe0] sm:$0xff] }
0x2665   :  { %v5075_v44 = vadd.f32 1e-06, %v5073_v16  ;;  %v5347_v16 = vld [vmem:[%s8775_s24 + $0x50] sm:$0xff] }
0x2666   :  { %7408 = vrsqrt.f32 %v5076_v17  ;;  %v7258_v17 = vpack.c.bf16 %v5347_v16, %v5344_v14  ;;  %v5537_v16 = vld [vmem:[%s8776_s26 + $0x60] sm:$0xff] }
0x2667   :  { %7410 = vrsqrt.f32 %v5075_v44  ;;  %v5343_v44 = vld [vmem:[%s8775_s24 + $0x30] sm:$0xff] }
0x2670   :  { %v7409_v18 = vpop.eup %7408 }
0x2671   :  { %v7411_v21 = vpop.eup %7410  ;;  %v5080_v23 = vmul.f32 %v7409_v18, %v5064_v8  ;;  %v5346_v18 = vld [vmem:[%s8775_s24 + $0x48] sm:$0xff] }
0x2672   :  { %v5079_v24 = vmul.f32 %v7411_v21, %v5063_v58  ;;  %v7428_v21 = vmov 0.0  }
0x2673   :  { %v5088_v50 = vmul.f32 %v5999_v19, %v5080_v23  ;;  %v5541_v23 = vld [vmem:[%s8776_s26 + $0x80] sm:$0xff] }
0x2674   :  { %v5087_v26 = vmul.f32 %v5999_v19, %v5079_v24  ;;  %v7260_v19 = vpack.c.bf16 %v5346_v18, %v5343_v44  ;;  %v5542_v24 = vld [vmem:[%s8776_s26 + $0x88] sm:$0xff]  ;;  %v5559_v18 = vld [vmem:[%s8776_s26 + $0x110] sm:$0xff] }
0x2675   :  { %v5096_v28 = vadd.f32 %v6000_v25, %v5088_v50  ;;  %v7268_v50 = vpack.c.bf16 %v5542_v24, %v5541_v23  ;;  %v5555_v23 = vld [vmem:[%s8776_s26 + $0xf0] sm:$0xff]  ;;  %v5556_v24 = vld [vmem:[%s8776_s26 + $0xf8] sm:$0xff] }
0x2676   :  { %v5095_v27 = vadd.f32 %v6000_v25, %v5087_v26  ;;  %v5525_v25 = vld [vmem:[%s8776_s26] sm:$0xff]  ;;  %v5526_v26 = vld [vmem:[%s8776_s26 + $0x8] sm:$0xff] }
0x2677   :  { %v7270_v29 = vpack.c.bf16 %v5526_v26, %v5525_v25  ;;  %7269 = vmatprep.subr.bf16.mxu0 %v7268_v50  ;;  %v7296_v25 = vpack.c.bf16 %v5556_v24, %v5555_v23  ;;  %v5539_v50 = vld [vmem:[%s8776_s26 + $0x70] sm:$0xff]  ;;  %v5540_v26 = vld [vmem:[%s8776_s26 + $0x78] sm:$0xff] }
0x2678   :  { %6794 = vmatprep.mubr.msk.f32.mxu1 %vm324_vm3, %v5095_v27  ;;  %v5543_v27 = vld [vmem:[%s8776_s26 + $0x90] sm:$0xff] }
0x2679   :  { %6795 = vmatmul.mubr.msk.f32.vlgmr.msra.gmra.mrb[52].mxu1 %vm324_vm3, %v5096_v28  ;;  %v5544_v28 = vld [vmem:[%s8776_s26 + $0x98] sm:$0xff] }
0x267a   :  { %7257 = vmatpush1.bf16.msra.mxu1 %v7256_v39  ;;  %5433 = vmatprep.mubr.f32.mxu1 %v7428_v21  ;;  %v7272_v30 = vpack.c.bf16 %v5544_v28, %v5543_v27  ;;  %v5554_v39 = vld [vmem:[%s8776_s26 + $0xe8] sm:$0xff]  ;;  %v7298_v27 = vpack.c.bf16 %v5540_v26, %v5539_v50  ;;  %v5561_v28 = vld [vmem:[%s8776_s26 + $0x120] sm:$0xff] }
0x267b   :  { %7259 = vmatprep.subr.bf16.mxu1 %v7258_v17  ;;  %v7292_v14 = vpack.c.bf16 %v5554_v39, %v5553_v43  ;;  %v5538_v17 = vld [vmem:[%s8776_s26 + $0x68] sm:$0xff] }
0x267c   :  { %v7294_v44 = vpack.c.bf16 %v5538_v17, %v5537_v16 }
0x267e   :  { %7261 = vmatpush1.bf16.msra.mxu1 %v7260_v19  ;;  %v5560_v19 = vld [vmem:[%s8776_s26 + $0x118] sm:$0xff] }
0x267f   :  { %7262 = vmatprep.subr.bf16.mxu1 %v7426_v0 }
0x274c   :  { %v6796_v38 = vpop.f32.mrb[52].mxu1 }
0x274d   :  { %v5188_v40 = vadd.f32 %v6796_v38, %v6006_v22  ;;  %v5182_v41 = vpop.f32.mrb[53].mxu1 }
0x274e   :  { %v5183_v42 = vadd.f32 %v6006_v22, %v5182_v41  ;;  %v6021_v41 = vld [vmem:[%s8777_s22] ss:$0 sm:$0xff] }
0x274f   :  { %v5194_v45 = vmul.f32 0.70710677, %v5188_v40  ;;  %v5192_v55 = vmul.f32 0.5, %v5188_v40 }
0x2750   :  { %v5193_v46 = vmul.f32 0.70710677, %v5183_v42  ;;  %v5191_v51 = vmul.f32 0.5, %v5183_v42 }
0x2751   :  { %7412 = verf.f32 %v5194_v45  ;;  %v5339_v45 = vld [vmem:[%s8775_s24 + $0x10] sm:$0xff] }
0x2752   :  { %7414 = verf.f32 %v5193_v46  ;;  %v5342_v46 = vld [vmem:[%s8775_s24 + $0x28] sm:$0xff] }
0x275b   :  { %v7413_v47 = vpop.eup %7412 }
0x275c   :  { %v7415_v48 = vpop.eup %7414  ;;  %v5198_v49 = vadd.f32 1.0, %v7413_v47  ;;  %v6022_v47 = vld [vmem:[%s8778_s23] ss:$0 sm:$0xff]  ;;  %s8825_s23 = sld [smem:[#allocation17_spill]] }
0x275d   :  { %v5197_v52 = vadd.f32 1.0, %v7415_v48 }
0x275e   :  { %v5200_v62 = vmul.f32 %v5198_v49, %v5192_v55  ;;  %v7263_v49 = vpack.c.bf16 %v5342_v46, %v5339_v45  ;;  %v5348_v55 = vld [vmem:[%s8775_s24 + $0x58] sm:$0xff] }
0x275f   :  { %v5199_v57 = vmul.f32 %v5197_v52, %v5191_v51  ;;  %v5345_v52 = vld [vmem:[%s8775_s24 + $0x40] sm:$0xff]  ;;  %s8826_s24 = sld [smem:[#allocation18_spill]] }
0x2761   :  { %6813 = vmatprep.mubr.msk.f32.mxu0 %vm126_vm0, %v5199_v57  ;;  %v7266_v57 = vpack.c.bf16 %v5348_v55, %v5345_v52 }
0x2762   :  { %6814 = vmatmul.mubr.msk.f32.vlgmr.msra.gmra.mrb[40].mxu0 %vm126_vm0, %v5200_v62  ;;  %v5547_v62 = vld [vmem:[%s8776_s26 + $0xb0] sm:$0xff] }
0x2763   :  { %7271 = vmatpush3.bf16.msra.mxu0 %v7270_v29  ;;  %v5562_v29 = vld [vmem:[%s8776_s26 + $0x128] sm:$0xff] }
0x2764   :  { %7273 = vmatprep.subr.bf16.mxu0 %v7272_v30  ;;  %v7307_v30 = vpack.c.bf16 %v5562_v29, %v5561_v28 }
0x2767   :  { %7275 = vmatpush3.bf16.msra.mxu0 %v7274_v35  ;;  %v5352_v35 = vshrl.u32 %v5351_v61, 7 }
0x2768   :  { %7277 = vmatprep.subr.bf16.mxu0 %v7276_v36 }
0x2769   :  { %v5353_v36 = vsub.s32 0, %v5352_v35  ;;  %v5357_v15 = vsub.s32 1, %v5352_v35 }
0x276b   :  { %7279 = vmatpush3.bf16.msra.mxu0 %v7278_v37  ;;  %v5354_v37 = vrot.slane %v5349_v12, %v5353_v36 }
0x2835   :  { %v6815_v2 = vpop.f32.mrb[40].mxu0 }
0x2836   :  { %v5296_v4 = vadd.f32 %v6815_v2, %v6018_v60  ;;  %v5290_v56 = vpop.f32.mrb[41].mxu0 }
0x2837   :  { %v5291_v7 = vadd.f32 %v6018_v60, %v5290_v56  ;;  %v5548_v60 = vld [vmem:[%s8776_s26 + $0xb8] sm:$0xff] }
0x2838   :  { %v5300_v59 = vadd.f32 %v5296_v4, %v8500_v63  ;;  %v7280_v2 = vpack.c.bf16 %v5548_v60, %v5547_v62  ;;  %v5531_v4 = vld [vmem:[%s8776_s26 + $0x30] sm:$0xff]  ;;  %v5532_v56 = vld [vmem:[%s8776_s26 + $0x38] sm:$0xff] }
0x2839   :  { %v5299_v8 = vadd.f32 %v5291_v7, %v8503_v1  ;;  %v7282_v7 = vpack.c.bf16 %v5532_v56, %v5531_v4 }
0x283a   :  { %5302 = vst.msk [vmem:[#allocation2 + $0x8] sm:$0x3] %vm328_vm4, %v5300_v59  ;;  %7281 = vmatprep.subr.bf16.mxu0 %v7280_v2  ;;  %v5549_v59 = vld [vmem:[%s8776_s26 + $0xc0] sm:$0xff] }
0x283b   :  { %5301 = vst.msk [vmem:[#allocation2] sm:$0xff] %vm324_vm3, %v5299_v8  ;;  %7283 = vmatpush3.bf16.msra.mxu0 %v7282_v7  ;;  %v5550_v8 = vld [vmem:[%s8776_s26 + $0xc8] sm:$0xff] }
0x2842   :  { %v5303_v58 = vld [vmem:[#allocation2] sm:$0x1]  ;;  %v5305_v6 = vld [vmem:[#allocation2 + $0x5] sm:$0x1] }
0x2843   :  { %5304 = vst.msk [vmem:[#allocation3] sm:$0x1] %vm200_vm1, %v5303_v58  ;;  %5306 = vst.msk [vmem:[#allocation3 + $0x1] sm:$0x1] %vm200_vm1, %v5305_v6  ;;  %v7284_v58 = vpack.c.bf16 %v5550_v8, %v5549_v59  ;;  %v5533_v6 = vld [vmem:[%s8776_s26 + $0x40] sm:$0xff] }
0x2845   :  { %7285 = vmatprep.subr.bf16.mxu0 %v7284_v58 }
0x284a   :  { %v5307_v53 = vld [vmem:[#allocation3] sm:$0x3] }
0x284b   :  { %v5310_v3 = vsel %vm328_vm4, %v5307_v53, 0.0 }
0x284c   :  { %5311 = vadd.xlane.f32.xlu0 %v5310_v3 }
0x28d9   :  { %v5312_v34 = vpop.xlane.xlu0 %5311 }
0x28da   :  { %v5313_v9 = vmul.f32 0.03125, %v5312_v34  ;;  %v5551_v34 = vld [vmem:[%s8776_s26 + $0xd0] sm:$0xff] }
0x28dc   :  { %v5314_v54 = vsub.f32 %v5307_v53, %v5313_v9  ;;  %v5534_v53 = vld [vmem:[%s8776_s26 + $0x48] sm:$0xff]  ;;  %v5552_v9 = vld [vmem:[%s8776_s26 + $0xd8] sm:$0xff] }
0x28dd   :  { %v7286_v3 = vpack.c.bf16 %v5534_v53, %v5533_v6 }
0x28de   :  { %v5315_v63 = vmul.f32 %v5314_v54, %v5314_v54 }
0x28df   :  { %7287 = vmatpush3.bf16.msra.mxu0 %v7286_v3  ;;  %v6025_v3 = vld [vmem:[%s8825_s23] ss:$0 sm:$0xff] }
0x28e0   :  { %v5316_v1 = vsel %vm328_vm4, %v5315_v63, 0.0  ;;  %v5535_v63 = vld [vmem:[%s8776_s26 + $0x50] sm:$0xff] }
0x28e1   :  { %5317 = vadd.xlane.f32.xlu1 %v5316_v1  ;;  %v5536_v1 = vld [vmem:[%s8776_s26 + $0x58] sm:$0xff] }
0x28e2   :  { %v7290_v10 = vpack.c.bf16 %v5536_v1, %v5535_v63 }
0x296e   :  { %v5318_v20 = vpop.xlane.xlu1 %5317 }
0x296f   :  { %v5319_v22 = vmul.f32 0.03125, %v5318_v20 }
0x2971   :  { %v5320_v38 = vadd.f32 1e-06, %v5319_v22 }
0x2973   :  { %7416 = vrsqrt.f32 %v5320_v38 }
0x297d   :  { %v7417_v40 = vpop.eup %7416 }
0x297e   :  { %v5322_v42 = vmul.f32 %v7417_v40, %v5314_v54  ;;  %v7288_v54 = vpack.c.bf16 %v5552_v9, %v5551_v34  ;;  %v5361_v40 = vsub.s32 2, %v5352_v35 }
0x2980   :  { %v5329_v48 = vmul.f32 %v6021_v41, %v5322_v42  ;;  %7289 = vmatprep.subr.bf16.mxu0 %v7288_v54  ;;  %v5362_v46 = vrot.slane %v5349_v12, %v5361_v40 }
0x2981   :  { %7291 = vmatpush3.bf16.msra.mxu0 %v7290_v10 }
0x2982   :  { %v5336_v51 = vadd.f32 %v6022_v47, %v5329_v48  ;;  %7293 = vmatprep.subr.bf16.mxu0 %v7292_v14 }
0x2984   :  { %6023 = vmatmul.mubr.msk.f32.vlgmr.msra.gmra.mrb[54].mxu1 %vm324_vm3, %v5336_v51 }
0x2985   :  { %7264 = vmatpush3.bf16.msra.mxu1 %v7263_v49  ;;  %6824 = vmatprep.mubr.msk.f32.mxu1 %vm7429_vm12, %v7428_v21 }
0x2986   :  { %7265 = vmatprep.subr.bf16.mxu1 %v7426_v0  ;;  %7295 = vmatpush3.bf16.msra.mxu0 %v7294_v44 }
0x2987   :  { %7297 = vmatprep.subr.bf16.mxu0 %v7296_v25 }
0x2989   :  { %7267 = vmatpush3.bf16.msra.mxu1 %v7266_v57 }
0x298a   :  { %7300 = vmatprep.subr.bf16.mxu1 %v7426_v0  ;;  %7299 = vmatpush3.bf16.msra.mxu0 %v7298_v27 }
0x298c   :  { %6825 = vmatmul.mubr.msk.f32.vlgmr.msra.gmra.mrb[56].mxu1 %vm324_vm3, %v5336_v51 }
0x298d   :  { %6843 = vmatprep.mubr.msk.f32.mxu1 %vm7429_vm12, %v7428_v21  ;;  %7302 = vmatpush3.bf16.msra.mxu1 %v7301_v13  ;;  %v7304_v21 = vpack.c.bf16 %v5560_v19, %v5559_v18 }
0x298e   :  { %7303 = vmatprep.subr.bf16.mxu1 %v7426_v0 }
0x2991   :  { %7305 = vmatpush3.bf16.msra.mxu1 %v7304_v21 }
0x2992   :  { %7306 = vmatprep.subr.bf16.mxu1 %v7426_v0 }
0x2995   :  { %7308 = vmatpush3.bf16.msra.mxu1 %v7307_v30 }
0x2996   :  { %7309 = vmatprep.subr.bf16.mxu1 %v7426_v0  ;;  %v5358_v0 = vrot.slane %v5349_v12, %v5357_v15 }
0x2999   :  { %7311 = vmatpush3.bf16.msra.mxu1 %v7310_v33 }
0x2a57   :  { %v5435_v20 = vpop.f32.mrb[54].mxu1 }
0x2a58   :  { %v5436_v22 = vadd.f32 %v5435_v20, %v5354_v37  ;;  %v5437_v38 = vpop.f32.mrb[55].mxu1 }
0x2a59   :  { %v5438_v41 = vadd.f32 %v5437_v38, %v5358_v0 }
0x2a5a   :  { %v5513_v42 = vmul.f32 0.70710677, %v5436_v22  ;;  %v5510_v2 = vmul.f32 0.5, %v5436_v22 }
0x2a5b   :  { %v5514_v45 = vmul.f32 0.70710677, %v5438_v41  ;;  %v5511_v62 = vmul.f32 0.5, %v5438_v41 }
0x2a5c   :  { %7418 = verf.f32 %v5513_v42 }
0x2a5d   :  { %7420 = verf.f32 %v5514_v45 }
0x2a5f   :  { %v5506_v47 = vpop.f32.mrb[56].mxu1 }
0x2a60   :  { %v5507_v48 = vadd.f32 %v5506_v47, %v5362_v46  ;;  %v6826_v49 = vpop.f32.mrb[57].mxu1 }
0x2a62   :  { %v5515_v51 = vmul.f32 0.70710677, %v5507_v48  ;;  %v5512_v59 = vmul.f32 0.5, %v5507_v48 }
0x2a64   :  { %7422 = verf.f32 %v5515_v51 }
0x2a66   :  { %v7419_v52 = vpop.eup %7418 }
0x2a67   :  { %v7421_v55 = vpop.eup %7420  ;;  %v5519_v57 = vadd.f32 1.0, %v7419_v52 }
0x2a68   :  { %v5520_v60 = vadd.f32 1.0, %v7421_v55 }
0x2a69   :  { %v5522_v56 = vmul.f32 %v5519_v57, %v5510_v2 }
0x2a6a   :  { %v5523_v4 = vmul.f32 %v5520_v60, %v5511_v62 }
0x2a6c   :  { %5639 = vmatprep.mubr.f32.mxu0 %v5523_v4 }
0x2a6d   :  { %5640 = vmatmul.mubr.f32.vlgmr.msra.gmra.mrb[42].mxu0 %v5522_v56 }
0x2a6e   :  { %v7423_v7 = vpop.eup %7422 }
0x2a6f   :  { %v5521_v8 = vadd.f32 1.0, %v7423_v7 }
0x2a71   :  { %v5524_v58 = vmul.f32 %v5521_v8, %v5512_v59 }
0x2a73   :  { %6844 = vmatmul.mubr.msk.f32.vlgmr.msra.gmra.mrb[58].mxu1 %vm126_vm0, %v5524_v58 }
0x2b40   :  { %v6328_v6 = vpop.f32.mrb[42].mxu0 }
0x2b41   :  { %v6329_v53 = vpop.f32.mrb[43].mxu0 }
0x2b42   :  { %v6330_v34 = vadd.f32 %v6329_v53, %v6328_v6 }
0x2b44   :  { %v5642_v9 = vadd.f32 %v6330_v34, %v6025_v3 }
0x2b46   :  { %v5711_v54 = vpop.f32.mrb[58].mxu1 }
0x2b47   :  { %v5712_v63 = vadd.f32 %v5711_v54, %v5642_v9  ;;  %v6845_v1 = vpop.f32.mrb[59].mxu1 }
0x2b49   :  { %5715 = vst [vmem:[%s8826_s24] sm:$0x3] %v5712_v63 }

</bundles_post_ra>
